<compile_context>
chip_gen: v7x
topology: tpu7x:2x2x1
jax: 0.10.0
libtpu: 0.0.40
codegen_flags: <defaults>
</compile_context>

<pallas_src>
import functools

import jax
import jax.numpy as jnp
from jax import lax
from jax.experimental import pallas as pl
from jax.experimental.pallas import tpu as pltpu


_LANE = 128                        # lane width: pad Cout to multiples of this
_VMEM_BUDGET = 24 * 1024 * 1024    # conservative per-call VMEM working-set target
_VMEM_LIMIT = 64 * 1024 * 1024     # scoped VMEM limit (<= v7x physical 64 MiB/TC)
_SMALL_M = 128                     # layers with fewer output pixels use jnp path


def _round_up(x, m):
    return ((x + m - 1) // m) * m


# --------------------------------------------------------------------------
# Pallas kernel: fused 4-tap (2x2 stride-1) conv tile = 4 shifted matmuls
# --------------------------------------------------------------------------
def _conv_tap_kernel(x_ref, xnext_ref, w_ref, b_ref, o_ref, *, taps, apply_relu):
    """y[q] = sum_t x_window[q + taps[t]] @ W[t] + b, LeakyReLU(0.2) optional.

    x_ref:     (tm, C4)      bf16  rows of this tile
    xnext_ref: (R,  C4)      bf16  first rows of the next tile (spill window)
    w_ref:     (4, C4, Coutp) bf16 per-tap weights (grid-invariant -> resident)
    b_ref:     (1, Coutp)    f32
    o_ref:     (tm, Coutp)   bf16 (intermediate layers) / f32 (final layer)
    """
    tm = x_ref.shape[0]
    # Row window [tile_start, tile_start + tm + R): own rows + spill rows.
    xw = jnp.concatenate([x_ref[...], xnext_ref[...]], axis=0)
    acc = None
    for t, d in enumerate(taps):          # static 4-way unroll
        part = jnp.dot(xw[d:d + tm, :], w_ref[t],
                       preferred_element_type=jnp.float32)
        acc = part if acc is None else acc + part
    acc = acc + b_ref[...]                # (1, Coutp) broadcast over rows
    if apply_relu:
        acc = jnp.where(acc >= 0, acc, 0.2 * acc)
    o_ref[...] = acc.astype(o_ref.dtype)


def _pick_tm(total_rows, r_unit, c4, coutp, out_bytes):
    """Largest M-tile (multiple of r_unit) whose VMEM working set fits budget."""
    # Grid-invariant / per-tile-constant allocations (double-buffered by the
    # default pipeline): spill block + tap weights (+ bias, negligible).
    const = 2 * (r_unit * c4 * 2) + 2 * (4 * c4 * coutp * 2)
    per_row = (4 * c4                    # double-buffered bf16 input block
               + 10 * c4                 # in-kernel concat + tap-slice temporaries
               + 4 * coutp               # f32 accumulator
               + 2 * coutp * out_bytes)  # double-buffered output block
    tm = max(r_unit, (_VMEM_BUDGET - const) // per_row)
    tm = max(r_unit, (tm // r_unit) * r_unit)
    cap = _round_up(total_rows, r_unit)  # never exceed the total work
    return int(min(tm, cap))


def conv4x4_s2_p1_pallas(x_nhwc, w_oihw, b, *, apply_relu, out_dtype):
    """Conv2d(k=4, s=2, p=1) + bias (+ LeakyReLU 0.2) as a fused Pallas kernel.

    x_nhwc: (N, H, W, Cin)   f32 or bf16
    w_oihw: (Cout, Cin, 4, 4) f32 (PyTorch layout)
    b:      (Cout,)           f32
    returns (N, H//2, W//2, Cout) in out_dtype
    """
    N, H, W, Cin = x_nhwc.shape
    assert H % 2 == 0 and W % 2 == 0, (H, W)
    Cout = w_oihw.shape[0]
    Ho, Wo = H // 2, W // 2
    Hs, Ws = Ho + 1, Wo + 1            # padded-image spatial dims / 2
    C4 = 4 * Cin                       # space-to-depth channel count
    Coutp = _round_up(Cout, _LANE)     # lane-dense output stores
    P = N * Hs * Ws                    # flattened (fringe-included) row count

    # --- glue (single XLA pass): pad + space-to-depth(2) + flatten ---
    # TODO(synk): fuse this pad/space-to-depth pass into the kernel via manual
    # DMA from the raw NHWC activation to save the remaining ~2x glue traffic.
    xp = jnp.pad(x_nhwc, ((0, 0), (1, 1), (1, 1), (0, 0)))
    xs = xp.reshape(N, Hs, 2, Ws, 2, Cin).transpose(0, 1, 3, 2, 4, 5)
    xsf = xs.reshape(P, C4).astype(jnp.bfloat16)

    # Row-window geometry: tap offsets in the flattened row space.
    taps = (0, 1, Ws, Ws + 1)
    r_unit = _round_up(Ws + 1, 16)     # spill-block rows (bf16 sublane aligned)
    out_bytes = jnp.dtype(out_dtype).itemsize
    tm = _pick_tm(P, r_unit, C4, Coutp, out_bytes)
    Mp = _round_up(P, tm)
    n_m = Mp // tm
    spill_stride = tm // r_unit        # (r_unit)-blocks per M tile

    # Zero rows so the last tile's spill window stays in bounds.
    xsf = jnp.pad(xsf, ((0, Mp + tm - P), (0, 0)))

    # Weights: (Cout, Cin, kh, kw) -> (tap=(i,j), k=(a,b,ci), Coutp),
    # with kh = 2i + a, kw = 2j + b matching the space-to-depth channel order.
    wt = w_oihw.reshape(Cout, Cin, 2, 2, 2, 2).transpose(2, 4, 3, 5, 1, 0)
    wt = wt.reshape(4, C4, Cout)
    wt = jnp.pad(wt, ((0, 0), (0, 0), (0, Coutp - Cout))).astype(jnp.bfloat16)
    bm = jnp.pad(b, (0, Coutp - Cout)).reshape(1, Coutp).astype(jnp.float32)

    cost = pl.CostEstimate(
        flops=2 * Mp * C4 * 4 * Coutp,
        transcendentals=0,
        bytes_accessed=int(xsf.size) * 2 + int(wt.size) * 2 + int(bm.size) * 4
                       + Mp * Coutp * out_bytes)

    out = pl.pallas_call(
        functools.partial(_conv_tap_kernel, taps=taps, apply_relu=apply_relu),
        out_shape=jax.ShapeDtypeStruct((Mp, Coutp), out_dtype),
        grid=(n_m,),
        in_specs=[
            # this tile's rows
            pl.BlockSpec((tm, C4), lambda m: (m, 0)),
            # spill window: first r_unit rows of the next tile
            pl.BlockSpec((r_unit, C4),
                         lambda m, s=spill_stride: ((m + 1) * s, 0)),
            # grid-invariant tap weights + bias (fetched once, stay resident)
            pl.BlockSpec((4, C4, Coutp), lambda m: (0, 0, 0)),
            pl.BlockSpec((1, Coutp), lambda m: (0, 0)),
        ],
        out_specs=pl.BlockSpec((tm, Coutp), lambda m: (m, 0)),
        compiler_params=pltpu.CompilerParams(
            dimension_semantics=("parallel",),      # v7x dual-TC sharding
            vmem_limit_bytes=_VMEM_LIMIT),
        cost_estimate=cost,
    )(xsf, xsf, wt, bm)

    # Drop fringe rows (wo == Ws-1, ho == Ho) and padded rows / channels.
    # Under jit this crop fuses with the next layer's pad + space-to-depth.
    out = out[:P].reshape(N, Hs, Ws, Coutp)[:, :Ho, :Wo, :Cout]
    return out


def conv4x4_s2_p1_small(x_nhwc, w_oihw, b, *, apply_relu):
    """Tiny-layer fallback (a handful of output pixels): jnp im2col + einsum."""
    N, H, W, Cin = x_nhwc.shape
    Cout = w_oihw.shape[0]
    Ho, Wo = H // 2, W // 2
    xp = jnp.pad(x_nhwc.astype(jnp.float32), ((0, 0), (1, 1), (1, 1), (0, 0)))
    cols = [xp[:, kh:kh + 2 * Ho:2, kw:kw + 2 * Wo:2, :]
            for kh in range(4) for kw in range(4)]
    patches = jnp.concatenate(cols, axis=-1)                    # (N,Ho,Wo,16*Cin)
    wm = jnp.transpose(w_oihw, (2, 3, 1, 0)).reshape(16 * Cin, Cout)
    out = jnp.einsum('nhwk,kc->nhwc', patches, wm.astype(jnp.float32))
    out = out + b.reshape(1, 1, 1, Cout)
    if apply_relu:
        out = jnp.where(out >= 0, out, 0.2 * out)
    return out


def init_params(key, num_classes, ndf):
    """Deterministic synthetic parameters (shapes match the PyTorch module)."""
    chans = [(num_classes, ndf),
             (ndf, ndf * 2),
             (ndf * 2, ndf * 4),
             (ndf * 4, ndf * 8),
             (ndf * 8, 1)]
    params = []
    for (cin, cout) in chans:
        key, kw, kb = jax.random.split(key, 3)
        fan_in = cin * 4 * 4
        scale = 1.0 / jnp.sqrt(fan_in)
        w = jax.random.uniform(kw, (cout, cin, 4, 4), jnp.float32, -scale, scale)
        b = jax.random.uniform(kb, (cout,), jnp.float32, -scale, scale)
        params.append((w, b))
    return params


def fc_discriminator_forward(x_nchw, params):
    """Matches FCDiscriminator.forward. Input/output are NCHW like PyTorch."""
    x = jnp.transpose(x_nchw, (0, 2, 3, 1))   # NCHW -> NHWC
    n_layers = len(params)
    for i, (w, b) in enumerate(params):
        relu = i < n_layers - 1
        N, H, W, _ = x.shape
        Cout = w.shape[0]
        M = N * (H // 2) * (W // 2)
        if M >= _SMALL_M and Cout > 1:
            x = conv4x4_s2_p1_pallas(
                x, w, b, apply_relu=relu,
                out_dtype=jnp.bfloat16 if relu else jnp.float32)
        else:
            # Launch/step-overhead bound tail layers and the Cout=1 head.
            x = conv4x4_s2_p1_small(x, w, b, apply_relu=relu)
    return jnp.transpose(x.astype(jnp.float32), (0, 3, 1, 2))   # NHWC -> NCHW


def _reference_forward(x_nchw, params):
    """Pure-JAX f32 reference (lax.conv) for correctness checking."""
    x = x_nchw
    n_layers = len(params)
    for i, (w, b) in enumerate(params):
        x = lax.conv_general_dilated(
            x, w, window_strides=(2, 2), padding=((1, 1), (1, 1)),
            dimension_numbers=("NCHW", "OIHW", "NCHW"))
        x = x + b.reshape(1, -1, 1, 1)
        if i < n_layers - 1:
            x = jnp.where(x >= 0, x, 0.2 * x)
    return x


if __name__ == "__main__":
    # Small shapes consistent with the module: 5 stride-2 convs need H,W >= 32.
    num_classes, ndf = 4, 8
    N, H, W = 2, 32, 32

    key = jax.random.PRNGKey(0)
    key, kx = jax.random.split(key)
    x = jax.random.normal(kx, (N, num_classes, H, W), jnp.float32)
    params = init_params(key, num_classes, ndf)

    fwd = jax.jit(fc_discriminator_forward)
    out = jax.block_until_ready(fwd(x, params))
    ref = jax.block_until_ready(_reference_forward(x, params))

    assert out.shape == (N, 1, 1, 1), out.shape
    # bf16 matmul operands and bf16 intermediate activations with f32
    # accumulation: tolerance loosened vs the f32 reference.
    assert jnp.allclose(out, ref, atol=2e-2, rtol=5e-2), (
        "mismatch vs reference", float(jnp.max(jnp.abs(out - ref))))
    print("KERNEL_OK")
</pallas_src>

<mosaic_0001>
module attributes {stable_mosaic.version = 11 : i64} {
  func.func @_conv_tap_kernel(%arg0: i32, %arg1: memref<608x16xbf16, #tpu.memory_space<vmem>>, %arg2: memref<32x16xbf16, #tpu.memory_space<vmem>>, %arg3: memref<4x16x128xbf16, #tpu.memory_space<vmem>>, %arg4: memref<1x128xf32, #tpu.memory_space<vmem>>, %arg5: memref<608x128xbf16, #tpu.memory_space<vmem>>) attributes {dimension_semantics = [#tpu.dimension_semantics<parallel>], iteration_bounds = array<i64: 1>, scalar_prefetch = 0 : i64, scratch_operands = 0 : i64, tpu.core_type = #tpu.core_type<tc>, window_params = [{transform_indices = @transform_0, window_bounds = array<i64: 608, 16>}, {transform_indices = @transform_1, window_bounds = array<i64: 32, 16>}, {pipeline_mode = #tpu.pipeline_mode<synchronous>, transform_indices = @transform_2, window_bounds = array<i64: 4, 16, 128>}, {pipeline_mode = #tpu.pipeline_mode<synchronous>, transform_indices = @transform_3, window_bounds = array<i64: 1, 128>}, {transform_indices = @transform_4, window_bounds = array<i64: 608, 128>}]} {
    %c0 = arith.constant 0 : index
    %c0_0 = arith.constant 0 : index
    %0 = vector.load %arg1[%c0, %c0_0] : memref<608x16xbf16, #tpu.memory_space<vmem>>, vector<608x16xbf16>
    %c0_1 = arith.constant 0 : index
    %c0_2 = arith.constant 0 : index
    %1 = vector.load %arg2[%c0_1, %c0_2] : memref<32x16xbf16, #tpu.memory_space<vmem>>, vector<32x16xbf16>
    %2 = tpu.concatenate %0, %1 in 0 : vector<608x16xbf16>, vector<32x16xbf16> -> vector<640x16xbf16>
    %3 = vector.extract_strided_slice %2 {offsets = [0, 0], sizes = [608, 16], strides = [1, 1]} : vector<640x16xbf16> to vector<608x16xbf16>
    %c0_3 = arith.constant 0 : index
    %c0_4 = arith.constant 0 : index
    %c0_5 = arith.constant 0 : index
    %4 = vector.load %arg3[%c0_3, %c0_4, %c0_5] : memref<4x16x128xbf16, #tpu.memory_space<vmem>>, vector<1x16x128xbf16>
    %5 = vector.shape_cast %4 : vector<1x16x128xbf16> to vector<16x128xbf16>
    %cst = arith.constant dense<0.000000e+00> : vector<608x128xf32>
    %6 = tpu.matmul %3, %5, %cst {dimension_numbers = #tpu.dot_dimension_numbers<[1], [0], [0], [1], [0, 0, 1, 1], [], []>} : vector<608x16xbf16>, vector<16x128xbf16>, vector<608x128xf32> -> vector<608x128xf32>
    %7 = vector.extract_strided_slice %2 {offsets = [1, 0], sizes = [608, 16], strides = [1, 1]} : vector<640x16xbf16> to vector<608x16xbf16>
    %c1 = arith.constant 1 : index
    %c0_6 = arith.constant 0 : index
    %c0_7 = arith.constant 0 : index
    %8 = vector.load %arg3[%c1, %c0_6, %c0_7] : memref<4x16x128xbf16, #tpu.memory_space<vmem>>, vector<1x16x128xbf16>
    %9 = vector.shape_cast %8 : vector<1x16x128xbf16> to vector<16x128xbf16>
    %cst_8 = arith.constant dense<0.000000e+00> : vector<608x128xf32>
    %10 = tpu.matmul %7, %9, %cst_8 {dimension_numbers = #tpu.dot_dimension_numbers<[1], [0], [0], [1], [0, 0, 1, 1], [], []>} : vector<608x16xbf16>, vector<16x128xbf16>, vector<608x128xf32> -> vector<608x128xf32>
    %11 = arith.addf %6, %10 : vector<608x128xf32>
    %12 = vector.extract_strided_slice %2 {offsets = [17, 0], sizes = [608, 16], strides = [1, 1]} : vector<640x16xbf16> to vector<608x16xbf16>
    %c2 = arith.constant 2 : index
    %c0_9 = arith.constant 0 : index
    %c0_10 = arith.constant 0 : index
    %13 = vector.load %arg3[%c2, %c0_9, %c0_10] : memref<4x16x128xbf16, #tpu.memory_space<vmem>>, vector<1x16x128xbf16>
    %14 = vector.shape_cast %13 : vector<1x16x128xbf16> to vector<16x128xbf16>
    %cst_11 = arith.constant dense<0.000000e+00> : vector<608x128xf32>
    %15 = tpu.matmul %12, %14, %cst_11 {dimension_numbers = #tpu.dot_dimension_numbers<[1], [0], [0], [1], [0, 0, 1, 1], [], []>} : vector<608x16xbf16>, vector<16x128xbf16>, vector<608x128xf32> -> vector<608x128xf32>
    %16 = arith.addf %11, %15 : vector<608x128xf32>
    %17 = vector.extract_strided_slice %2 {offsets = [18, 0], sizes = [608, 16], strides = [1, 1]} : vector<640x16xbf16> to vector<608x16xbf16>
    %c3 = arith.constant 3 : index
    %c0_12 = arith.constant 0 : index
    %c0_13 = arith.constant 0 : index
    %18 = vector.load %arg3[%c3, %c0_12, %c0_13] : memref<4x16x128xbf16, #tpu.memory_space<vmem>>, vector<1x16x128xbf16>
    %19 = vector.shape_cast %18 : vector<1x16x128xbf16> to vector<16x128xbf16>
    %cst_14 = arith.constant dense<0.000000e+00> : vector<608x128xf32>
    %20 = tpu.matmul %17, %19, %cst_14 {dimension_numbers = #tpu.dot_dimension_numbers<[1], [0], [0], [1], [0, 0, 1, 1], [], []>} : vector<608x16xbf16>, vector<16x128xbf16>, vector<608x128xf32> -> vector<608x128xf32>
    %21 = arith.addf %16, %20 : vector<608x128xf32>
    %c0_15 = arith.constant 0 : index
    %c0_16 = arith.constant 0 : index
    %22 = vector.load %arg4[%c0_15, %c0_16] : memref<1x128xf32, #tpu.memory_space<vmem>>, vector<1x128xf32>
    %23 = vector.broadcast %22 : vector<1x128xf32> to vector<608x128xf32>
    %24 = arith.addf %21, %23 : vector<608x128xf32>
    %cst_17 = arith.constant 0.000000e+00 : f32
    %25 = vector.broadcast %cst_17 : f32 to vector<608x128xf32>
    %26 = arith.cmpf oge, %24, %25 : vector<608x128xf32>
    %cst_18 = arith.constant 2.000000e-01 : f32
    %27 = vector.broadcast %cst_18 : f32 to vector<608x128xf32>
    %28 = arith.mulf %27, %24 : vector<608x128xf32>
    %29 = arith.select %26, %24, %28 : vector<608x128xi1>, vector<608x128xf32>
    %30 = arith.truncf %29 : vector<608x128xf32> to vector<608x128xbf16>
    %c0_19 = arith.constant 0 : index
    %c0_20 = arith.constant 0 : index
    %31 = vector.load %arg5[%c0_19, %c0_20] : memref<608x128xbf16, #tpu.memory_space<vmem>>, vector<608x128xbf16>
    tpu.vector_store %arg5[%c0_19, %c0_20], %30 {strides = array<i32>} : memref<608x128xbf16, #tpu.memory_space<vmem>>, vector<608x128xbf16>,
    return
  }
  func.func @transform_0(%arg0: i32) -> (i32, i32) {
    %c0_i32 = arith.constant 0 : i32
    %c0_i32_0 = arith.constant 0 : i32
    return %arg0, %c0_i32 : i32, i32
  }
  func.func @transform_1(%arg0: i32) -> (i32, i32) {
    %c1_i32 = arith.constant 1 : i32
    %0 = arith.addi %arg0, %c1_i32 : i32
    %c19_i32 = arith.constant 19 : i32
    %1 = arith.muli %0, %c19_i32 : i32
    %c0_i32 = arith.constant 0 : i32
    %c0_i32_0 = arith.constant 0 : i32
    return %1, %c0_i32 : i32, i32
  }
  func.func @transform_2(%arg0: i32) -> (i32, i32, i32) {
    %c0_i32 = arith.constant 0 : i32
    %c0_i32_0 = arith.constant 0 : i32
    %c0_i32_1 = arith.constant 0 : i32
    %c0_i32_2 = arith.constant 0 : i32
    return %c0_i32, %c0_i32_0, %c0_i32_1 : i32, i32, i32
  }
  func.func @transform_3(%arg0: i32) -> (i32, i32) {
    %c0_i32 = arith.constant 0 : i32
    %c0_i32_0 = arith.constant 0 : i32
    %c0_i32_1 = arith.constant 0 : i32
    return %c0_i32, %c0_i32_0 : i32, i32
  }
  func.func @transform_4(%arg0: i32) -> (i32, i32) {
    %c0_i32 = arith.constant 0 : i32
    %c0_i32_0 = arith.constant 0 : i32
    return %arg0, %c0_i32 : i32, i32
  }
}

module attributes {stable_mosaic.version = 11 : i64} {
  func.func @_conv_tap_kernel(%arg0: i32, %arg1: memref<176x32xbf16, #tpu.memory_space<vmem>>, %arg2: memref<16x32xbf16, #tpu.memory_space<vmem>>, %arg3: memref<4x32x128xbf16, #tpu.memory_space<vmem>>, %arg4: memref<1x128xf32, #tpu.memory_space<vmem>>, %arg5: memref<176x128xbf16, #tpu.memory_space<vmem>>) attributes {dimension_semantics = [#tpu.dimension_semantics<parallel>], iteration_bounds = array<i64: 1>, scalar_prefetch = 0 : i64, scratch_operands = 0 : i64, tpu.core_type = #tpu.core_type<tc>, window_params = [{transform_indices = @transform_0, window_bounds = array<i64: 176, 32>}, {transform_indices = @transform_1, window_bounds = array<i64: 16, 32>}, {pipeline_mode = #tpu.pipeline_mode<synchronous>, transform_indices = @transform_2, window_bounds = array<i64: 4, 32, 128>}, {pipeline_mode = #tpu.pipeline_mode<synchronous>, transform_indices = @transform_3, window_bounds = array<i64: 1, 128>}, {transform_indices = @transform_4, window_bounds = array<i64: 176, 128>}]} {
    %c0 = arith.constant 0 : index
    %c0_0 = arith.constant 0 : index
    %0 = vector.load %arg1[%c0, %c0_0] : memref<176x32xbf16, #tpu.memory_space<vmem>>, vector<176x32xbf16>
    %c0_1 = arith.constant 0 : index
    %c0_2 = arith.constant 0 : index
    %1 = vector.load %arg2[%c0_1, %c0_2] : memref<16x32xbf16, #tpu.memory_space<vmem>>, vector<16x32xbf16>
    %2 = tpu.concatenate %0, %1 in 0 : vector<176x32xbf16>, vector<16x32xbf16> -> vector<192x32xbf16>
    %3 = vector.extract_strided_slice %2 {offsets = [0, 0], sizes = [176, 32], strides = [1, 1]} : vector<192x32xbf16> to vector<176x32xbf16>
    %c0_3 = arith.constant 0 : index
    %c0_4 = arith.constant 0 : index
    %c0_5 = arith.constant 0 : index
    %4 = vector.load %arg3[%c0_3, %c0_4, %c0_5] : memref<4x32x128xbf16, #tpu.memory_space<vmem>>, vector<1x32x128xbf16>
    %5 = vector.shape_cast %4 : vector<1x32x128xbf16> to vector<32x128xbf16>
    %cst = arith.constant dense<0.000000e+00> : vector<176x128xf32>
    %6 = tpu.matmul %3, %5, %cst {dimension_numbers = #tpu.dot_dimension_numbers<[1], [0], [0], [1], [0, 0, 1, 1], [], []>} : vector<176x32xbf16>, vector<32x128xbf16>, vector<176x128xf32> -> vector<176x128xf32>
    %7 = vector.extract_strided_slice %2 {offsets = [1, 0], sizes = [176, 32], strides = [1, 1]} : vector<192x32xbf16> to vector<176x32xbf16>
    %c1 = arith.constant 1 : index
    %c0_6 = arith.constant 0 : index
    %c0_7 = arith.constant 0 : index
    %8 = vector.load %arg3[%c1, %c0_6, %c0_7] : memref<4x32x128xbf16, #tpu.memory_space<vmem>>, vector<1x32x128xbf16>
    %9 = vector.shape_cast %8 : vector<1x32x128xbf16> to vector<32x128xbf16>
    %cst_8 = arith.constant dense<0.000000e+00> : vector<176x128xf32>
    %10 = tpu.matmul %7, %9, %cst_8 {dimension_numbers = #tpu.dot_dimension_numbers<[1], [0], [0], [1], [0, 0, 1, 1], [], []>} : vector<176x32xbf16>, vector<32x128xbf16>, vector<176x128xf32> -> vector<176x128xf32>
    %11 = arith.addf %6, %10 : vector<176x128xf32>
    %12 = vector.extract_strided_slice %2 {offsets = [9, 0], sizes = [176, 32], strides = [1, 1]} : vector<192x32xbf16> to vector<176x32xbf16>
    %c2 = arith.constant 2 : index
    %c0_9 = arith.constant 0 : index
    %c0_10 = arith.constant 0 : index
    %13 = vector.load %arg3[%c2, %c0_9, %c0_10] : memref<4x32x128xbf16, #tpu.memory_space<vmem>>, vector<1x32x128xbf16>
    %14 = vector.shape_cast %13 : vector<1x32x128xbf16> to vector<32x128xbf16>
    %cst_11 = arith.constant dense<0.000000e+00> : vector<176x128xf32>
    %15 = tpu.matmul %12, %14, %cst_11 {dimension_numbers = #tpu.dot_dimension_numbers<[1], [0], [0], [1], [0, 0, 1, 1], [], []>} : vector<176x32xbf16>, vector<32x128xbf16>, vector<176x128xf32> -> vector<176x128xf32>
    %16 = arith.addf %11, %15 : vector<176x128xf32>
    %17 = vector.extract_strided_slice %2 {offsets = [10, 0], sizes = [176, 32], strides = [1, 1]} : vector<192x32xbf16> to vector<176x32xbf16>
    %c3 = arith.constant 3 : index
    %c0_12 = arith.constant 0 : index
    %c0_13 = arith.constant 0 : index
    %18 = vector.load %arg3[%c3, %c0_12, %c0_13] : memref<4x32x128xbf16, #tpu.memory_space<vmem>>, vector<1x32x128xbf16>
    %19 = vector.shape_cast %18 : vector<1x32x128xbf16> to vector<32x128xbf16>
    %cst_14 = arith.constant dense<0.000000e+00> : vector<176x128xf32>
    %20 = tpu.matmul %17, %19, %cst_14 {dimension_numbers = #tpu.dot_dimension_numbers<[1], [0], [0], [1], [0, 0, 1, 1], [], []>} : vector<176x32xbf16>, vector<32x128xbf16>, vector<176x128xf32> -> vector<176x128xf32>
    %21 = arith.addf %16, %20 : vector<176x128xf32>
    %c0_15 = arith.constant 0 : index
    %c0_16 = arith.constant 0 : index
    %22 = vector.load %arg4[%c0_15, %c0_16] : memref<1x128xf32, #tpu.memory_space<vmem>>, vector<1x128xf32>
    %23 = vector.broadcast %22 : vector<1x128xf32> to vector<176x128xf32>
    %24 = arith.addf %21, %23 : vector<176x128xf32>
    %cst_17 = arith.constant 0.000000e+00 : f32
    %25 = vector.broadcast %cst_17 : f32 to vector<176x128xf32>
    %26 = arith.cmpf oge, %24, %25 : vector<176x128xf32>
    %cst_18 = arith.constant 2.000000e-01 : f32
    %27 = vector.broadcast %cst_18 : f32 to vector<176x128xf32>
    %28 = arith.mulf %27, %24 : vector<176x128xf32>
    %29 = arith.select %26, %24, %28 : vector<176x128xi1>, vector<176x128xf32>
    %30 = arith.truncf %29 : vector<176x128xf32> to vector<176x128xbf16>
    %c0_19 = arith.constant 0 : index
    %c0_20 = arith.constant 0 : index
    %31 = vector.load %arg5[%c0_19, %c0_20] : memref<176x128xbf16, #tpu.memory_space<vmem>>, vector<176x128xbf16>
    tpu.vector_store %arg5[%c0_19, %c0_20], %30 {strides = array<i32>} : memref<176x128xbf16, #tpu.memory_space<vmem>>, vector<176x128xbf16>,
    return
  }
  func.func @transform_0(%arg0: i32) -> (i32, i32) {
    %c0_i32 = arith.constant 0 : i32
    %c0_i32_0 = arith.constant 0 : i32
    return %arg0, %c0_i32 : i32, i32
  }
  func.func @transform_1(%arg0: i32) -> (i32, i32) {
    %c1_i32 = arith.constant 1 : i32
    %0 = arith.addi %arg0, %c1_i32 : i32
    %c11_i32 = arith.constant 11 : i32
    %1 = arith.muli %0, %c11_i32 : i32
    %c0_i32 = arith.constant 0 : i32
    %c0_i32_0 = arith.constant 0 : i32
    return %1, %c0_i32 : i32, i32
  }
  func.func @transform_2(%arg0: i32) -> (i32, i32, i32) {
    %c0_i32 = arith.constant 0 : i32
    %c0_i32_0 = arith.constant 0 : i32
    %c0_i32_1 = arith.constant 0 : i32
    %c0_i32_2 = arith.constant 0 : i32
    return %c0_i32, %c0_i32_0, %c0_i32_1 : i32, i32, i32
  }
  func.func @transform_3(%arg0: i32) -> (i32, i32) {
    %c0_i32 = arith.constant 0 : i32
    %c0_i32_0 = arith.constant 0 : i32
    %c0_i32_1 = arith.constant 0 : i32
    return %c0_i32, %c0_i32_0 : i32, i32
  }
  func.func @transform_4(%arg0: i32) -> (i32, i32) {
    %c0_i32 = arith.constant 0 : i32
    %c0_i32_0 = arith.constant 0 : i32
    return %arg0, %c0_i32 : i32, i32
  }
}

</mosaic_0001>

<bundles_post_ra>
// kernel: fc_discriminator_forward.2
= control target key start
LH: loop header
LB: loop body
LE: loop exit
PB: predicated region body
PF: predicated region fallthrough
CT: control target
= control target key end

     0   :  { %9 = vsyncpa [#allocation3], 0  ;;  %s5406_s0 = inlined_call_operand.hbm [shape: bf16[1216,16], index: 0, kind: input, shape index: {}, may-alias: {0,1}]   ;;  %s5407_s1 = inlined_call_operand.hbm [shape: bf16[1216,16], index: 1, kind: input, shape index: {}, may-alias: {0,1}]   ;;  %s5408_s2 = inlined_call_operand.hbm [shape: bf16[4,16,128], index: 2, kind: input, shape index: {}]   ;;  %s5409_s3 = inlined_call_operand.hbm [shape: f32[1,128], index: 3, kind: input, shape index: {}]   ;;  %s5410_s4 = inlined_call_operand.hbm [shape: bf16[608,128], index: 4, kind: output, shape index: {}]  }
   0x1   :  { %10 = vsyncpa [#allocation6], 0 }
   0x2   :  { %11 = vsyncpa [#allocation9], 0 }
   0x3   :  { %12 = vsyncpa [#allocation4], 0  ;;  %s3308_s17 = scalar_lea.hbm %s5407_s1, 4864  ;;  %s4754_s18 = smov [#allocation5]  }
   0x4   :  { %s35_s19 = sshll.u32 %s4754_s18, 4  ;;  %s4755_s20 = smov [#allocation2]   ;;  %s36_s19 = int_to_ptr.vmem [resolvable:$true] %s35_s19 }
   0x5   :  { %s18_s21 = sshll.u32 %s4755_s20, 4  ;;  %s4657_s24 = scalar_lea.hbm %s5407_s1, 5120  ;;  %s19_s21 = int_to_ptr.vmem [resolvable:$true] %s18_s21 }
   0x6   :  { %p4634_p0 = scmp.ne.s32.totalorder %s3308_s17, %s4657_s24  ;;  %s4635_s27 = scalar_lea.hbm %s5407_s1, 9728 }
   0x7   :  { %p4636_p1 = scmp.lt.u32.totalorder %s3308_s17, %s5407_s1  ;;  %p4637_p2 = scmp.lt.u32.totalorder %s4635_s27, %s4657_s24 }
   0x8   :  { %p4639_p4 = scmp.lt.u32.totalorder %s4657_s24, %s3308_s17 }
   0x9   :  { %p4638_p3 = por %p4637_p2, %p4636_p1 }
   0xb   :  { %p4640_p5 = por %p4639_p4, %p4638_p3 }
   0xd   :  { %p4641_p6 = pnand %p4640_p5, %p4634_p0 }
   0xf   :  { %4644 = shalt.err (!%p4641_p6)
}
  0x10   :  { %s4645_s30 = scalar_lea.vmem %s36_s19, 256  ;;  %p4650_p8 = scmp.lt.s32.totalorder %s36_s19, %s36_s19 }
  0x11   :  { %p4646_p7 = scmp.ne.s32.totalorder %s36_s19, %s4645_s30  ;;  %p4651_p9 = scmp.lt.s32.totalorder %s4645_s30, %s4645_s30 }
  0x13   :  { %p4652_p10 = por %p4651_p9, %p4650_p8 }
  0x15   :  { %p4653_p11 = pnand %p4652_p10, %p4646_p7 }
  0x17   :  { %4656 = shalt.err (!%p4653_p11)
}
  0x18   :  { %s4756_s5 = smov 64   ;;  %s4757_s6 = smov 4  }
  0x19   :  { %41 = dma.hbm_to_vmem [thread:$0]  %s3308_s17, 256, %s36_s19, [#allocation6], %s4756_s5, %s4756_s5, %s4757_s6  }
  0x1a   :  { %s4658_s8 = scalar_lea.hbm %s5406_s0, 4864  ;;  %s4660_s13 = scalar_lea.hbm %s5406_s0, 9728 }
  0x1b   :  { %p4659_p12 = scmp.ne.s32.totalorder %s5406_s0, %s4658_s8  ;;  %p4661_p13 = scmp.lt.u32.totalorder %s4660_s13, %s4658_s8 }
  0x1c   :  { %p4662_p0 = scmp.lt.u32.totalorder %s4658_s8, %s5406_s0 }
  0x1e   :  { %p4663_p1 = por %p4662_p0, %p4661_p13 }
  0x20   :  { %p4664_p2 = pnand %p4663_p1, %p4659_p12 }
  0x22   :  { %4667 = shalt.err (!%p4664_p2)
}
  0x23   :  { %s4668_s16 = scalar_lea.vmem %s19_s21, 4864  ;;  %p4673_p4 = scmp.lt.s32.totalorder %s19_s21, %s19_s21 }
  0x24   :  { %p4669_p3 = scmp.ne.s32.totalorder %s19_s21, %s4668_s16  ;;  %p4674_p5 = scmp.lt.s32.totalorder %s4668_s16, %s4668_s16 }
  0x26   :  { %p4675_p6 = por %p4674_p5, %p4673_p4 }
  0x28   :  { %p4676_p7 = pnand %p4675_p6, %p4669_p3 }
  0x2a   :  { %4679 = shalt.err (!%p4676_p7)
}
  0x2b   :  { %24 = dma.hbm_to_vmem [thread:$0]  %s5406_s0, 4864, %s19_s21, [#allocation3], %s4756_s5, %s4756_s5, %s4757_s6  }
  0x2c   :  { %s4758_s19 = smov [#allocation7]   ;;  %s4759_s22 = smov [#allocation8]  }
  0x2d   :  { %s47_s20 = sshll.u32 %s4758_s19, 4  ;;  %s60_s23 = sshll.u32 %s4759_s22, 4  ;;  %s48_s20 = int_to_ptr.vmem [resolvable:$true] %s47_s20  ;;  %s61_s23 = int_to_ptr.vmem [resolvable:$true] %s60_s23 }
  0x2e   :  { %s4680_s26 = scalar_lea.hbm %s5408_s2, 512 }
  0x2f   :  { %p4681_p8 = scmp.ne.s32.totalorder %s5408_s2, %s4680_s26  ;;  %p4684_p9 = scmp.lt.u32.totalorder %s4680_s26, %s5408_s2 }
  0x31   :  { %p4686_p10 = pnand %p4684_p9, %p4681_p8 }
  0x33   :  { %4689 = shalt.err (!%p4686_p10)
}
  0x34   :  { %s4690_s0 = scalar_lea.vmem %s48_s20, 512  ;;  %p4695_p12 = scmp.lt.s32.totalorder %s48_s20, %s48_s20 }
  0x35   :  { %p4691_p11 = scmp.ne.s32.totalorder %s48_s20, %s4690_s0  ;;  %p4696_p13 = scmp.lt.s32.totalorder %s4690_s0, %s4690_s0 }
  0x37   :  { %p4697_p0 = por %p4696_p13, %p4695_p12 }
  0x39   :  { %p4698_p1 = pnand %p4697_p0, %p4691_p11 }
  0x3b   :  { %4701 = shalt.err (!%p4698_p1)
}
  0x3c   :  { %53 = dma.hbm_to_vmem [thread:$0]  %s5408_s2, 512, %s48_s20, [#allocation6], %s4756_s5, %s4756_s5, %s4757_s6  }
  0x3d   :  { %s4702_s9 = scalar_lea.hbm %s5409_s3, 16 }
  0x3e   :  { %p4703_p2 = scmp.ne.s32.totalorder %s5409_s3, %s4702_s9  ;;  %p4706_p3 = scmp.lt.u32.totalorder %s4702_s9, %s5409_s3 }
  0x40   :  { %p4708_p4 = pnand %p4706_p3, %p4703_p2 }
  0x42   :  { %4711 = shalt.err (!%p4708_p4)
}
  0x43   :  { %s4712_s14 = scalar_lea.vmem %s61_s23, 16  ;;  %s4716_s15 = scalar_lea.vmem %s61_s23, 32 }
  0x44   :  { %p4713_p5 = scmp.ne.s32.totalorder %s61_s23, %s4712_s14  ;;  %p4717_p6 = scmp.lt.s32.totalorder %s61_s23, %s61_s23 }
  0x45   :  { %p4718_p7 = scmp.lt.s32.totalorder %s4716_s15, %s4712_s14 }
  0x47   :  { %p4719_p8 = por %p4718_p7, %p4717_p6 }
  0x49   :  { %p4720_p9 = pnand %p4719_p8, %p4713_p5 }
  0x4b   :  { %4723 = shalt.err (!%p4720_p9)
}
  0x4c   :  { %63 = dma.hbm_to_vmem [thread:$0]  %s5409_s3, 16, %s61_s23, [#allocation9]  }
  0x4d   :  { %4746 = dma.done.wait [#allocation3], 4864  }
  0x4e   :  { %4747 = vsyncadd [#allocation3], 4294962432 }
  0x4f   :  { %4748 = dma.done.wait [#allocation6], 768  }
  0x50   :  { %4749 = vsyncadd [#allocation6], 4294966528 }
  0x51   :  { %4750 = dma.done.wait [#allocation9], 16  }
  0x52   :  { %4751 = vsyncadd [#allocation9], 4294967280  ;;  %v4588_v0 = vld [vmem:[#allocation7 + $0x8] sm:$0xff]   ;;  %v4589_v1 = vld [vmem:[#allocation7 + $0x10] sm:$0xff]   ;;  %vm365_vm0 = vsmask.f32 7424 }
  0x53   :  { %4041 = vmatprep.subr.bf16.mxu1 %v4588_v0  ;;  %4197 = vmatprep.subr.bf16.mxu0 %v4589_v1  ;;  %v4846_v2 = vld [vmem:[#allocation2] sm:$0xff]   ;;  %v4848_v3 = vld [vmem:[#allocation2 + $0x8] sm:$0xff]   ;;  %v4853_v8 = vld [vmem:[#allocation2 + $0x10] sm:$0xff]   ;;  %vm680_vm1 = vcmask 130048   ;;  %vm1987_vm2 = vcmask 1046528   ;;  %s4760_s3 = smov [#allocation10]  }
  0x54   :  { %4042 = vmatpush3.bf16.msra.mxu1 %v4588_v0  ;;  %4198 = vmatpush3.bf16.msra.mxu0 %v4589_v1  ;;  %v4592_v4 = vld [vmem:[#allocation7] sm:$0xff]   ;;  %v367_v5 = vshrl.u32 %v4846_v2, 16  ;;  %v369_v6 = vshll.u32 %v4846_v2, 16  ;;  %v374_v7 = vshll.u32 %v4848_v3, 16  ;;  %v378_v9 = vshrl.u32 %v4848_v3, 16  ;;  %v4594_v10 = vld [vmem:[#allocation7 + $0x18] sm:$0xff]  }
  0x55   :  { %4119 = vmatprep.subr.bf16.mxu1 %v4592_v4  ;;  %v382_v13 = vshll.u32 %v4853_v8, 16  ;;  %v386_v14 = vshrl.u32 %v4853_v8, 16  ;;  %4275 = vmatprep.subr.bf16.mxu0 %v4594_v10  ;;  %v4858_v15 = vld [vmem:[#allocation2 + $0x18] sm:$0xff]   ;;  %v4860_v19 = vld [vmem:[#allocation2 + $0x20] sm:$0xff]   ;;  %v4867_v26 = vld [vmem:[#allocation2 + $0x28] sm:$0xff]   ;;  %s3294_s17 = sshll.u32 %s4760_s3, 4  ;;  %s3295_s17 = int_to_ptr.vmem [resolvable:$true] %s3294_s17 }
  0x56   :  { %v371_v11 = vrot.slane %v369_v6, 1  ;;  %v376_v12 = vrot.slane %v374_v7, 1  ;;  %v390_v20 = vshll.u32 %v4858_v15, 16  ;;  %v394_v21 = vshrl.u32 %v4858_v15, 16  ;;  %v4872_v29 = vld [vmem:[#allocation2 + $0x30] sm:$0xff]   ;;  %v4881_v37 = vld [vmem:[#allocation2 + $0x38] sm:$0xff]   ;;  %p4729_p11 = scmp.lt.s32.totalorder %s3295_s17, %s3295_s17 }
  0x57   :  { %v384_v18 = vrot.slane %v382_v13, 1  ;;  %v398_v25 = vshll.u32 %v4860_v19, 16  ;;  %v402_v28 = vshrl.u32 %v4860_v19, 16  ;;  %v406_v31 = vshll.u32 %v4867_v26, 16  ;;  %v4885_v42 = vld [vmem:[#allocation2 + $0x40] sm:$0xff]   ;;  %v4896_v50 = vld [vmem:[#allocation2 + $0x48] sm:$0xff]  }
  0x58   :  { %v372_v16 = vor.u32 %v371_v11, %v367_v5  ;;  %v380_v17 = vor.u32 %v378_v9, %v376_v12  ;;  %v392_v27 = vrot.slane %v390_v20, 1  ;;  %v410_v32 = vshrl.u32 %v4867_v26, 16  ;;  %v4899_v54 = vld [vmem:[#allocation2 + $0x50] sm:$0xff]   ;;  %v4910_v62 = vld [vmem:[#allocation2 + $0x58] sm:$0xff]   ;;  %v4924_v13 = vld [vmem:[#allocation2 + $0x68] sm:$0xff]   ;;  %s4724_s18 = scalar_lea.vmem %s3295_s17, 4864 }
  0x59   :  { %v388_v24 = vor.u32 %v386_v14, %v384_v18  ;;  %v400_v30 = vrot.slane %v398_v25, 1  ;;  %v414_v35 = vshll.u32 %v4872_v29, 16  ;;  %v408_v36 = vrot.slane %v406_v31, 1  ;;  %p4725_p10 = scmp.ne.s32.totalorder %s3295_s17, %s4724_s18  ;;  %p4730_p12 = scmp.lt.s32.totalorder %s4724_s18, %s4724_s18 }
  0x5a   :  { %v377_v22 = vsel %vm365_vm0, %v372_v16, %v376_v12  ;;  %v385_v23 = vsel %vm365_vm0, %v380_v17, %v384_v18  ;;  %v396_v34 = vor.u32 %v394_v21, %v392_v27  ;;  %v422_v43 = vshll.u32 %v4881_v37, 16  ;;  %v4927_v18 = vld [vmem:[#allocation2 + $0x70] sm:$0xff]  }
  0x5b   :  { %4043 = vmatprep.mubr.msk.bf16.mxu1 %vm680_vm1, %v377_v22  ;;  %4199 = vmatprep.mubr.msk.bf16.mxu0 %vm680_vm1, %v385_v23  ;;  %v393_v33 = vsel %vm365_vm0, %v388_v24, %v392_v27  ;;  %v404_v39 = vor.u32 %v402_v28, %v400_v30  ;;  %v412_v40 = vor.u32 %v410_v32, %v408_v36  ;;  %v416_v41 = vrot.slane %v414_v35, 1  ;;  %v4938_v28 = vld [vmem:[#allocation2 + $0x78] sm:$0xff]   ;;  %p4731_p13 = por %p4730_p12, %p4729_p11 }
  0x5c   :  { %4044 = vmatmul.mubr.msk.bf16.vlgmr.msra.gmra.mrb[0].mxu1 %vm680_vm1, %v385_v23  ;;  %4200 = vmatmul.mubr.msk.bf16.vlgmr.msra.gmra.mrb[0].mxu0 %vm680_vm1, %v393_v33  ;;  %v401_v38 = vsel %vm365_vm0, %v396_v34, %v400_v30  ;;  %v418_v45 = vshrl.u32 %v4872_v29, 16  ;;  %v426_v47 = vshrl.u32 %v4881_v37, 16  ;;  %v430_v48 = vshll.u32 %v4885_v42, 16 }
  0x5d   :  { %4120 = vmatpush3.bf16.msra.mxu1 %v4592_v4  ;;  %4047 = vmatprep.mubr.msk.bf16.mxu1 %vm680_vm1, %v393_v33  ;;  %v409_v44 = vsel %vm365_vm0, %v404_v39, %v408_v36  ;;  %v417_v46 = vsel %vm365_vm0, %v412_v40, %v416_v41  ;;  %v424_v49 = vrot.slane %v422_v43, 1  ;;  %v438_v55 = vshll.u32 %v4896_v50, 16  ;;  %v4913_v4 = vld [vmem:[#allocation2 + $0x60] sm:$0xff]   ;;  %v4952_v43 = vld [vmem:[#allocation2 + $0x88] sm:$0xff]   ;;  %p4732_p0 = pnand %p4731_p13, %p4725_p10 }
  0x5e   :  { %4276 = vmatpush3.bf16.msra.mxu0 %v4594_v10  ;;  %4203 = vmatprep.mubr.msk.bf16.mxu0 %vm680_vm1, %v401_v38  ;;  %v420_v51 = vor.u32 %v418_v45, %v416_v41  ;;  %v432_v53 = vrot.slane %v430_v48, 1  ;;  %v434_v57 = vshrl.u32 %v4885_v42, 16  ;;  %v442_v59 = vshrl.u32 %v4896_v50, 16  ;;  %v4941_v33 = vld [vmem:[#allocation2 + $0x80] sm:$0xff]  }
  0x5f   :  { %v428_v52 = vor.u32 %v426_v47, %v424_v49  ;;  %v446_v60 = vshll.u32 %v4899_v54, 16  ;;  %v440_v61 = vrot.slane %v438_v55, 1  ;;  %v454_v5 = vshll.u32 %v4910_v62, 16  ;;  %v4955_v47 = vld [vmem:[#allocation2 + $0x90] sm:$0xff]  }
  0x60   :  { %v425_v56 = vsel %vm365_vm0, %v420_v51, %v424_v49  ;;  %v436_v63 = vor.u32 %v434_v57, %v432_v53  ;;  %v450_v7 = vshrl.u32 %v4899_v54, 16  ;;  %v458_v10 = vshrl.u32 %v4910_v62, 16  ;;  %v4966_v57 = vld [vmem:[#allocation2 + $0x98] sm:$0xff]  }
  0x61   :  { %v433_v58 = vsel %vm365_vm0, %v428_v52, %v432_v53  ;;  %v444_v0 = vor.u32 %v442_v59, %v440_v61  ;;  %v448_v1 = vrot.slane %v446_v60, 1  ;;  %v462_v11 = vshll.u32 %v4913_v4, 16 }
  0x62   :  { %v441_v6 = vsel %vm365_vm0, %v436_v63, %v440_v61  ;;  %v456_v12 = vrot.slane %v454_v5, 1  ;;  %v470_v20 = vshll.u32 %v4924_v13, 16  ;;  %v466_v22 = vshrl.u32 %v4913_v4, 16  ;;  %v4969_v61 = vld [vmem:[#allocation2 + $0xa0] sm:$0xff]  }
  0x63   :  { %v449_v9 = vsel %vm365_vm0, %v444_v0, %v448_v1  ;;  %v452_v14 = vor.u32 %v450_v7, %v448_v1  ;;  %v464_v17 = vrot.slane %v462_v11, 1  ;;  %v474_v24 = vshrl.u32 %v4924_v13, 16 }
  0x64   :  { %4048 = vmatmul.mubr.msk.bf16.gmra.mrb[4].mxu1 %vm680_vm1, %v401_v38  ;;  %4204 = vmatmul.mubr.msk.bf16.gmra.mrb[4].mxu0 %vm680_vm1, %v409_v44  ;;  %v460_v16 = vor.u32 %v458_v10, %v456_v12  ;;  %v478_v25 = vshll.u32 %v4927_v18, 16  ;;  %v472_v27 = vrot.slane %v470_v20, 1  ;;  %v486_v34 = vshll.u32 %v4938_v28, 16  ;;  %v4980_v10 = vld [vmem:[#allocation2 + $0xa8] sm:$0xff]  }
  0x65   :  { %4051 = vmatprep.mubr.msk.bf16.mxu1 %vm680_vm1, %v409_v44  ;;  %4207 = vmatprep.mubr.msk.bf16.mxu0 %vm680_vm1, %v417_v46  ;;  %v457_v21 = vsel %vm365_vm0, %v452_v14, %v456_v12  ;;  %v468_v30 = vor.u32 %v466_v22, %v464_v17  ;;  %v482_v36 = vshrl.u32 %v4927_v18, 16  ;;  %v490_v39 = vshrl.u32 %v4938_v28, 16 }
  0x66   :  { %v465_v23 = vsel %vm365_vm0, %v460_v16, %v464_v17  ;;  %v476_v31 = vor.u32 %v474_v24, %v472_v27  ;;  %v480_v32 = vrot.slane %v478_v25, 1  ;;  %v494_v40 = vshll.u32 %v4941_v33, 16  ;;  %v4983_v16 = vld [vmem:[#allocation2 + $0xb0] sm:$0xff]  }
  0x67   :  { %v473_v35 = vsel %vm365_vm0, %v468_v30, %v472_v27  ;;  %v488_v41 = vrot.slane %v486_v34, 1  ;;  %v502_v48 = vshll.u32 %v4952_v43, 16  ;;  %v498_v51 = vshrl.u32 %v4941_v33, 16  ;;  %v4994_v27 = vld [vmem:[#allocation2 + $0xb8] sm:$0xff]   ;;  %v4997_v34 = vld [vmem:[#allocation2 + $0xc0] sm:$0xff]  }
  0x68   :  { %v481_v38 = vsel %vm365_vm0, %v476_v31, %v480_v32  ;;  %v484_v44 = vor.u32 %v482_v36, %v480_v32  ;;  %v506_v53 = vshrl.u32 %v4952_v43, 16  ;;  %v510_v55 = vshll.u32 %v4955_v47, 16 }
  0x69   :  { %v492_v45 = vor.u32 %v490_v39, %v488_v41  ;;  %v518_v63 = vshll.u32 %v4966_v57, 16  ;;  %v514_v1 = vshrl.u32 %v4955_v47, 16  ;;  %v526_v7 = vshll.u32 %v4969_v61, 16 }
  0x6a   :  { %v489_v49 = vsel %vm365_vm0, %v484_v44, %v488_v41  ;;  %v512_v60 = vrot.slane %v510_v55, 1  ;;  %v534_v17 = vshll.u32 %v4980_v10, 16  ;;  %v542_v24 = vshll.u32 %v4983_v16, 16 }
  0x6b   :  { %v528_v14 = vrot.slane %v526_v7, 1  ;;  %v558_v41 = vshll.u32 %v4997_v34, 16  ;;  %v562_v55 = vshrl.u32 %v4997_v34, 16 }
  0x6c   :  { %4052 = vmatmul.mubr.msk.bf16.gmra.mrb[8].mxu1 %vm680_vm1, %v417_v46  ;;  %4208 = vmatmul.mubr.msk.bf16.gmra.mrb[8].mxu0 %vm680_vm1, %v425_v56  ;;  %v496_v46 = vrot.slane %v494_v40, 1  ;;  %v516_v11 = vor.u32 %v514_v1, %v512_v60  ;;  %v536_v25 = vrot.slane %v534_v17, 1  ;;  %v544_v32 = vrot.slane %v542_v24, 1 }
  0x6d   :  { %4055 = vmatprep.mubr.msk.bf16.mxu1 %vm680_vm1, %v425_v56  ;;  %4211 = vmatprep.mubr.msk.bf16.mxu0 %vm680_vm1, %v433_v58  ;;  %v504_v56 = vrot.slane %v502_v48, 1  ;;  %v554_v40 = vshrl.u32 %v4994_v27, 16 }
  0x6e   :  { %v497_v52 = vsel %vm365_vm0, %v492_v45, %v496_v46  ;;  %v5008_v45 = vld [vmem:[#allocation2 + $0xc8] sm:$0xff]  }
  0x6f   :  { %v508_v59 = vor.u32 %v506_v53, %v504_v56 }
  0x71   :  { %v513_v5 = vsel %vm365_vm0, %v508_v59, %v512_v60 }
  0x74   :  { %4056 = vmatmul.mubr.msk.bf16.gmra.mrb[12].mxu1 %vm680_vm1, %v433_v58  ;;  %4212 = vmatmul.mubr.msk.bf16.gmra.mrb[12].mxu0 %vm680_vm1, %v441_v6  ;;  %v500_v58 = vor.u32 %v498_v51, %v496_v46  ;;  %v5011_v51 = vld [vmem:[#allocation2 + $0xd0] sm:$0xff]  }
  0x75   :  { %4059 = vmatprep.mubr.msk.bf16.mxu1 %vm680_vm1, %v441_v6  ;;  %4215 = vmatprep.mubr.msk.bf16.mxu0 %vm680_vm1, %v449_v9  ;;  %v522_v6 = vshrl.u32 %v4966_v57, 16  ;;  %v574_v59 = vshll.u32 %v5011_v51, 16 }
  0x76   :  { %v505_v0 = vsel %vm365_vm0, %v500_v58, %v504_v56  ;;  %v570_v58 = vshrl.u32 %v5008_v45, 16 }
  0x7c   :  { %4060 = vmatmul.mubr.msk.bf16.gmra.mrb[16].mxu1 %vm680_vm1, %v449_v9  ;;  %4216 = vmatmul.mubr.msk.bf16.gmra.mrb[16].mxu0 %vm680_vm1, %v457_v21  ;;  %v520_v9 = vrot.slane %v518_v63, 1  ;;  %v5022_v63 = vld [vmem:[#allocation2 + $0xd8] sm:$0xff]  }
  0x7d   :  { %4063 = vmatprep.mubr.msk.bf16.mxu1 %vm680_vm1, %v457_v21  ;;  %4219 = vmatprep.mubr.msk.bf16.mxu0 %vm680_vm1, %v465_v23  ;;  %v530_v21 = vshrl.u32 %v4969_v61, 16  ;;  %v582_v7 = vshll.u32 %v5022_v63, 16 }
  0x7e   :  { %v524_v12 = vor.u32 %v522_v6, %v520_v9  ;;  %v521_v20 = vsel %vm365_vm0, %v516_v11, %v520_v9  ;;  %v5025_v6 = vld [vmem:[#allocation2 + $0xe0] sm:$0xff]   ;;  %v578_v11 = vshrl.u32 %v5011_v51, 16 }
  0x7f   :  { %v532_v30 = vor.u32 %v530_v21, %v528_v14  ;;  %v590_v17 = vshll.u32 %v5025_v6, 16  ;;  %v5036_v21 = vld [vmem:[#allocation2 + $0xe8] sm:$0xff]  }
  0x80   :  { %v529_v22 = vsel %vm365_vm0, %v524_v12, %v528_v14  ;;  %v586_v14 = vshrl.u32 %v5022_v63, 16 }
  0x81   :  { %v537_v36 = vsel %vm365_vm0, %v532_v30, %v536_v25  ;;  %v592_v24 = vrot.slane %v590_v17, 1  ;;  %v598_v30 = vshll.u32 %v5036_v21, 16 }
  0x84   :  { %4064 = vmatmul.mubr.msk.bf16.gmra.mrb[20].mxu1 %vm680_vm1, %v465_v23  ;;  %4220 = vmatmul.mubr.msk.bf16.gmra.mrb[20].mxu0 %vm680_vm1, %v473_v35  ;;  %v538_v23 = vshrl.u32 %v4980_v10, 16 }
  0x85   :  { %4067 = vmatprep.mubr.msk.bf16.mxu1 %vm680_vm1, %v473_v35  ;;  %4223 = vmatprep.mubr.msk.bf16.mxu0 %vm680_vm1, %v481_v38  ;;  %v550_v35 = vshll.u32 %v4994_v27, 16 }
  0x86   :  { %v540_v31 = vor.u32 %v538_v23, %v536_v25  ;;  %v5039_v25 = vld [vmem:[#allocation2 + $0xf0] sm:$0xff]  }
  0x87   :  { %v552_v44 = vrot.slane %v550_v35, 1 }
  0x88   :  { %v545_v39 = vsel %vm365_vm0, %v540_v31, %v544_v32 }
  0x89   :  { %v556_v48 = vor.u32 %v554_v40, %v552_v44  ;;  %v5050_v40 = vld [vmem:[#allocation2 + $0xf8] sm:$0xff]  }
  0x8c   :  { %4068 = vmatmul.mubr.msk.bf16.gmra.mrb[24].mxu1 %vm680_vm1, %v481_v38  ;;  %4224 = vmatmul.mubr.msk.bf16.gmra.mrb[24].mxu0 %vm680_vm1, %v489_v49  ;;  %v546_v38 = vshrl.u32 %v4983_v16, 16 }
  0x8d   :  { %4071 = vmatprep.mubr.msk.bf16.mxu1 %vm680_vm1, %v489_v49  ;;  %4227 = vmatprep.mubr.msk.bf16.mxu0 %vm680_vm1, %v497_v52  ;;  %v560_v49 = vrot.slane %v558_v41, 1 }
  0x8e   :  { %v548_v46 = vor.u32 %v546_v38, %v544_v32  ;;  %v594_v32 = vshrl.u32 %v5025_v6, 16  ;;  %v606_v38 = vshll.u32 %v5039_v25, 16 }
  0x8f   :  { %v561_v56 = vsel %vm365_vm0, %v556_v48, %v560_v49  ;;  %v5053_v48 = vld [vmem:[#allocation2 + $0x100] sm:$0xff]  }
  0x90   :  { %v553_v53 = vsel %vm365_vm0, %v548_v46, %v552_v44  ;;  %v596_v41 = vor.u32 %v594_v32, %v592_v24  ;;  %v608_v46 = vrot.slane %v606_v38, 1  ;;  %v5081_v32 = vld [vmem:[#allocation2 + $0x120] sm:$0xff]  }
  0x94   :  { %4072 = vmatmul.mubr.msk.bf16.gmra.mrb[28].mxu1 %vm680_vm1, %v497_v52  ;;  %4228 = vmatmul.mubr.msk.bf16.gmra.mrb[28].mxu0 %vm680_vm1, %v505_v0  ;;  %v566_v52 = vshll.u32 %v5008_v45, 16 }
  0x95   :  { %4075 = vmatprep.mubr.msk.bf16.mxu1 %vm680_vm1, %v505_v0  ;;  %4231 = vmatprep.mubr.msk.bf16.mxu0 %vm680_vm1, %v513_v5  ;;  %v564_v0 = vor.u32 %v562_v55, %v560_v49  ;;  %v614_v49 = vshll.u32 %v5050_v40, 16 }
  0x96   :  { %v568_v60 = vrot.slane %v566_v52, 1 }
  0x98   :  { %v572_v1 = vor.u32 %v570_v58, %v568_v60  ;;  %v569_v9 = vsel %vm365_vm0, %v564_v0, %v568_v60  ;;  %v622_v58 = vshll.u32 %v5053_v48, 16  ;;  %v5064_v60 = vld [vmem:[#allocation2 + $0x108] sm:$0xff]  }
  0x99   :  { %v634_v17 = vshrl.u32 %v5064_v60, 16 }
  0x9c   :  { %4076 = vmatmul.mubr.msk.bf16.gmra.mrb[32].mxu1 %vm680_vm1, %v513_v5  ;;  %4232 = vmatmul.mubr.msk.bf16.gmra.mrb[32].mxu0 %vm680_vm1, %v521_v20  ;;  %v576_v5 = vrot.slane %v574_v59, 1  ;;  %v616_v59 = vrot.slane %v614_v49, 1  ;;  %v5092_v49 = vld [vmem:[#allocation2 + $0x128] sm:$0xff]  }
  0x9d   :  { %4079 = vmatprep.mubr.msk.bf16.mxu1 %vm680_vm1, %v521_v20  ;;  %4235 = vmatprep.mubr.msk.bf16.mxu0 %vm680_vm1, %v529_v22  ;;  %v584_v20 = vrot.slane %v582_v7, 1  ;;  %v5067_v7 = vld [vmem:[#allocation2 + $0x110] sm:$0xff]  }
  0x9e   :  { %v577_v12 = vsel %vm365_vm0, %v572_v1, %v576_v5  ;;  %v642_v38 = vshrl.u32 %v5067_v7, 16 }
  0x9f   :  { %v588_v23 = vor.u32 %v586_v14, %v584_v20 }
  0xa1   :  { %v593_v35 = vsel %vm365_vm0, %v588_v23, %v592_v24  ;;  %v5078_v23 = vld [vmem:[#allocation2 + $0x118] sm:$0xff]  }
  0xa4   :  { %4080 = vmatmul.mubr.msk.bf16.gmra.mrb[36].mxu1 %vm680_vm1, %v529_v22  ;;  %4236 = vmatmul.mubr.msk.bf16.gmra.mrb[36].mxu0 %vm680_vm1, %v537_v36  ;;  %v580_v22 = vor.u32 %v578_v11, %v576_v5  ;;  %v624_v5 = vrot.slane %v622_v58, 1  ;;  %v662_v58 = vshll.u32 %v5092_v49, 16 }
  0xa5   :  { %4083 = vmatprep.mubr.msk.bf16.mxu1 %vm680_vm1, %v537_v36  ;;  %4239 = vmatprep.mubr.msk.bf16.mxu0 %vm680_vm1, %v545_v39  ;;  %v602_v36 = vshrl.u32 %v5036_v21, 16 }
  0xa6   :  { %v585_v31 = vsel %vm365_vm0, %v580_v22, %v584_v20  ;;  %v638_v20 = vshll.u32 %v5067_v7, 16 }
  0xac   :  { %4084 = vmatmul.mubr.msk.bf16.gmra.mrb[40].mxu1 %vm680_vm1, %v545_v39  ;;  %4240 = vmatmul.mubr.msk.bf16.gmra.mrb[40].mxu0 %vm680_vm1, %v553_v53  ;;  %v600_v39 = vrot.slane %v598_v30, 1 }
  0xad   :  { %4087 = vmatprep.mubr.msk.bf16.mxu1 %vm680_vm1, %v553_v53  ;;  %4243 = vmatprep.mubr.msk.bf16.mxu0 %vm680_vm1, %v561_v56  ;;  %v610_v53 = vshrl.u32 %v5039_v25, 16 }
  0xae   :  { %v604_v44 = vor.u32 %v602_v36, %v600_v39  ;;  %v601_v52 = vsel %vm365_vm0, %v596_v41, %v600_v39  ;;  %v650_v41 = vshrl.u32 %v5078_v23, 16 }
  0xaf   :  { %v612_v0 = vor.u32 %v610_v53, %v608_v46 }
  0xb0   :  { %v609_v55 = vsel %vm365_vm0, %v604_v44, %v608_v46  ;;  %v654_v44 = vshll.u32 %v5081_v32, 16 }
  0xb1   :  { %v617_v11 = vsel %vm365_vm0, %v612_v0, %v616_v59  ;;  %v658_v0 = vshrl.u32 %v5081_v32, 16 }
  0xb4   :  { %4088 = vmatmul.mubr.msk.bf16.gmra.mrb[44].mxu1 %vm680_vm1, %v561_v56  ;;  %4244 = vmatmul.mubr.msk.bf16.gmra.mrb[44].mxu0 %vm680_vm1, %v569_v9  ;;  %v618_v56 = vshrl.u32 %v5050_v40, 16 }
  0xb5   :  { %4091 = vmatprep.mubr.msk.bf16.mxu1 %vm680_vm1, %v569_v9  ;;  %4247 = vmatprep.mubr.msk.bf16.mxu0 %vm680_vm1, %v577_v12  ;;  %v630_v9 = vshll.u32 %v5064_v60, 16 }
  0xb6   :  { %v620_v1 = vor.u32 %v618_v56, %v616_v59  ;;  %v5095_v56 = vld [vmem:[#allocation5] sm:$0xff]  }
  0xb7   :  { %v632_v22 = vrot.slane %v630_v9, 1  ;;  %v670_v9 = vshll.u32 %v5095_v56, 16 }
  0xb8   :  { %v625_v14 = vsel %vm365_vm0, %v620_v1, %v624_v5 }
  0xb9   :  { %v636_v30 = vor.u32 %v634_v17, %v632_v22 }
  0xbc   :  { %4092 = vmatmul.mubr.msk.bf16.gmra.mrb[48].mxu1 %vm680_vm1, %v577_v12  ;;  %4248 = vmatmul.mubr.msk.bf16.gmra.mrb[48].mxu0 %vm680_vm1, %v585_v31  ;;  %v626_v12 = vshrl.u32 %v5053_v48, 16 }
  0xbd   :  { %4095 = vmatprep.mubr.msk.bf16.mxu1 %vm680_vm1, %v585_v31  ;;  %4251 = vmatprep.mubr.msk.bf16.mxu0 %vm680_vm1, %v593_v35  ;;  %v640_v31 = vrot.slane %v638_v20, 1  ;;  %v672_v20 = vrot.slane %v670_v9, 1 }
  0xbe   :  { %v628_v24 = vor.u32 %v626_v12, %v624_v5  ;;  %v666_v5 = vshrl.u32 %v5092_v49, 16 }
  0xbf   :  { %v641_v39 = vsel %vm365_vm0, %v636_v30, %v640_v31 }
  0xc0   :  { %v633_v36 = vsel %vm365_vm0, %v628_v24, %v632_v22  ;;  %v1554_v24 = vshrl.u32 %v5095_v56, 16 }
  0xc4   :  { %4096 = vmatmul.mubr.msk.bf16.gmra.mrb[52].mxu1 %vm680_vm1, %v593_v35  ;;  %4252 = vmatmul.mubr.msk.bf16.gmra.mrb[52].mxu0 %vm680_vm1, %v601_v52  ;;  %v646_v35 = vshll.u32 %v5078_v23, 16 }
  0xc5   :  { %4099 = vmatprep.mubr.msk.bf16.mxu1 %vm680_vm1, %v601_v52  ;;  %4255 = vmatprep.mubr.msk.bf16.mxu0 %vm680_vm1, %v609_v55  ;;  %v644_v52 = vor.u32 %v642_v38, %v640_v31  ;;  %v1988_v38 = vrot.slane %v4848_v3, 1 }
  0xc6   :  { %v648_v46 = vrot.slane %v646_v35, 1  ;;  %v1556_v35 = vor.u32 %v1554_v24, %v672_v20 }
  0xc8   :  { %v652_v53 = vor.u32 %v650_v41, %v648_v46  ;;  %v649_v59 = vsel %vm365_vm0, %v644_v52, %v648_v46  ;;  %v1991_v46 = vrot.slane %v4858_v15, 1  ;;  %v1993_v52 = vrot.slane %v4860_v19, 1 }
  0xcc   :  { %4100 = vmatmul.mubr.msk.bf16.gmra.mrb[56].mxu1 %vm680_vm1, %v609_v55  ;;  %4256 = vmatmul.mubr.msk.bf16.gmra.mrb[56].mxu0 %vm680_vm1, %v617_v11  ;;  %v656_v55 = vrot.slane %v654_v44, 1 }
  0xcd   :  { %4103 = vmatprep.mubr.msk.bf16.mxu1 %vm680_vm1, %v617_v11  ;;  %4259 = vmatprep.mubr.msk.bf16.mxu0 %vm680_vm1, %v625_v14  ;;  %v664_v11 = vrot.slane %v662_v58, 1  ;;  %v1997_v58 = vrot.slane %v4872_v29, 1 }
  0xce   :  { %v657_v1 = vsel %vm365_vm0, %v652_v53, %v656_v55  ;;  %v660_v12 = vor.u32 %v658_v0, %v656_v55  ;;  %v1994_v55 = vsel %vm1987_vm2, %v1991_v46, %v1993_v52  ;;  %v2001_v0 = vrot.slane %v4885_v42, 1 }
  0xcf   :  { %v668_v17 = vor.u32 %v666_v5, %v664_v11  ;;  %v2005_v5 = vrot.slane %v4899_v54, 1 }
  0xd0   :  { %v665_v22 = vsel %vm365_vm0, %v660_v12, %v664_v11  ;;  %v2009_v11 = vrot.slane %v4913_v4, 1 }
  0xd1   :  { %v673_v31 = vsel %vm365_vm0, %v668_v17, %v672_v20  ;;  %v2013_v17 = vrot.slane %v4927_v18, 1 }
  0xd4   :  { %4104 = vmatmul.mubr.msk.bf16.gmra.mrb[60].mxu1 %vm680_vm1, %v625_v14  ;;  %4260 = vmatmul.mubr.msk.bf16.gmra.mrb[60].mxu0 %vm680_vm1, %v633_v36  ;;  %v5107_v14 = vld [vmem:[#allocation5 + $0x8] sm:$0xff]  }
  0xd5   :  { %4107 = vmatprep.mubr.msk.bf16.mxu1 %vm680_vm1, %v633_v36  ;;  %4263 = vmatprep.mubr.msk.bf16.mxu0 %vm680_vm1, %v641_v39  ;;  %v1558_v30 = vshll.u32 %v5107_v14, 16 }
  0xd7   :  { %v1560_v36 = vrot.slane %v1558_v30, 1  ;;  %v2021_v30 = vrot.slane %v4955_v47, 1 }
  0xd9   :  { %v1561_v41 = vsel %vm365_vm0, %v1556_v35, %v1560_v36  ;;  %v2025_v35 = vrot.slane %v4969_v61, 1 }
  0xdc   :  { %4108 = vmatmul.mubr.msk.bf16.gmra.mrb[64].mxu1 %vm680_vm1, %v641_v39  ;;  %4264 = vmatmul.mubr.msk.bf16.gmra.mrb[64].mxu0 %vm680_vm1, %v649_v59  ;;  %v1989_v39 = vrot.slane %v4853_v8, 1 }
  0xdd   :  { %4111 = vmatprep.mubr.msk.bf16.mxu1 %vm680_vm1, %v649_v59  ;;  %4267 = vmatprep.mubr.msk.bf16.mxu0 %vm680_vm1, %v657_v1 }
  0xde   :  { %v1990_v44 = vsel %vm1987_vm2, %v1988_v38, %v1989_v39  ;;  %v1992_v53 = vsel %vm1987_vm2, %v1989_v39, %v1991_v46  ;;  %v2029_v38 = vrot.slane %v4983_v16, 1  ;;  %v2037_v46 = vrot.slane %v5011_v51, 1 }
  0xe4   :  { %4112 = vmatmul.mubr.msk.bf16.gmra.mrb[68].mxu1 %vm680_vm1, %v657_v1  ;;  %4268 = vmatmul.mubr.msk.bf16.gmra.mrb[68].mxu0 %vm680_vm1, %v665_v22 }
  0xe5   :  { %4115 = vmatprep.mubr.msk.bf16.mxu1 %vm680_vm1, %v665_v22  ;;  %4271 = vmatprep.mubr.msk.bf16.mxu0 %vm680_vm1, %v673_v31  ;;  %v2017_v22 = vrot.slane %v4941_v33, 1 }
  0xec   :  { %4116 = vmatmul.mubr.msk.bf16.gmra.mrb[72].mxu1 %vm680_vm1, %v673_v31  ;;  %4272 = vmatmul.mubr.msk.bf16.gmra.mrb[72].mxu0 %vm680_vm1, %v1561_v41  ;;  %v2033_v41 = vrot.slane %v4997_v34, 1 }
  0xed   :  { %4121 = vmatprep.mubr.msk.bf16.mxu1 %vm680_vm1, %v4846_v2  ;;  %4277 = vmatprep.mubr.msk.bf16.mxu0 %vm680_vm1, %v1990_v44  ;;  %v1995_v2 = vrot.slane %v4867_v26, 1 }
  0xef   :  { %v1996_v59 = vsel %vm1987_vm2, %v1993_v52, %v1995_v2 }
  0xf4   :  { %4122 = vmatmul.mubr.msk.bf16.vlgmr.msra.gmra.mrb[0].mxu1 %vm680_vm1, %v4848_v3  ;;  %4278 = vmatmul.mubr.msk.bf16.vlgmr.msra.gmra.mrb[0].mxu0 %vm680_vm1, %v1992_v53  ;;  %v1998_v3 = vsel %vm1987_vm2, %v1995_v2, %v1997_v58  ;;  %v2041_v53 = vrot.slane %v5025_v6, 1  ;;  %v2045_v2 = vrot.slane %v5039_v25, 1 }
  0xf5   :  { %4125 = vmatprep.mubr.msk.bf16.mxu1 %vm680_vm1, %v4853_v8  ;;  %4281 = vmatprep.mubr.msk.bf16.mxu0 %vm680_vm1, %v1994_v55  ;;  %v1999_v8 = vrot.slane %v4881_v37, 1 }
  0xf7   :  { %v2000_v1 = vsel %vm1987_vm2, %v1997_v58, %v1999_v8 }
  0xfc   :  { %4126 = vmatmul.mubr.msk.bf16.gmra.mrb[4].mxu1 %vm680_vm1, %v4858_v15  ;;  %4282 = vmatmul.mubr.msk.bf16.gmra.mrb[4].mxu0 %vm680_vm1, %v1996_v59  ;;  %v2002_v15 = vsel %vm1987_vm2, %v1999_v8, %v2001_v0  ;;  %v2049_v59 = vrot.slane %v5053_v48, 1  ;;  %v2053_v8 = vrot.slane %v5067_v7, 1 }
  0xfd   :  { %4129 = vmatprep.mubr.msk.bf16.mxu1 %vm680_vm1, %v4860_v19  ;;  %4285 = vmatprep.mubr.msk.bf16.mxu0 %vm680_vm1, %v1998_v3  ;;  %v2003_v19 = vrot.slane %v4896_v50, 1 }
  0xff   :  { %v2004_v9 = vsel %vm1987_vm2, %v2001_v0, %v2003_v19 }
 0x104   :  { %4130 = vmatmul.mubr.msk.bf16.gmra.mrb[8].mxu1 %vm680_vm1, %v4867_v26  ;;  %4286 = vmatmul.mubr.msk.bf16.gmra.mrb[8].mxu0 %vm680_vm1, %v2000_v1  ;;  %v2006_v26 = vsel %vm1987_vm2, %v2003_v19, %v2005_v5  ;;  %v2057_v1 = vrot.slane %v5081_v32, 1  ;;  %v2061_v19 = vrot.slane %v5095_v56, 1 }
 0x105   :  { %4133 = vmatprep.mubr.msk.bf16.mxu1 %vm680_vm1, %v4872_v29  ;;  %4289 = vmatprep.mubr.msk.bf16.mxu0 %vm680_vm1, %v2002_v15  ;;  %v2007_v29 = vrot.slane %v4910_v62, 1 }
 0x107   :  { %v2008_v12 = vsel %vm1987_vm2, %v2005_v5, %v2007_v29 }
 0x10c   :  { %4134 = vmatmul.mubr.msk.bf16.gmra.mrb[12].mxu1 %vm680_vm1, %v4881_v37  ;;  %4290 = vmatmul.mubr.msk.bf16.gmra.mrb[12].mxu0 %vm680_vm1, %v2004_v9  ;;  %v2010_v37 = vsel %vm1987_vm2, %v2007_v29, %v2009_v11  ;;  %v5311_v29 = vld [vmem:[#allocation8] ss:$0 sm:$0xff] }
 0x10d   :  { %4137 = vmatprep.mubr.msk.bf16.mxu1 %vm680_vm1, %v4885_v42  ;;  %4293 = vmatprep.mubr.msk.bf16.mxu0 %vm680_vm1, %v2006_v26  ;;  %v2011_v42 = vrot.slane %v4924_v13, 1 }
 0x10f   :  { %v2012_v20 = vsel %vm1987_vm2, %v2009_v11, %v2011_v42 }
 0x114   :  { %4138 = vmatmul.mubr.msk.bf16.gmra.mrb[16].mxu1 %vm680_vm1, %v4896_v50  ;;  %4294 = vmatmul.mubr.msk.bf16.gmra.mrb[16].mxu0 %vm680_vm1, %v2008_v12  ;;  %v2014_v50 = vsel %vm1987_vm2, %v2011_v42, %v2013_v17 }
 0x115   :  { %4141 = vmatprep.mubr.msk.bf16.mxu1 %vm680_vm1, %v4899_v54  ;;  %4297 = vmatprep.mubr.msk.bf16.mxu0 %vm680_vm1, %v2010_v37  ;;  %v2015_v54 = vrot.slane %v4938_v28, 1 }
 0x117   :  { %v2016_v24 = vsel %vm1987_vm2, %v2013_v17, %v2015_v54 }
 0x11c   :  { %4142 = vmatmul.mubr.msk.bf16.gmra.mrb[20].mxu1 %vm680_vm1, %v4910_v62  ;;  %4298 = vmatmul.mubr.msk.bf16.gmra.mrb[20].mxu0 %vm680_vm1, %v2012_v20  ;;  %v2018_v62 = vsel %vm1987_vm2, %v2015_v54, %v2017_v22 }
 0x11d   :  { %4145 = vmatprep.mubr.msk.bf16.mxu1 %vm680_vm1, %v4913_v4  ;;  %4301 = vmatprep.mubr.msk.bf16.mxu0 %vm680_vm1, %v2014_v50  ;;  %v2019_v4 = vrot.slane %v4952_v43, 1 }
 0x11f   :  { %v2020_v31 = vsel %vm1987_vm2, %v2017_v22, %v2019_v4 }
 0x124   :  { %4146 = vmatmul.mubr.msk.bf16.gmra.mrb[24].mxu1 %vm680_vm1, %v4924_v13  ;;  %4302 = vmatmul.mubr.msk.bf16.gmra.mrb[24].mxu0 %vm680_vm1, %v2016_v24  ;;  %v2022_v13 = vsel %vm1987_vm2, %v2019_v4, %v2021_v30 }
 0x125   :  { %4149 = vmatprep.mubr.msk.bf16.mxu1 %vm680_vm1, %v4927_v18  ;;  %4305 = vmatprep.mubr.msk.bf16.mxu0 %vm680_vm1, %v2018_v62  ;;  %v2023_v18 = vrot.slane %v4966_v57, 1 }
 0x127   :  { %v2024_v36 = vsel %vm1987_vm2, %v2021_v30, %v2023_v18 }
 0x12c   :  { %4150 = vmatmul.mubr.msk.bf16.gmra.mrb[28].mxu1 %vm680_vm1, %v4938_v28  ;;  %4306 = vmatmul.mubr.msk.bf16.gmra.mrb[28].mxu0 %vm680_vm1, %v2020_v31  ;;  %v2026_v28 = vsel %vm1987_vm2, %v2023_v18, %v2025_v35 }
 0x12d   :  { %4153 = vmatprep.mubr.msk.bf16.mxu1 %vm680_vm1, %v4941_v33  ;;  %4309 = vmatprep.mubr.msk.bf16.mxu0 %vm680_vm1, %v2022_v13  ;;  %v2027_v33 = vrot.slane %v4980_v10, 1 }
 0x12f   :  { %v2028_v39 = vsel %vm1987_vm2, %v2025_v35, %v2027_v33 }
 0x134   :  { %4154 = vmatmul.mubr.msk.bf16.gmra.mrb[32].mxu1 %vm680_vm1, %v4952_v43  ;;  %4310 = vmatmul.mubr.msk.bf16.gmra.mrb[32].mxu0 %vm680_vm1, %v2024_v36  ;;  %v2030_v43 = vsel %vm1987_vm2, %v2027_v33, %v2029_v38 }
 0x135   :  { %4157 = vmatprep.mubr.msk.bf16.mxu1 %vm680_vm1, %v4955_v47  ;;  %4313 = vmatprep.mubr.msk.bf16.mxu0 %vm680_vm1, %v2026_v28  ;;  %v2031_v47 = vrot.slane %v4994_v27, 1 }
 0x137   :  { %v2032_v44 = vsel %vm1987_vm2, %v2029_v38, %v2031_v47 }
 0x13c   :  { %4158 = vmatmul.mubr.msk.bf16.gmra.mrb[36].mxu1 %vm680_vm1, %v4966_v57  ;;  %4314 = vmatmul.mubr.msk.bf16.gmra.mrb[36].mxu0 %vm680_vm1, %v2028_v39  ;;  %v2034_v57 = vsel %vm1987_vm2, %v2031_v47, %v2033_v41 }
 0x13d   :  { %4161 = vmatprep.mubr.msk.bf16.mxu1 %vm680_vm1, %v4969_v61  ;;  %4317 = vmatprep.mubr.msk.bf16.mxu0 %vm680_vm1, %v2030_v43  ;;  %v2035_v61 = vrot.slane %v5008_v45, 1 }
 0x13f   :  { %v2036_v52 = vsel %vm1987_vm2, %v2033_v41, %v2035_v61 }
 0x144   :  { %4162 = vmatmul.mubr.msk.bf16.gmra.mrb[40].mxu1 %vm680_vm1, %v4980_v10  ;;  %4318 = vmatmul.mubr.msk.bf16.gmra.mrb[40].mxu0 %vm680_vm1, %v2032_v44  ;;  %v2038_v10 = vsel %vm1987_vm2, %v2035_v61, %v2037_v46 }
 0x145   :  { %4165 = vmatprep.mubr.msk.bf16.mxu1 %vm680_vm1, %v4983_v16  ;;  %4321 = vmatprep.mubr.msk.bf16.mxu0 %vm680_vm1, %v2034_v57  ;;  %v2039_v16 = vrot.slane %v5022_v63, 1 }
 0x147   :  { %v2040_v55 = vsel %vm1987_vm2, %v2037_v46, %v2039_v16 }
 0x14c   :  { %4166 = vmatmul.mubr.msk.bf16.gmra.mrb[44].mxu1 %vm680_vm1, %v4994_v27  ;;  %4322 = vmatmul.mubr.msk.bf16.gmra.mrb[44].mxu0 %vm680_vm1, %v2036_v52  ;;  %v2042_v27 = vsel %vm1987_vm2, %v2039_v16, %v2041_v53 }
 0x14d   :  { %4169 = vmatprep.mubr.msk.bf16.mxu1 %vm680_vm1, %v4997_v34  ;;  %4325 = vmatprep.mubr.msk.bf16.mxu0 %vm680_vm1, %v2038_v10  ;;  %v2043_v34 = vrot.slane %v5036_v21, 1 }
 0x14f   :  { %v2044_v58 = vsel %vm1987_vm2, %v2041_v53, %v2043_v34 }
 0x154   :  { %4170 = vmatmul.mubr.msk.bf16.gmra.mrb[48].mxu1 %vm680_vm1, %v5008_v45  ;;  %4326 = vmatmul.mubr.msk.bf16.gmra.mrb[48].mxu0 %vm680_vm1, %v2040_v55  ;;  %v2046_v45 = vsel %vm1987_vm2, %v2043_v34, %v2045_v2 }
 0x155   :  { %4173 = vmatprep.mubr.msk.bf16.mxu1 %vm680_vm1, %v5011_v51  ;;  %4329 = vmatprep.mubr.msk.bf16.mxu0 %vm680_vm1, %v2042_v27  ;;  %v2047_v51 = vrot.slane %v5050_v40, 1 }
 0x157   :  { %v2048_v3 = vsel %vm1987_vm2, %v2045_v2, %v2047_v51 }
 0x15c   :  { %4174 = vmatmul.mubr.msk.bf16.gmra.mrb[52].mxu1 %vm680_vm1, %v5022_v63  ;;  %4330 = vmatmul.mubr.msk.bf16.gmra.mrb[52].mxu0 %vm680_vm1, %v2044_v58  ;;  %v2050_v63 = vsel %vm1987_vm2, %v2047_v51, %v2049_v59 }
 0x15d   :  { %4177 = vmatprep.mubr.msk.bf16.mxu1 %vm680_vm1, %v5025_v6  ;;  %4333 = vmatprep.mubr.msk.bf16.mxu0 %vm680_vm1, %v2046_v45  ;;  %v2051_v6 = vrot.slane %v5064_v60, 1 }
 0x15f   :  { %v2052_v0 = vsel %vm1987_vm2, %v2049_v59, %v2051_v6 }
 0x164   :  { %4178 = vmatmul.mubr.msk.bf16.gmra.mrb[56].mxu1 %vm680_vm1, %v5036_v21  ;;  %4334 = vmatmul.mubr.msk.bf16.gmra.mrb[56].mxu0 %vm680_vm1, %v2048_v3  ;;  %v2054_v21 = vsel %vm1987_vm2, %v2051_v6, %v2053_v8 }
 0x165   :  { %4181 = vmatprep.mubr.msk.bf16.mxu1 %vm680_vm1, %v5039_v25  ;;  %4337 = vmatprep.mubr.msk.bf16.mxu0 %vm680_vm1, %v2050_v63  ;;  %v2055_v25 = vrot.slane %v5078_v23, 1 }
 0x167   :  { %v2056_v15 = vsel %vm1987_vm2, %v2053_v8, %v2055_v25 }
 0x16c   :  { %4182 = vmatmul.mubr.msk.bf16.gmra.mrb[60].mxu1 %vm680_vm1, %v5050_v40  ;;  %4338 = vmatmul.mubr.msk.bf16.gmra.mrb[60].mxu0 %vm680_vm1, %v2052_v0  ;;  %v2058_v40 = vsel %vm1987_vm2, %v2055_v25, %v2057_v1 }
 0x16d   :  { %4185 = vmatprep.mubr.msk.bf16.mxu1 %vm680_vm1, %v5053_v48  ;;  %4341 = vmatprep.mubr.msk.bf16.mxu0 %vm680_vm1, %v2054_v21  ;;  %v2059_v48 = vrot.slane %v5092_v49, 1 }
 0x16f   :  { %v2060_v5 = vsel %vm1987_vm2, %v2057_v1, %v2059_v48 }
 0x174   :  { %4186 = vmatmul.mubr.msk.bf16.gmra.mrb[64].mxu1 %vm680_vm1, %v5064_v60  ;;  %4342 = vmatmul.mubr.msk.bf16.gmra.mrb[64].mxu0 %vm680_vm1, %v2056_v15  ;;  %v2062_v60 = vsel %vm1987_vm2, %v2059_v48, %v2061_v19 }
 0x175   :  { %4189 = vmatprep.mubr.msk.bf16.mxu1 %vm680_vm1, %v5067_v7  ;;  %4345 = vmatprep.mubr.msk.bf16.mxu0 %vm680_vm1, %v2058_v40  ;;  %v2063_v7 = vrot.slane %v5107_v14, 1 }
 0x177   :  { %v2064_v9 = vsel %vm1987_vm2, %v2061_v19, %v2063_v7 }
 0x17c   :  { %4190 = vmatmul.mubr.msk.bf16.gmra.mrb[68].mxu1 %vm680_vm1, %v5078_v23  ;;  %4346 = vmatmul.mubr.msk.bf16.gmra.mrb[68].mxu0 %vm680_vm1, %v2060_v5 }
 0x17d   :  { %4193 = vmatprep.mubr.msk.bf16.mxu1 %vm680_vm1, %v5081_v32  ;;  %4349 = vmatprep.mubr.msk.bf16.mxu0 %vm680_vm1, %v2062_v60 }
 0x184   :  { %4194 = vmatmul.mubr.msk.bf16.gmra.mrb[72].mxu1 %vm680_vm1, %v5092_v49  ;;  %4350 = vmatmul.mubr.msk.bf16.gmra.mrb[72].mxu0 %vm680_vm1, %v2064_v9 }
 0x1c7   :  { %v4123_v56 = vpop.f32.mrb[0].mxu1  ;;  %v4279_v26 = vpop.f32.mrb[0].mxu0 }
 0x1c8   :  { %v1248_v23 = vpop.f32.mrb[1].mxu1  ;;  %v4353_v32 = vadd.f32 %v4279_v26, %v4123_v56  ;;  %v2219_v12 = vpop.f32.mrb[1].mxu0 }
 0x1c9   :  { %v4124_v11 = vpop.f32.mrb[2].mxu1  ;;  %v4354_v42 = vadd.f32 %v2219_v12, %v1248_v23  ;;  %v4280_v17 = vpop.f32.mrb[2].mxu0 }
 0x1ca   :  { %v1251_v37 = vpop.f32.mrb[3].mxu1  ;;  %v2607_v14 = vadd.f32 %v4353_v32, %v5311_v29  ;;  %v4355_v20 = vadd.f32 %v4280_v17, %v4124_v11  ;;  %v2222_v50 = vpop.f32.mrb[3].mxu0 }
 0x1cb   :  { %v2605_v54 = vadd.f32 %v4354_v42, %v5311_v29  ;;  %v4356_v49 = vadd.f32 %v2222_v50, %v1251_v37 }
 0x1cc   :  { %v2759_v22 = vmul.f32 0.2, %v2607_v14  ;;  %v2608_v24 = vadd.f32 %v4355_v20, %v5311_v29  ;;  %vm2683_vm3 = vcmp.ge.f32.partialorder %v2607_v14, 0.0 }
 0x1cd   :  { %v2757_v62 = vmul.f32 0.2, %v2605_v54  ;;  %v2606_v4 = vadd.f32 %v4356_v49, %v5311_v29  ;;  %vm2681_vm4 = vcmp.ge.f32.partialorder %v2605_v54, 0.0 }
 0x1ce   :  { %vm2684_vm5 = vcmp.ge.f32.partialorder %v2608_v24, 0.0  ;;  %v2760_v31 = vmul.f32 0.2, %v2608_v24  ;;  %v2835_v28 = vsel %vm2683_vm3, %v2607_v14, %v2759_v22 }
 0x1cf   :  { %v4127_v30 = vpop.f32.mrb[4].mxu1  ;;  %vm2682_vm6 = vcmp.ge.f32.partialorder %v2606_v4, 0.0  ;;  %v2758_v18 = vmul.f32 0.2, %v2606_v4  ;;  %v4283_v35 = vpop.f32.mrb[4].mxu0  ;;  %v2833_v47 = vsel %vm2681_vm4, %v2605_v54, %v2757_v62 }
 0x1d0   :  { %v1264_v13 = vpop.f32.mrb[5].mxu1  ;;  %v2836_v33 = vsel %vm2684_vm5, %v2608_v24, %v2760_v31  ;;  %v4357_v38 = vadd.f32 %v4283_v35, %v4127_v30  ;;  %v2235_v39 = vpop.f32.mrb[5].mxu0 }
 0x1d1   :  { %v4128_v36 = vpop.f32.mrb[6].mxu1  ;;  %v3666_v41 = vpack.c.bf16 %v2836_v33, %v2835_v28  ;;  %v2834_v44 = vsel %vm2682_vm6, %v2606_v4, %v2758_v18  ;;  %v4358_v57 = vadd.f32 %v2235_v39, %v1264_v13  ;;  %v4284_v61 = vpop.f32.mrb[6].mxu0 }
 0x1d2   :  { %v1267_v43 = vpop.f32.mrb[7].mxu1  ;;  %v3661_v46 = vpack.c.bf16 %v2834_v44, %v2833_v47  ;;  %v2611_v52 = vadd.f32 %v4357_v38, %v5311_v29  ;;  %v4359_v10 = vadd.f32 %v4284_v61, %v4128_v36  ;;  %v2238_v16 = vpop.f32.mrb[7].mxu0 }
 0x1d3   :  { %3848 = vst [vmem:[#allocation10 + $0x8] sm:$0xff] %v3666_v41   ;;  %v2609_v53 = vadd.f32 %v4358_v57, %v5311_v29  ;;  %v4360_v55 = vadd.f32 %v2238_v16, %v1267_v43 }
 0x1d4   :  { %3662 = vst [vmem:[#allocation10] sm:$0xff] %v3661_v46   ;;  %v2763_v27 = vmul.f32 0.2, %v2611_v52  ;;  %v2612_v34 = vadd.f32 %v4359_v10, %v5311_v29  ;;  %vm2687_vm7 = vcmp.ge.f32.partialorder %v2611_v52, 0.0 }
 0x1d5   :  { %v2761_v2 = vmul.f32 0.2, %v2609_v53  ;;  %v2610_v58 = vadd.f32 %v4360_v55, %v5311_v29  ;;  %vm2685_vm8 = vcmp.ge.f32.partialorder %v2609_v53, 0.0 }
 0x1d6   :  { %vm2688_vm9 = vcmp.ge.f32.partialorder %v2612_v34, 0.0  ;;  %v2764_v51 = vmul.f32 0.2, %v2612_v34  ;;  %v2839_v8 = vsel %vm2687_vm7, %v2611_v52, %v2763_v27 }
 0x1d7   :  { %v4131_v45 = vpop.f32.mrb[8].mxu1  ;;  %vm2686_vm10 = vcmp.ge.f32.partialorder %v2610_v58, 0.0  ;;  %v2762_v3 = vmul.f32 0.2, %v2610_v58  ;;  %v4287_v63 = vpop.f32.mrb[8].mxu0  ;;  %v2837_v15 = vsel %vm2685_vm8, %v2609_v53, %v2761_v2 }
 0x1d8   :  { %v1280_v59 = vpop.f32.mrb[9].mxu1  ;;  %v2840_v0 = vsel %vm2688_vm9, %v2612_v34, %v2764_v51  ;;  %v4361_v21 = vadd.f32 %v4287_v63, %v4131_v45  ;;  %v2251_v25 = vpop.f32.mrb[9].mxu0 }
 0x1d9   :  { %v4132_v6 = vpop.f32.mrb[10].mxu1  ;;  %v3676_v40 = vpack.c.bf16 %v2840_v0, %v2839_v8  ;;  %v2838_v48 = vsel %vm2686_vm10, %v2610_v58, %v2762_v3  ;;  %v4362_v19 = vadd.f32 %v2251_v25, %v1280_v59  ;;  %v4288_v5 = vpop.f32.mrb[10].mxu0 }
 0x1da   :  { %v1283_v1 = vpop.f32.mrb[11].mxu1  ;;  %v3671_v60 = vpack.c.bf16 %v2838_v48, %v2837_v15  ;;  %v2615_v7 = vadd.f32 %v4361_v21, %v5311_v29  ;;  %v4363_v9 = vadd.f32 %v4288_v5, %v4132_v6  ;;  %v2254_v56 = vpop.f32.mrb[11].mxu0 }
 0x1db   :  { %3850 = vst [vmem:[#allocation10 + $0x18] sm:$0xff] %v3676_v40   ;;  %v2613_v23 = vadd.f32 %v4362_v19, %v5311_v29  ;;  %v4364_v26 = vadd.f32 %v2254_v56, %v1283_v1 }
 0x1dc   :  { %3849 = vst [vmem:[#allocation10 + $0x10] sm:$0xff] %v3671_v60   ;;  %v2767_v11 = vmul.f32 0.2, %v2615_v7  ;;  %v2616_v32 = vadd.f32 %v4363_v9, %v5311_v29  ;;  %vm2691_vm11 = vcmp.ge.f32.partialorder %v2615_v7, 0.0 }
 0x1dd   :  { %v2765_v12 = vmul.f32 0.2, %v2613_v23  ;;  %v2614_v37 = vadd.f32 %v4364_v26, %v5311_v29  ;;  %vm2689_vm12 = vcmp.ge.f32.partialorder %v2613_v23, 0.0 }
 0x1de   :  { %vm2692_vm13 = vcmp.ge.f32.partialorder %v2616_v32, 0.0  ;;  %v2768_v17 = vmul.f32 0.2, %v2616_v32  ;;  %v2843_v49 = vsel %vm2691_vm11, %v2615_v7, %v2767_v11 }
 0x1df   :  { %v4135_v42 = vpop.f32.mrb[12].mxu1  ;;  %vm2690_vm14 = vcmp.ge.f32.partialorder %v2614_v37, 0.0  ;;  %v2766_v20 = vmul.f32 0.2, %v2614_v37  ;;  %v4291_v50 = vpop.f32.mrb[12].mxu0  ;;  %v2841_v30 = vsel %vm2689_vm12, %v2613_v23, %v2765_v12 }
 0x1e0   :  { %v1296_v14 = vpop.f32.mrb[13].mxu1  ;;  %v2844_v22 = vsel %vm2692_vm13, %v2616_v32, %v2768_v17  ;;  %v4365_v24 = vadd.f32 %v4291_v50, %v4135_v42  ;;  %v2267_v62 = vpop.f32.mrb[13].mxu0 }
 0x1e1   :  { %v4136_v54 = vpop.f32.mrb[14].mxu1  ;;  %v3686_v31 = vpack.c.bf16 %v2844_v22, %v2843_v49  ;;  %v2842_v13 = vsel %vm2690_vm14, %v2614_v37, %v2766_v20  ;;  %v4366_v18 = vadd.f32 %v2267_v62, %v1296_v14  ;;  %v4292_v35 = vpop.f32.mrb[14].mxu0 }
 0x1e2   :  { %v1299_v4 = vpop.f32.mrb[15].mxu1  ;;  %v3681_v36 = vpack.c.bf16 %v2842_v13, %v2841_v30  ;;  %v2619_v28 = vadd.f32 %v4365_v24, %v5311_v29  ;;  %v4367_v33 = vadd.f32 %v4292_v35, %v4136_v54  ;;  %v2270_v38 = vpop.f32.mrb[15].mxu0 }
 0x1e3   :  { %3852 = vst [vmem:[#allocation10 + $0x28] sm:$0xff] %v3686_v31   ;;  %v2617_v39 = vadd.f32 %v4366_v18, %v5311_v29  ;;  %v4368_v43 = vadd.f32 %v2270_v38, %v1299_v4 }
 0x1e4   :  { %3851 = vst [vmem:[#allocation10 + $0x20] sm:$0xff] %v3681_v36   ;;  %v2771_v47 = vmul.f32 0.2, %v2619_v28  ;;  %v2620_v41 = vadd.f32 %v4367_v33, %v5311_v29  ;;  %vm2695_vm15 = vcmp.ge.f32.partialorder %v2619_v28, 0.0 }
 0x1e5   :  { %v2769_v44 = vmul.f32 0.2, %v2617_v39  ;;  %v2618_v57 = vadd.f32 %v4368_v43, %v5311_v29  ;;  %vm2693_vm0 = vcmp.ge.f32.partialorder %v2617_v39, 0.0 }
 0x1e6   :  { %vm2696_vm1 = vcmp.ge.f32.partialorder %v2620_v41, 0.0  ;;  %v2772_v46 = vmul.f32 0.2, %v2620_v41  ;;  %v2847_v55 = vsel %vm2695_vm15, %v2619_v28, %v2771_v47 }
 0x1e7   :  { %v4139_v61 = vpop.f32.mrb[16].mxu1  ;;  %vm2694_vm2 = vcmp.ge.f32.partialorder %v2618_v57, 0.0  ;;  %v2770_v10 = vmul.f32 0.2, %v2618_v57  ;;  %v4295_v16 = vpop.f32.mrb[16].mxu0  ;;  %v2845_v45 = vsel %vm2693_vm0, %v2617_v39, %v2769_v44 }
 0x1e8   :  { %v1312_v52 = vpop.f32.mrb[17].mxu1  ;;  %v2848_v27 = vsel %vm2696_vm1, %v2620_v41, %v2772_v46  ;;  %v4369_v34 = vadd.f32 %v4295_v16, %v4139_v61  ;;  %v2283_v2 = vpop.f32.mrb[17].mxu0 }
 0x1e9   :  { %v4140_v53 = vpop.f32.mrb[18].mxu1  ;;  %v3696_v51 = vpack.c.bf16 %v2848_v27, %v2847_v55  ;;  %v2846_v59 = vsel %vm2694_vm2, %v2618_v57, %v2770_v10  ;;  %v4370_v3 = vadd.f32 %v2283_v2, %v1312_v52  ;;  %v4296_v63 = vpop.f32.mrb[18].mxu0 }
 0x1ea   :  { %v1315_v58 = vpop.f32.mrb[19].mxu1  ;;  %v3691_v6 = vpack.c.bf16 %v2846_v59, %v2845_v45  ;;  %v2623_v8 = vadd.f32 %v4369_v34, %v5311_v29  ;;  %v4371_v0 = vadd.f32 %v4296_v63, %v4140_v53  ;;  %v2286_v21 = vpop.f32.mrb[19].mxu0 }
 0x1eb   :  { %3854 = vst [vmem:[#allocation10 + $0x38] sm:$0xff] %v3696_v51   ;;  %v2621_v25 = vadd.f32 %v4370_v3, %v5311_v29  ;;  %v4372_v1 = vadd.f32 %v2286_v21, %v1315_v58 }
 0x1ec   :  { %3853 = vst [vmem:[#allocation10 + $0x30] sm:$0xff] %v3691_v6   ;;  %v2775_v15 = vmul.f32 0.2, %v2623_v8  ;;  %v2624_v40 = vadd.f32 %v4371_v0, %v5311_v29  ;;  %vm2699_vm3 = vcmp.ge.f32.partialorder %v2623_v8, 0.0 }
 0x1ed   :  { %v2773_v48 = vmul.f32 0.2, %v2621_v25  ;;  %v2622_v19 = vadd.f32 %v4372_v1, %v5311_v29  ;;  %vm2697_vm4 = vcmp.ge.f32.partialorder %v2621_v25, 0.0 }
 0x1ee   :  { %vm2700_vm5 = vcmp.ge.f32.partialorder %v2624_v40, 0.0  ;;  %v2776_v60 = vmul.f32 0.2, %v2624_v40  ;;  %v2851_v26 = vsel %vm2699_vm3, %v2623_v8, %v2775_v15 }
 0x1ef   :  { %v4143_v5 = vpop.f32.mrb[20].mxu1  ;;  %vm2698_vm6 = vcmp.ge.f32.partialorder %v2622_v19, 0.0  ;;  %v2774_v9 = vmul.f32 0.2, %v2622_v19  ;;  %v4299_v56 = vpop.f32.mrb[20].mxu0  ;;  %v2849_v42 = vsel %vm2697_vm4, %v2621_v25, %v2773_v48 }
 0x1f0   :  { %v1328_v7 = vpop.f32.mrb[21].mxu1  ;;  %v2852_v11 = vsel %vm2700_vm5, %v2624_v40, %v2776_v60  ;;  %v4373_v32 = vadd.f32 %v4299_v56, %v4143_v5  ;;  %v2299_v12 = vpop.f32.mrb[21].mxu0 }
 0x1f1   :  { %v4144_v23 = vpop.f32.mrb[22].mxu1  ;;  %v3706_v17 = vpack.c.bf16 %v2852_v11, %v2851_v26  ;;  %v2850_v14 = vsel %vm2698_vm6, %v2622_v19, %v2774_v9  ;;  %v4374_v20 = vadd.f32 %v2299_v12, %v1328_v7  ;;  %v4300_v50 = vpop.f32.mrb[22].mxu0 }
 0x1f2   :  { %v1331_v37 = vpop.f32.mrb[23].mxu1  ;;  %v3701_v54 = vpack.c.bf16 %v2850_v14, %v2849_v42  ;;  %v2627_v49 = vadd.f32 %v4373_v32, %v5311_v29  ;;  %v4375_v22 = vadd.f32 %v4300_v50, %v4144_v23  ;;  %v2302_v24 = vpop.f32.mrb[23].mxu0 }
 0x1f3   :  { %3856 = vst [vmem:[#allocation10 + $0x48] sm:$0xff] %v3706_v17   ;;  %v2625_v62 = vadd.f32 %v4374_v20, %v5311_v29  ;;  %v4376_v4 = vadd.f32 %v2302_v24, %v1331_v37 }
 0x1f4   :  { %3855 = vst [vmem:[#allocation10 + $0x40] sm:$0xff] %v3701_v54   ;;  %v2779_v30 = vmul.f32 0.2, %v2627_v49  ;;  %v2628_v31 = vadd.f32 %v4375_v22, %v5311_v29  ;;  %vm2703_vm7 = vcmp.ge.f32.partialorder %v2627_v49, 0.0 }
 0x1f5   :  { %v2777_v13 = vmul.f32 0.2, %v2625_v62  ;;  %v2626_v18 = vadd.f32 %v4376_v4, %v5311_v29  ;;  %vm2701_vm8 = vcmp.ge.f32.partialorder %v2625_v62, 0.0 }
 0x1f6   :  { %vm2704_vm9 = vcmp.ge.f32.partialorder %v2628_v31, 0.0  ;;  %v2780_v36 = vmul.f32 0.2, %v2628_v31  ;;  %v2855_v43 = vsel %vm2703_vm7, %v2627_v49, %v2779_v30 }
 0x1f7   :  { %v4147_v35 = vpop.f32.mrb[24].mxu1  ;;  %vm2702_vm10 = vcmp.ge.f32.partialorder %v2626_v18, 0.0  ;;  %v2778_v33 = vmul.f32 0.2, %v2626_v18  ;;  %v4303_v38 = vpop.f32.mrb[24].mxu0  ;;  %v2853_v61 = vsel %vm2701_vm8, %v2625_v62, %v2777_v13 }
 0x1f8   :  { %v1344_v28 = vpop.f32.mrb[25].mxu1  ;;  %v2856_v47 = vsel %vm2704_vm9, %v2628_v31, %v2780_v36  ;;  %v4377_v41 = vadd.f32 %v4303_v38, %v4147_v35  ;;  %v2315_v44 = vpop.f32.mrb[25].mxu0 }
 0x1f9   :  { %v4148_v39 = vpop.f32.mrb[26].mxu1  ;;  %v3716_v46 = vpack.c.bf16 %v2856_v47, %v2855_v43  ;;  %v2854_v52 = vsel %vm2702_vm10, %v2626_v18, %v2778_v33  ;;  %v4378_v10 = vadd.f32 %v2315_v44, %v1344_v28  ;;  %v4304_v16 = vpop.f32.mrb[26].mxu0 }
 0x1fa   :  { %v1347_v57 = vpop.f32.mrb[27].mxu1  ;;  %v3711_v53 = vpack.c.bf16 %v2854_v52, %v2853_v61  ;;  %v2631_v55 = vadd.f32 %v4377_v41, %v5311_v29  ;;  %v4379_v27 = vadd.f32 %v4304_v16, %v4148_v39  ;;  %v2318_v34 = vpop.f32.mrb[27].mxu0 }
 0x1fb   :  { %3858 = vst [vmem:[#allocation10 + $0x58] sm:$0xff] %v3716_v46   ;;  %v2629_v2 = vadd.f32 %v4378_v10, %v5311_v29  ;;  %v4380_v58 = vadd.f32 %v2318_v34, %v1347_v57 }
 0x1fc   :  { %3857 = vst [vmem:[#allocation10 + $0x50] sm:$0xff] %v3711_v53   ;;  %v2783_v45 = vmul.f32 0.2, %v2631_v55  ;;  %v2632_v51 = vadd.f32 %v4379_v27, %v5311_v29  ;;  %vm2707_vm11 = vcmp.ge.f32.partialorder %v2631_v55, 0.0 }
 0x1fd   :  { %v2781_v59 = vmul.f32 0.2, %v2629_v2  ;;  %v2630_v3 = vadd.f32 %v4380_v58, %v5311_v29  ;;  %vm2705_vm12 = vcmp.ge.f32.partialorder %v2629_v2, 0.0 }
 0x1fe   :  { %vm2708_vm13 = vcmp.ge.f32.partialorder %v2632_v51, 0.0  ;;  %v2784_v6 = vmul.f32 0.2, %v2632_v51  ;;  %v2859_v1 = vsel %vm2707_vm11, %v2631_v55, %v2783_v45 }
 0x1ff   :  { %v4151_v63 = vpop.f32.mrb[28].mxu1  ;;  %vm2706_vm14 = vcmp.ge.f32.partialorder %v2630_v3, 0.0  ;;  %v2782_v0 = vmul.f32 0.2, %v2630_v3  ;;  %v4307_v21 = vpop.f32.mrb[28].mxu0  ;;  %v2857_v5 = vsel %vm2705_vm12, %v2629_v2, %v2781_v59 }
 0x200   :  { %v1360_v8 = vpop.f32.mrb[29].mxu1  ;;  %v2860_v15 = vsel %vm2708_vm13, %v2632_v51, %v2784_v6  ;;  %v4381_v40 = vadd.f32 %v4307_v21, %v4151_v63  ;;  %v2331_v48 = vpop.f32.mrb[29].mxu0 }
 0x201   :  { %v4152_v25 = vpop.f32.mrb[30].mxu1  ;;  %v3726_v60 = vpack.c.bf16 %v2860_v15, %v2859_v1  ;;  %v2858_v7 = vsel %vm2706_vm14, %v2630_v3, %v2782_v0  ;;  %v4382_v9 = vadd.f32 %v2331_v48, %v1360_v8  ;;  %v4308_v56 = vpop.f32.mrb[30].mxu0 }
 0x202   :  { %v1363_v19 = vpop.f32.mrb[31].mxu1  ;;  %v3721_v23 = vpack.c.bf16 %v2858_v7, %v2857_v5  ;;  %v2635_v26 = vadd.f32 %v4381_v40, %v5311_v29  ;;  %v4383_v11 = vadd.f32 %v4308_v56, %v4152_v25  ;;  %v2334_v32 = vpop.f32.mrb[31].mxu0 }
 0x203   :  { %3860 = vst [vmem:[#allocation10 + $0x68] sm:$0xff] %v3726_v60   ;;  %v2633_v12 = vadd.f32 %v4382_v9, %v5311_v29  ;;  %v4384_v37 = vadd.f32 %v2334_v32, %v1363_v19 }
 0x204   :  { %3859 = vst [vmem:[#allocation10 + $0x60] sm:$0xff] %v3721_v23   ;;  %v2787_v42 = vmul.f32 0.2, %v2635_v26  ;;  %v2636_v17 = vadd.f32 %v4383_v11, %v5311_v29  ;;  %vm2711_vm15 = vcmp.ge.f32.partialorder %v2635_v26, 0.0 }
 0x205   :  { %v2785_v14 = vmul.f32 0.2, %v2633_v12  ;;  %v2634_v20 = vadd.f32 %v4384_v37, %v5311_v29  ;;  %vm2709_vm0 = vcmp.ge.f32.partialorder %v2633_v12, 0.0 }
 0x206   :  { %vm2712_vm1 = vcmp.ge.f32.partialorder %v2636_v17, 0.0  ;;  %v2788_v54 = vmul.f32 0.2, %v2636_v17  ;;  %v2863_v4 = vsel %vm2711_vm15, %v2635_v26, %v2787_v42 }
 0x207   :  { %v4155_v50 = vpop.f32.mrb[32].mxu1  ;;  %vm2710_vm2 = vcmp.ge.f32.partialorder %v2634_v20, 0.0  ;;  %v2786_v22 = vmul.f32 0.2, %v2634_v20  ;;  %v4311_v24 = vpop.f32.mrb[32].mxu0  ;;  %v2861_v35 = vsel %vm2709_vm0, %v2633_v12, %v2785_v14 }
 0x208   :  { %v1376_v49 = vpop.f32.mrb[33].mxu1  ;;  %v2864_v30 = vsel %vm2712_vm1, %v2636_v17, %v2788_v54  ;;  %v4385_v31 = vadd.f32 %v4311_v24, %v4155_v50  ;;  %v2347_v13 = vpop.f32.mrb[33].mxu0 }
 0x209   :  { %v4156_v62 = vpop.f32.mrb[34].mxu1  ;;  %v3736_v36 = vpack.c.bf16 %v2864_v30, %v2863_v4  ;;  %v2862_v28 = vsel %vm2710_vm2, %v2634_v20, %v2786_v22  ;;  %v4386_v33 = vadd.f32 %v2347_v13, %v1376_v49  ;;  %v4312_v38 = vpop.f32.mrb[34].mxu0 }
 0x20a   :  { %v1379_v18 = vpop.f32.mrb[35].mxu1  ;;  %v3731_v39 = vpack.c.bf16 %v2862_v28, %v2861_v35  ;;  %v2639_v43 = vadd.f32 %v4385_v31, %v5311_v29  ;;  %v4387_v47 = vadd.f32 %v4312_v38, %v4156_v62  ;;  %v2350_v41 = vpop.f32.mrb[35].mxu0 }
 0x20b   :  { %3862 = vst [vmem:[#allocation10 + $0x78] sm:$0xff] %v3736_v36   ;;  %v2637_v44 = vadd.f32 %v4386_v33, %v5311_v29  ;;  %v4388_v57 = vadd.f32 %v2350_v41, %v1379_v18 }
 0x20c   :  { %3861 = vst [vmem:[#allocation10 + $0x70] sm:$0xff] %v3731_v39   ;;  %v2791_v61 = vmul.f32 0.2, %v2639_v43  ;;  %v2640_v46 = vadd.f32 %v4387_v47, %v5311_v29  ;;  %vm2715_vm3 = vcmp.ge.f32.partialorder %v2639_v43, 0.0 }
 0x20d   :  { %v2789_v52 = vmul.f32 0.2, %v2637_v44  ;;  %v2638_v10 = vadd.f32 %v4388_v57, %v5311_v29  ;;  %vm2713_vm4 = vcmp.ge.f32.partialorder %v2637_v44, 0.0 }
 0x20e   :  { %vm2716_vm5 = vcmp.ge.f32.partialorder %v2640_v46, 0.0  ;;  %v2792_v53 = vmul.f32 0.2, %v2640_v46  ;;  %v2867_v58 = vsel %vm2715_vm3, %v2639_v43, %v2791_v61 }
 0x20f   :  { %v4159_v16 = vpop.f32.mrb[36].mxu1  ;;  %vm2714_vm6 = vcmp.ge.f32.partialorder %v2638_v10, 0.0  ;;  %v2790_v27 = vmul.f32 0.2, %v2638_v10  ;;  %v4315_v34 = vpop.f32.mrb[36].mxu0  ;;  %v2865_v63 = vsel %vm2713_vm4, %v2637_v44, %v2789_v52 }
 0x210   :  { %v1392_v55 = vpop.f32.mrb[37].mxu1  ;;  %v2868_v45 = vsel %vm2716_vm5, %v2640_v46, %v2792_v53  ;;  %v4389_v51 = vadd.f32 %v4315_v34, %v4159_v16  ;;  %v2363_v59 = vpop.f32.mrb[37].mxu0 }
 0x211   :  { %v4160_v2 = vpop.f32.mrb[38].mxu1  ;;  %v3746_v6 = vpack.c.bf16 %v2868_v45, %v2867_v58  ;;  %v2866_v8 = vsel %vm2714_vm6, %v2638_v10, %v2790_v27  ;;  %v4390_v0 = vadd.f32 %v2363_v59, %v1392_v55  ;;  %v4316_v21 = vpop.f32.mrb[38].mxu0 }
 0x212   :  { %v1395_v3 = vpop.f32.mrb[39].mxu1  ;;  %v3741_v25 = vpack.c.bf16 %v2866_v8, %v2865_v63  ;;  %v2643_v1 = vadd.f32 %v4389_v51, %v5311_v29  ;;  %v4391_v15 = vadd.f32 %v4316_v21, %v4160_v2  ;;  %v2366_v40 = vpop.f32.mrb[39].mxu0 }
 0x213   :  { %3864 = vst [vmem:[#allocation10 + $0x88] sm:$0xff] %v3746_v6   ;;  %v2641_v48 = vadd.f32 %v4390_v0, %v5311_v29  ;;  %v4392_v19 = vadd.f32 %v2366_v40, %v1395_v3 }
 0x214   :  { %3863 = vst [vmem:[#allocation10 + $0x80] sm:$0xff] %v3741_v25   ;;  %v2795_v5 = vmul.f32 0.2, %v2643_v1  ;;  %v2644_v60 = vadd.f32 %v4391_v15, %v5311_v29  ;;  %vm2719_vm7 = vcmp.ge.f32.partialorder %v2643_v1, 0.0 }
 0x215   :  { %v2793_v7 = vmul.f32 0.2, %v2641_v48  ;;  %v2642_v9 = vadd.f32 %v4392_v19, %v5311_v29  ;;  %vm2717_vm8 = vcmp.ge.f32.partialorder %v2641_v48, 0.0 }
 0x216   :  { %vm2720_vm9 = vcmp.ge.f32.partialorder %v2644_v60, 0.0  ;;  %v2796_v23 = vmul.f32 0.2, %v2644_v60  ;;  %v2871_v37 = vsel %vm2719_vm7, %v2643_v1, %v2795_v5 }
 0x217   :  { %v4163_v56 = vpop.f32.mrb[40].mxu1  ;;  %vm2718_vm10 = vcmp.ge.f32.partialorder %v2642_v9, 0.0  ;;  %v2794_v11 = vmul.f32 0.2, %v2642_v9  ;;  %v4319_v32 = vpop.f32.mrb[40].mxu0  ;;  %v2869_v50 = vsel %vm2717_vm8, %v2641_v48, %v2793_v7 }
 0x218   :  { %v1408_v26 = vpop.f32.mrb[41].mxu1  ;;  %v2872_v42 = vsel %vm2720_vm9, %v2644_v60, %v2796_v23  ;;  %v4393_v17 = vadd.f32 %v4319_v32, %v4163_v56  ;;  %v2379_v14 = vpop.f32.mrb[41].mxu0 }
 0x219   :  { %v4164_v12 = vpop.f32.mrb[42].mxu1  ;;  %v3756_v54 = vpack.c.bf16 %v2872_v42, %v2871_v37  ;;  %v2870_v49 = vsel %vm2718_vm10, %v2642_v9, %v2794_v11  ;;  %v4394_v22 = vadd.f32 %v2379_v14, %v1408_v26  ;;  %v4320_v24 = vpop.f32.mrb[42].mxu0 }
 0x21a   :  { %v1411_v20 = vpop.f32.mrb[43].mxu1  ;;  %v3751_v62 = vpack.c.bf16 %v2870_v49, %v2869_v50  ;;  %v2647_v4 = vadd.f32 %v4393_v17, %v5311_v29  ;;  %v4395_v30 = vadd.f32 %v4320_v24, %v4164_v12  ;;  %v2382_v31 = vpop.f32.mrb[43].mxu0 }
 0x21b   :  { %3866 = vst [vmem:[#allocation10 + $0x98] sm:$0xff] %v3756_v54   ;;  %v2645_v13 = vadd.f32 %v4394_v22, %v5311_v29  ;;  %v4396_v18 = vadd.f32 %v2382_v31, %v1411_v20 }
 0x21c   :  { %3865 = vst [vmem:[#allocation10 + $0x90] sm:$0xff] %v3751_v62   ;;  %v2799_v35 = vmul.f32 0.2, %v2647_v4  ;;  %v2648_v36 = vadd.f32 %v4395_v30, %v5311_v29  ;;  %vm2723_vm11 = vcmp.ge.f32.partialorder %v2647_v4, 0.0 }
 0x21d   :  { %v2797_v28 = vmul.f32 0.2, %v2645_v13  ;;  %v2646_v33 = vadd.f32 %v4396_v18, %v5311_v29  ;;  %vm2721_vm12 = vcmp.ge.f32.partialorder %v2645_v13, 0.0 }
 0x21e   :  { %vm2724_vm13 = vcmp.ge.f32.partialorder %v2648_v36, 0.0  ;;  %v2800_v39 = vmul.f32 0.2, %v2648_v36  ;;  %v2875_v57 = vsel %vm2723_vm11, %v2647_v4, %v2799_v35 }
 0x21f   :  { %v4167_v38 = vpop.f32.mrb[44].mxu1  ;;  %vm2722_vm14 = vcmp.ge.f32.partialorder %v2646_v33, 0.0  ;;  %v2798_v47 = vmul.f32 0.2, %v2646_v33  ;;  %v4323_v41 = vpop.f32.mrb[44].mxu0  ;;  %v2873_v16 = vsel %vm2721_vm12, %v2645_v13, %v2797_v28 }
 0x220   :  { %v1424_v43 = vpop.f32.mrb[45].mxu1  ;;  %v2876_v61 = vsel %vm2724_vm13, %v2648_v36, %v2800_v39  ;;  %v4397_v46 = vadd.f32 %v4323_v41, %v4167_v38  ;;  %v2395_v52 = vpop.f32.mrb[45].mxu0 }
 0x221   :  { %v4168_v44 = vpop.f32.mrb[46].mxu1  ;;  %v3766_v53 = vpack.c.bf16 %v2876_v61, %v2875_v57  ;;  %v2874_v55 = vsel %vm2722_vm14, %v2646_v33, %v2798_v47  ;;  %v4398_v27 = vadd.f32 %v2395_v52, %v1424_v43  ;;  %v4324_v34 = vpop.f32.mrb[46].mxu0 }
 0x222   :  { %v1427_v10 = vpop.f32.mrb[47].mxu1  ;;  %v3761_v2 = vpack.c.bf16 %v2874_v55, %v2873_v16  ;;  %v2651_v58 = vadd.f32 %v4397_v46, %v5311_v29  ;;  %v4399_v45 = vadd.f32 %v4324_v34, %v4168_v44  ;;  %v2398_v51 = vpop.f32.mrb[47].mxu0 }
 0x223   :  { %3868 = vst [vmem:[#allocation10 + $0xa8] sm:$0xff] %v3766_v53   ;;  %v2649_v59 = vadd.f32 %v4398_v27, %v5311_v29  ;;  %v4400_v3 = vadd.f32 %v2398_v51, %v1427_v10 }
 0x224   :  { %3867 = vst [vmem:[#allocation10 + $0xa0] sm:$0xff] %v3761_v2   ;;  %v2803_v63 = vmul.f32 0.2, %v2651_v58  ;;  %v2652_v6 = vadd.f32 %v4399_v45, %v5311_v29  ;;  %vm2727_vm15 = vcmp.ge.f32.partialorder %v2651_v58, 0.0 }
 0x225   :  { %v2801_v8 = vmul.f32 0.2, %v2649_v59  ;;  %v2650_v0 = vadd.f32 %v4400_v3, %v5311_v29  ;;  %vm2725_vm0 = vcmp.ge.f32.partialorder %v2649_v59, 0.0 }
 0x226   :  { %vm2728_vm1 = vcmp.ge.f32.partialorder %v2652_v6, 0.0  ;;  %v2804_v25 = vmul.f32 0.2, %v2652_v6  ;;  %v2879_v19 = vsel %vm2727_vm15, %v2651_v58, %v2803_v63 }
 0x227   :  { %v4171_v21 = vpop.f32.mrb[48].mxu1  ;;  %vm2726_vm2 = vcmp.ge.f32.partialorder %v2650_v0, 0.0  ;;  %v2802_v15 = vmul.f32 0.2, %v2650_v0  ;;  %v4327_v40 = vpop.f32.mrb[48].mxu0  ;;  %v2877_v56 = vsel %vm2725_vm0, %v2649_v59, %v2801_v8 }
 0x228   :  { %v1440_v1 = vpop.f32.mrb[49].mxu1  ;;  %v2880_v5 = vsel %vm2728_vm1, %v2652_v6, %v2804_v25  ;;  %v4401_v60 = vadd.f32 %v4327_v40, %v4171_v21  ;;  %v2411_v7 = vpop.f32.mrb[49].mxu0 }
 0x229   :  { %v4172_v48 = vpop.f32.mrb[50].mxu1  ;;  %v3776_v23 = vpack.c.bf16 %v2880_v5, %v2879_v19  ;;  %v2878_v26 = vsel %vm2726_vm2, %v2650_v0, %v2802_v15  ;;  %v4402_v11 = vadd.f32 %v2411_v7, %v1440_v1  ;;  %v4328_v32 = vpop.f32.mrb[50].mxu0 }
 0x22a   :  { %v1443_v9 = vpop.f32.mrb[51].mxu1  ;;  %v3771_v12 = vpack.c.bf16 %v2878_v26, %v2877_v56  ;;  %v2655_v37 = vadd.f32 %v4401_v60, %v5311_v29  ;;  %v4403_v42 = vadd.f32 %v4328_v32, %v4172_v48  ;;  %v2414_v17 = vpop.f32.mrb[51].mxu0 }
 0x22b   :  { %3870 = vst [vmem:[#allocation10 + $0xb8] sm:$0xff] %v3776_v23   ;;  %v2653_v14 = vadd.f32 %v4402_v11, %v5311_v29  ;;  %v4404_v20 = vadd.f32 %v2414_v17, %v1443_v9 }
 0x22c   :  { %3869 = vst [vmem:[#allocation10 + $0xb0] sm:$0xff] %v3771_v12   ;;  %v2807_v50 = vmul.f32 0.2, %v2655_v37  ;;  %v2656_v54 = vadd.f32 %v4403_v42, %v5311_v29  ;;  %vm2731_vm3 = vcmp.ge.f32.partialorder %v2655_v37, 0.0 }
 0x22d   :  { %v2805_v49 = vmul.f32 0.2, %v2653_v14  ;;  %v2654_v22 = vadd.f32 %v4404_v20, %v5311_v29  ;;  %vm2729_vm4 = vcmp.ge.f32.partialorder %v2653_v14, 0.0 }
 0x22e   :  { %vm2732_vm5 = vcmp.ge.f32.partialorder %v2656_v54, 0.0  ;;  %v2808_v62 = vmul.f32 0.2, %v2656_v54  ;;  %v2883_v18 = vsel %vm2731_vm3, %v2655_v37, %v2807_v50 }
 0x22f   :  { %v4175_v24 = vpop.f32.mrb[52].mxu1  ;;  %vm2730_vm6 = vcmp.ge.f32.partialorder %v2654_v22, 0.0  ;;  %v2806_v30 = vmul.f32 0.2, %v2654_v22  ;;  %v4331_v31 = vpop.f32.mrb[52].mxu0  ;;  %v2881_v38 = vsel %vm2729_vm4, %v2653_v14, %v2805_v49 }
 0x230   :  { %v1456_v4 = vpop.f32.mrb[53].mxu1  ;;  %v2884_v35 = vsel %vm2732_vm5, %v2656_v54, %v2808_v62  ;;  %v4405_v36 = vadd.f32 %v4331_v31, %v4175_v24  ;;  %v2427_v28 = vpop.f32.mrb[53].mxu0 }
 0x231   :  { %v4176_v13 = vpop.f32.mrb[54].mxu1  ;;  %v3786_v39 = vpack.c.bf16 %v2884_v35, %v2883_v18  ;;  %v2882_v43 = vsel %vm2730_vm6, %v2654_v22, %v2806_v30  ;;  %v4406_v47 = vadd.f32 %v2427_v28, %v1456_v4  ;;  %v4332_v41 = vpop.f32.mrb[54].mxu0 }
 0x232   :  { %v1459_v33 = vpop.f32.mrb[55].mxu1  ;;  %v3781_v44 = vpack.c.bf16 %v2882_v43, %v2881_v38  ;;  %v2659_v57 = vadd.f32 %v4405_v36, %v5311_v29  ;;  %v4407_v61 = vadd.f32 %v4332_v41, %v4176_v13  ;;  %v2430_v46 = vpop.f32.mrb[55].mxu0 }
 0x233   :  { %3872 = vst [vmem:[#allocation10 + $0xc8] sm:$0xff] %v3786_v39   ;;  %v2657_v52 = vadd.f32 %v4406_v47, %v5311_v29  ;;  %v4408_v10 = vadd.f32 %v2430_v46, %v1459_v33 }
 0x234   :  { %3871 = vst [vmem:[#allocation10 + $0xc0] sm:$0xff] %v3781_v44   ;;  %v2811_v16 = vmul.f32 0.2, %v2659_v57  ;;  %v2660_v53 = vadd.f32 %v4407_v61, %v5311_v29  ;;  %vm2735_vm7 = vcmp.ge.f32.partialorder %v2659_v57, 0.0 }
 0x235   :  { %v2809_v55 = vmul.f32 0.2, %v2657_v52  ;;  %v2658_v27 = vadd.f32 %v4408_v10, %v5311_v29  ;;  %vm2733_vm8 = vcmp.ge.f32.partialorder %v2657_v52, 0.0 }
 0x236   :  { %vm2736_vm9 = vcmp.ge.f32.partialorder %v2660_v53, 0.0  ;;  %v2812_v2 = vmul.f32 0.2, %v2660_v53  ;;  %v2887_v3 = vsel %vm2735_vm7, %v2659_v57, %v2811_v16 }
 0x237   :  { %v4179_v34 = vpop.f32.mrb[56].mxu1  ;;  %vm2734_vm10 = vcmp.ge.f32.partialorder %v2658_v27, 0.0  ;;  %v2810_v45 = vmul.f32 0.2, %v2658_v27  ;;  %v4335_v51 = vpop.f32.mrb[56].mxu0  ;;  %v2885_v21 = vsel %vm2733_vm8, %v2657_v52, %v2809_v55 }
 0x238   :  { %v1472_v58 = vpop.f32.mrb[57].mxu1  ;;  %v2888_v63 = vsel %vm2736_vm9, %v2660_v53, %v2812_v2  ;;  %v4409_v6 = vadd.f32 %v4335_v51, %v4179_v34  ;;  %v2443_v8 = vpop.f32.mrb[57].mxu0 }
 0x239   :  { %v4180_v59 = vpop.f32.mrb[58].mxu1  ;;  %v3796_v25 = vpack.c.bf16 %v2888_v63, %v2887_v3  ;;  %v2886_v1 = vsel %vm2734_vm10, %v2658_v27, %v2810_v45  ;;  %v4410_v15 = vadd.f32 %v2443_v8, %v1472_v58  ;;  %v4336_v40 = vpop.f32.mrb[58].mxu0 }
 0x23a   :  { %v1475_v0 = vpop.f32.mrb[59].mxu1  ;;  %v3791_v48 = vpack.c.bf16 %v2886_v1, %v2885_v21  ;;  %v2663_v19 = vadd.f32 %v4409_v6, %v5311_v29  ;;  %v4411_v5 = vadd.f32 %v4336_v40, %v4180_v59  ;;  %v2446_v60 = vpop.f32.mrb[59].mxu0  ;;  %v5377_v59 = vld [vmem:[#allocation8] ss:$0 sm:$0xff] }
 0x23b   :  { %3874 = vst [vmem:[#allocation10 + $0xd8] sm:$0xff] %v3796_v25   ;;  %v2661_v7 = vadd.f32 %v4410_v15, %v5311_v29  ;;  %v4412_v9 = vadd.f32 %v2446_v60, %v1475_v0 }
 0x23c   :  { %3873 = vst [vmem:[#allocation10 + $0xd0] sm:$0xff] %v3791_v48   ;;  %v2815_v56 = vmul.f32 0.2, %v2663_v19  ;;  %v2664_v23 = vadd.f32 %v4411_v5, %v5311_v29  ;;  %vm2739_vm11 = vcmp.ge.f32.partialorder %v2663_v19, 0.0 }
 0x23d   :  { %v2813_v26 = vmul.f32 0.2, %v2661_v7  ;;  %v2662_v11 = vadd.f32 %v4412_v9, %v5311_v29  ;;  %vm2737_vm12 = vcmp.ge.f32.partialorder %v2661_v7, 0.0 }
 0x23e   :  { %vm2740_vm13 = vcmp.ge.f32.partialorder %v2664_v23, 0.0  ;;  %v2816_v12 = vmul.f32 0.2, %v2664_v23  ;;  %v2891_v20 = vsel %vm2739_vm11, %v2663_v19, %v2815_v56 }
 0x23f   :  { %v4183_v32 = vpop.f32.mrb[60].mxu1  ;;  %vm2738_vm14 = vcmp.ge.f32.partialorder %v2662_v11, 0.0  ;;  %v2814_v42 = vmul.f32 0.2, %v2662_v11  ;;  %v4339_v17 = vpop.f32.mrb[60].mxu0  ;;  %v2889_v24 = vsel %vm2737_vm12, %v2661_v7, %v2813_v26 }
 0x240   :  { %v1488_v37 = vpop.f32.mrb[61].mxu1  ;;  %v2892_v50 = vsel %vm2740_vm13, %v2664_v23, %v2816_v12  ;;  %v4413_v54 = vadd.f32 %v4339_v17, %v4183_v32  ;;  %v2459_v49 = vpop.f32.mrb[61].mxu0 }
 0x241   :  { %v4184_v14 = vpop.f32.mrb[62].mxu1  ;;  %v3806_v62 = vpack.c.bf16 %v2892_v50, %v2891_v20  ;;  %v2890_v4 = vsel %vm2738_vm14, %v2662_v11, %v2814_v42  ;;  %v4414_v30 = vadd.f32 %v2459_v49, %v1488_v37  ;;  %v4340_v31 = vpop.f32.mrb[62].mxu0 }
 0x242   :  { %v1491_v22 = vpop.f32.mrb[63].mxu1  ;;  %v3801_v13 = vpack.c.bf16 %v2890_v4, %v2889_v24  ;;  %v2667_v18 = vadd.f32 %v4413_v54, %v5311_v29  ;;  %v4415_v35 = vadd.f32 %v4340_v31, %v4184_v14  ;;  %v2462_v36 = vpop.f32.mrb[63].mxu0 }
 0x243   :  { %3876 = vst [vmem:[#allocation10 + $0xe8] sm:$0xff] %v3806_v62   ;;  %v2665_v28 = vadd.f32 %v4414_v30, %v5311_v29  ;;  %v4416_v33 = vadd.f32 %v2462_v36, %v1491_v22 }
 0x244   :  { %3875 = vst [vmem:[#allocation10 + $0xe0] sm:$0xff] %v3801_v13   ;;  %v2819_v38 = vmul.f32 0.2, %v2667_v18  ;;  %v2668_v39 = vadd.f32 %v4415_v35, %v5311_v29  ;;  %vm2743_vm15 = vcmp.ge.f32.partialorder %v2667_v18, 0.0 }
 0x245   :  { %v2817_v43 = vmul.f32 0.2, %v2665_v28  ;;  %v2666_v47 = vadd.f32 %v4416_v33, %v5311_v29  ;;  %vm2741_vm0 = vcmp.ge.f32.partialorder %v2665_v28, 0.0 }
 0x246   :  { %vm2744_vm1 = vcmp.ge.f32.partialorder %v2668_v39, 0.0  ;;  %v2820_v44 = vmul.f32 0.2, %v2668_v39  ;;  %v2895_v10 = vsel %vm2743_vm15, %v2667_v18, %v2819_v38 }
 0x247   :  { %v4187_v41 = vpop.f32.mrb[64].mxu1  ;;  %vm2742_vm2 = vcmp.ge.f32.partialorder %v2666_v47, 0.0  ;;  %v2818_v61 = vmul.f32 0.2, %v2666_v47  ;;  %v4343_v46 = vpop.f32.mrb[64].mxu0  ;;  %v2893_v34 = vsel %vm2741_vm0, %v2665_v28, %v2817_v43 }
 0x248   :  { %v1504_v57 = vpop.f32.mrb[65].mxu1  ;;  %v2896_v16 = vsel %vm2744_vm1, %v2668_v39, %v2820_v44  ;;  %v4417_v53 = vadd.f32 %v4343_v46, %v4187_v41  ;;  %v2475_v55 = vpop.f32.mrb[65].mxu0 }
 0x249   :  { %v4188_v52 = vpop.f32.mrb[66].mxu1  ;;  %v3816_v2 = vpack.c.bf16 %v2896_v16, %v2895_v10  ;;  %v2894_v58 = vsel %vm2742_vm2, %v2666_v47, %v2818_v61  ;;  %v4418_v45 = vadd.f32 %v2475_v55, %v1504_v57  ;;  %v4344_v51 = vpop.f32.mrb[66].mxu0 }
 0x24a   :  { %v1507_v27 = vpop.f32.mrb[67].mxu1  ;;  %v3811_v29 = vpack.c.bf16 %v2894_v58, %v2893_v34  ;;  %v2671_v3 = vadd.f32 %v5377_v59, %v4417_v53  ;;  %v4419_v63 = vadd.f32 %v4344_v51, %v4188_v52  ;;  %v2478_v6 = vpop.f32.mrb[67].mxu0 }
 0x24b   :  { %3878 = vst [vmem:[#allocation10 + $0xf8] sm:$0xff] %v3816_v2   ;;  %v2669_v8 = vadd.f32 %v5377_v59, %v4418_v45  ;;  %v4420_v0 = vadd.f32 %v2478_v6, %v1507_v27 }
 0x24c   :  { %3877 = vst [vmem:[#allocation10 + $0xf0] sm:$0xff] %v3811_v29   ;;  %v2823_v21 = vmul.f32 0.2, %v2671_v3  ;;  %v2672_v25 = vadd.f32 %v5377_v59, %v4419_v63  ;;  %vm2747_vm3 = vcmp.ge.f32.partialorder %v2671_v3, 0.0 }
 0x24d   :  { %v2821_v1 = vmul.f32 0.2, %v2669_v8  ;;  %v2670_v15 = vadd.f32 %v5377_v59, %v4420_v0  ;;  %vm2745_vm4 = vcmp.ge.f32.partialorder %v2669_v8, 0.0 }
 0x24e   :  { %vm2748_vm5 = vcmp.ge.f32.partialorder %v2672_v25, 0.0  ;;  %v2824_v48 = vmul.f32 0.2, %v2672_v25  ;;  %v2899_v9 = vsel %vm2747_vm3, %v2671_v3, %v2823_v21 }
 0x24f   :  { %v4191_v40 = vpop.f32.mrb[68].mxu1  ;;  %vm2746_vm6 = vcmp.ge.f32.partialorder %v2670_v15, 0.0  ;;  %v2822_v5 = vmul.f32 0.2, %v2670_v15  ;;  %v4347_v60 = vpop.f32.mrb[68].mxu0  ;;  %v2897_v32 = vsel %vm2745_vm4, %v2669_v8, %v2821_v1 }
 0x250   :  { %v1520_v19 = vpop.f32.mrb[69].mxu1  ;;  %v2900_v56 = vsel %vm2748_vm5, %v2672_v25, %v2824_v48  ;;  %v4421_v23 = vadd.f32 %v4347_v60, %v4191_v40  ;;  %v2491_v26 = vpop.f32.mrb[69].mxu0 }
 0x251   :  { %v4192_v7 = vpop.f32.mrb[70].mxu1  ;;  %v3826_v12 = vpack.c.bf16 %v2900_v56, %v2899_v9  ;;  %v2898_v37 = vsel %vm2746_vm6, %v2670_v15, %v2822_v5  ;;  %v4422_v42 = vadd.f32 %v2491_v26, %v1520_v19  ;;  %v4348_v17 = vpop.f32.mrb[70].mxu0 }
 0x252   :  { %v1523_v11 = vpop.f32.mrb[71].mxu1  ;;  %v3821_v14 = vpack.c.bf16 %v2898_v37, %v2897_v32  ;;  %v2675_v20 = vadd.f32 %v5377_v59, %v4421_v23  ;;  %v4423_v50 = vadd.f32 %v4348_v17, %v4192_v7  ;;  %v2494_v54 = vpop.f32.mrb[71].mxu0 }
 0x253   :  { %3880 = vst [vmem:[#allocation10 + $0x108] sm:$0xff] %v3826_v12   ;;  %v2673_v49 = vadd.f32 %v5377_v59, %v4422_v42  ;;  %v4424_v22 = vadd.f32 %v2494_v54, %v1523_v11 }
 0x254   :  { %3879 = vst [vmem:[#allocation10 + $0x100] sm:$0xff] %v3821_v14   ;;  %v2827_v24 = vmul.f32 0.2, %v2675_v20  ;;  %v2676_v62 = vadd.f32 %v5377_v59, %v4423_v50  ;;  %vm2751_vm7 = vcmp.ge.f32.partialorder %v2675_v20, 0.0 }
 0x255   :  { %v2825_v4 = vmul.f32 0.2, %v2673_v49  ;;  %v2674_v30 = vadd.f32 %v5377_v59, %v4424_v22  ;;  %vm2749_vm8 = vcmp.ge.f32.partialorder %v2673_v49, 0.0 }
 0x256   :  { %vm2752_vm9 = vcmp.ge.f32.partialorder %v2676_v62, 0.0  ;;  %v2828_v13 = vmul.f32 0.2, %v2676_v62  ;;  %v2903_v33 = vsel %vm2751_vm7, %v2675_v20, %v2827_v24 }
 0x257   :  { %v4195_v31 = vpop.f32.mrb[72].mxu1  ;;  %vm2750_vm10 = vcmp.ge.f32.partialorder %v2674_v30, 0.0  ;;  %v2826_v35 = vmul.f32 0.2, %v2674_v30  ;;  %v4351_v36 = vpop.f32.mrb[72].mxu0  ;;  %v2901_v41 = vsel %vm2749_vm8, %v2673_v49, %v2825_v4 }
 0x258   :  { %v1536_v18 = vpop.f32.mrb[73].mxu1  ;;  %v2904_v38 = vsel %vm2752_vm9, %v2676_v62, %v2828_v13  ;;  %v4425_v39 = vadd.f32 %v4351_v36, %v4195_v31  ;;  %v2507_v43 = vpop.f32.mrb[73].mxu0 }
 0x259   :  { %v4196_v28 = vpop.f32.mrb[74].mxu1  ;;  %v3836_v44 = vpack.c.bf16 %v2904_v38, %v2903_v33  ;;  %v2902_v57 = vsel %vm2750_vm10, %v2674_v30, %v2826_v35  ;;  %v4426_v61 = vadd.f32 %v2507_v43, %v1536_v18  ;;  %v4352_v46 = vpop.f32.mrb[74].mxu0 }
 0x25a   :  { %v1539_v47 = vpop.f32.mrb[75].mxu1  ;;  %v3831_v52 = vpack.c.bf16 %v2902_v57, %v2901_v41  ;;  %v2679_v10 = vadd.f32 %v5377_v59, %v4425_v39  ;;  %v4427_v16 = vadd.f32 %v4352_v46, %v4196_v28  ;;  %v2510_v53 = vpop.f32.mrb[75].mxu0 }
 0x25b   :  { %3882 = vst [vmem:[#allocation10 + $0x118] sm:$0xff] %v3836_v44   ;;  %v2677_v55 = vadd.f32 %v5377_v59, %v4426_v61  ;;  %v4428_v27 = vadd.f32 %v2510_v53, %v1539_v47 }
 0x25c   :  { %3881 = vst [vmem:[#allocation10 + $0x110] sm:$0xff] %v3831_v52   ;;  %v2831_v34 = vmul.f32 0.2, %v2679_v10  ;;  %v2680_v2 = vadd.f32 %v5377_v59, %v4427_v16  ;;  %vm2755_vm11 = vcmp.ge.f32.partialorder %v2679_v10, 0.0 }
 0x25d   :  { %v2829_v58 = vmul.f32 0.2, %v2677_v55  ;;  %v2678_v45 = vadd.f32 %v5377_v59, %v4428_v27  ;;  %vm2753_vm12 = vcmp.ge.f32.partialorder %v2677_v55, 0.0 }
 0x25e   :  { %vm2756_vm13 = vcmp.ge.f32.partialorder %v2680_v2, 0.0  ;;  %v2832_v51 = vmul.f32 0.2, %v2680_v2  ;;  %v2907_v3 = vsel %vm2755_vm11, %v2679_v10, %v2831_v34 }
 0x25f   :  { %vm2754_vm14 = vcmp.ge.f32.partialorder %v2678_v45, 0.0  ;;  %v2830_v29 = vmul.f32 0.2, %v2678_v45  ;;  %v2905_v6 = vsel %vm2753_vm12, %v2677_v55, %v2829_v58 }
 0x260   :  { %v2908_v63 = vsel %vm2756_vm13, %v2680_v2, %v2832_v51 }
 0x261   :  { %v3846_v8 = vpack.c.bf16 %v2908_v63, %v2907_v3  ;;  %v2906_v0 = vsel %vm2754_vm14, %v2678_v45, %v2830_v29 }
 0x262   :  { %v3841_v21 = vpack.c.bf16 %v2906_v0, %v2905_v6 }
 0x263   :  { %3884 = vst [vmem:[#allocation10 + $0x128] sm:$0xff] %v3846_v8  }
 0x264   :  { %3883 = vst [vmem:[#allocation10 + $0x120] sm:$0xff] %v3841_v21  }
 0x265   :  { %4735 = shalt.err (!%p4732_p0)
}
 0x266   :  { %s4736_s22 = scalar_lea.hbm %s5410_s4, 4864 }
 0x267   :  { %p4737_p1 = scmp.ne.s32.totalorder %s5410_s4, %s4736_s22  ;;  %p4740_p2 = scmp.lt.u32.totalorder %s4736_s22, %s5410_s4 }
 0x269   :  { %p4742_p3 = pnand %p4740_p2, %p4737_p1 }
 0x26b   :  { %4745 = shalt.err (!%p4742_p3)
}
 0x26c   :  { %3300 = dma.vmem_to_hbm [thread:$0]  %s3295_s17, 4864, %s5410_s4, [#allocation4], %s4756_s5, %s4756_s5, %s4757_s6  }
 0x26d   :  { %4752 = dma.done.wait [#allocation4], 4864  }
 0x26e   :  { %4753 = vsyncadd [#allocation4], 4294962432 }
 0x26f   :  { %3304 = vsyncpa [#allocation3], 1 }
 0x270   :  { %3305 = vsyncpa [#allocation6], 1 }
 0x271   :  { %3306 = vsyncpa [#allocation9], 1 }
 0x272   :  { %3307 = vsyncpa [#allocation4], 1 }

// kernel: fc_discriminator_forward.3
= control target key start
LH: loop header
LB: loop body
LE: loop exit
PB: predicated region body
PF: predicated region fallthrough
CT: control target
= control target key end

     0   :  { %9 = vsyncpa [#allocation3], 0  ;;  %s2392_s0 = inlined_call_operand.hbm [shape: bf16[352,32], index: 0, kind: input, shape index: {}, may-alias: {0,1}]   ;;  %s2393_s1 = inlined_call_operand.hbm [shape: bf16[352,32], index: 1, kind: input, shape index: {}, may-alias: {0,1}]   ;;  %s2394_s2 = inlined_call_operand.hbm [shape: bf16[4,32,128], index: 2, kind: input, shape index: {}]   ;;  %s2395_s3 = inlined_call_operand.hbm [shape: f32[1,128], index: 3, kind: input, shape index: {}]   ;;  %s2396_s4 = inlined_call_operand.hbm [shape: bf16[176,128], index: 4, kind: output, shape index: {}]  }
   0x1   :  { %10 = vsyncpa [#allocation6], 0 }
   0x2   :  { %11 = vsyncpa [#allocation9], 0 }
   0x3   :  { %12 = vsyncpa [#allocation4], 0  ;;  %s1272_s17 = scalar_lea.hbm %s2393_s1, 1408  ;;  %s1841_s18 = smov [#allocation5]  }
   0x4   :  { %s35_s19 = sshll.u32 %s1841_s18, 4  ;;  %s1842_s20 = smov [#allocation2]   ;;  %s36_s19 = int_to_ptr.vmem [resolvable:$true] %s35_s19 }
   0x5   :  { %s18_s21 = sshll.u32 %s1842_s20, 4  ;;  %s1744_s24 = scalar_lea.hbm %s2393_s1, 1536  ;;  %s19_s21 = int_to_ptr.vmem [resolvable:$true] %s18_s21 }
   0x6   :  { %p1721_p0 = scmp.ne.s32.totalorder %s1272_s17, %s1744_s24  ;;  %s1722_s27 = scalar_lea.hbm %s2393_s1, 2816 }
   0x7   :  { %p1723_p1 = scmp.lt.u32.totalorder %s1272_s17, %s2393_s1  ;;  %p1724_p2 = scmp.lt.u32.totalorder %s1722_s27, %s1744_s24 }
   0x8   :  { %p1726_p4 = scmp.lt.u32.totalorder %s1744_s24, %s1272_s17 }
   0x9   :  { %p1725_p3 = por %p1724_p2, %p1723_p1 }
   0xb   :  { %p1727_p5 = por %p1726_p4, %p1725_p3 }
   0xd   :  { %p1728_p6 = pnand %p1727_p5, %p1721_p0 }
   0xf   :  { %1731 = shalt.err (!%p1728_p6)
}
  0x10   :  { %s1732_s30 = scalar_lea.vmem %s36_s19, 128  ;;  %p1737_p8 = scmp.lt.s32.totalorder %s36_s19, %s36_s19 }
  0x11   :  { %p1733_p7 = scmp.ne.s32.totalorder %s36_s19, %s1732_s30  ;;  %p1738_p9 = scmp.lt.s32.totalorder %s1732_s30, %s1732_s30 }
  0x13   :  { %p1739_p10 = por %p1738_p9, %p1737_p8 }
  0x15   :  { %p1740_p11 = pnand %p1739_p10, %p1733_p7 }
  0x17   :  { %1743 = shalt.err (!%p1740_p11)
}
  0x18   :  { %s1843_s5 = smov 64   ;;  %s1844_s6 = smov 4  }
  0x19   :  { %41 = dma.hbm_to_vmem [thread:$0]  %s1272_s17, 128, %s36_s19, [#allocation6], %s1843_s5, %s1843_s5, %s1844_s6  }
  0x1a   :  { %s1745_s8 = scalar_lea.hbm %s2392_s0, 1408  ;;  %s1747_s13 = scalar_lea.hbm %s2392_s0, 2816 }
  0x1b   :  { %p1746_p12 = scmp.ne.s32.totalorder %s2392_s0, %s1745_s8  ;;  %p1748_p13 = scmp.lt.u32.totalorder %s1747_s13, %s1745_s8 }
  0x1c   :  { %p1749_p0 = scmp.lt.u32.totalorder %s1745_s8, %s2392_s0 }
  0x1e   :  { %p1750_p1 = por %p1749_p0, %p1748_p13 }
  0x20   :  { %p1751_p2 = pnand %p1750_p1, %p1746_p12 }
  0x22   :  { %1754 = shalt.err (!%p1751_p2)
}
  0x23   :  { %s1755_s16 = scalar_lea.vmem %s19_s21, 1408  ;;  %p1760_p4 = scmp.lt.s32.totalorder %s19_s21, %s19_s21 }
  0x24   :  { %p1756_p3 = scmp.ne.s32.totalorder %s19_s21, %s1755_s16  ;;  %p1761_p5 = scmp.lt.s32.totalorder %s1755_s16, %s1755_s16 }
  0x26   :  { %p1762_p6 = por %p1761_p5, %p1760_p4 }
  0x28   :  { %p1763_p7 = pnand %p1762_p6, %p1756_p3 }
  0x2a   :  { %1766 = shalt.err (!%p1763_p7)
}
  0x2b   :  { %24 = dma.hbm_to_vmem [thread:$0]  %s2392_s0, 1408, %s19_s21, [#allocation3], %s1843_s5, %s1843_s5, %s1844_s6  }
  0x2c   :  { %s1845_s19 = smov [#allocation7]   ;;  %s1846_s22 = smov [#allocation8]  }
  0x2d   :  { %s47_s20 = sshll.u32 %s1845_s19, 4  ;;  %s60_s23 = sshll.u32 %s1846_s22, 4  ;;  %s48_s20 = int_to_ptr.vmem [resolvable:$true] %s47_s20  ;;  %s61_s23 = int_to_ptr.vmem [resolvable:$true] %s60_s23 }
  0x2e   :  { %s1767_s26 = scalar_lea.hbm %s2394_s2, 1024 }
  0x2f   :  { %p1768_p8 = scmp.ne.s32.totalorder %s2394_s2, %s1767_s26  ;;  %p1771_p9 = scmp.lt.u32.totalorder %s1767_s26, %s2394_s2 }
  0x31   :  { %p1773_p10 = pnand %p1771_p9, %p1768_p8 }
  0x33   :  { %1776 = shalt.err (!%p1773_p10)
}
  0x34   :  { %s1777_s0 = scalar_lea.vmem %s48_s20, 1024  ;;  %p1782_p12 = scmp.lt.s32.totalorder %s48_s20, %s48_s20 }
  0x35   :  { %p1778_p11 = scmp.ne.s32.totalorder %s48_s20, %s1777_s0  ;;  %p1783_p13 = scmp.lt.s32.totalorder %s1777_s0, %s1777_s0 }
  0x37   :  { %p1784_p0 = por %p1783_p13, %p1782_p12 }
  0x39   :  { %p1785_p1 = pnand %p1784_p0, %p1778_p11 }
  0x3b   :  { %1788 = shalt.err (!%p1785_p1)
}
  0x3c   :  { %53 = dma.hbm_to_vmem [thread:$0]  %s2394_s2, 1024, %s48_s20, [#allocation6], %s1843_s5, %s1843_s5, %s1844_s6  }
  0x3d   :  { %s1789_s9 = scalar_lea.hbm %s2395_s3, 16 }
  0x3e   :  { %p1790_p2 = scmp.ne.s32.totalorder %s2395_s3, %s1789_s9  ;;  %p1793_p3 = scmp.lt.u32.totalorder %s1789_s9, %s2395_s3 }
  0x40   :  { %p1795_p4 = pnand %p1793_p3, %p1790_p2 }
  0x42   :  { %1798 = shalt.err (!%p1795_p4)
}
  0x43   :  { %s1799_s14 = scalar_lea.vmem %s61_s23, 16  ;;  %s1803_s15 = scalar_lea.vmem %s61_s23, 32 }
  0x44   :  { %p1800_p5 = scmp.ne.s32.totalorder %s61_s23, %s1799_s14  ;;  %p1804_p6 = scmp.lt.s32.totalorder %s61_s23, %s61_s23 }
  0x45   :  { %p1805_p7 = scmp.lt.s32.totalorder %s1803_s15, %s1799_s14 }
  0x47   :  { %p1806_p8 = por %p1805_p7, %p1804_p6 }
  0x49   :  { %p1807_p9 = pnand %p1806_p8, %p1800_p5 }
  0x4b   :  { %1810 = shalt.err (!%p1807_p9)
}
  0x4c   :  { %63 = dma.hbm_to_vmem [thread:$0]  %s2395_s3, 16, %s61_s23, [#allocation9]  }
  0x4d   :  { %1833 = dma.done.wait [#allocation3], 1408  }
  0x4e   :  { %1834 = vsyncadd [#allocation3], 4294965888 }
  0x4f   :  { %1835 = dma.done.wait [#allocation6], 1152  }
  0x50   :  { %1836 = vsyncadd [#allocation6], 4294966144 }
  0x51   :  { %1837 = dma.done.wait [#allocation9], 16  }
  0x52   :  { %1838 = vsyncadd [#allocation9], 4294967280  ;;  %v1847_v0 = vmov 0.0   ;;  %vm1848_vm0 = vmmov 0   ;;  %v1700_v1 = vld [vmem:[#allocation7 + $0x10] sm:$0xff]   ;;  %v1701_v2 = vld [vmem:[#allocation7] sm:$0xff]  }
  0x53   :  { %1499 = vmatprep.subr.bf16.mxu0 %v1847_v0  ;;  %1547 = vmatprep.subr.bf16.mxu1 %v1847_v0  ;;  %v1702_v3 = vld [vmem:[#allocation7 + $0x18] sm:$0xff]   ;;  %v1703_v4 = vld [vmem:[#allocation7 + $0x8] sm:$0xff]   ;;  %v1943_v5 = vld [vmem:[#allocation2] sm:$0xff]   ;;  %vm173_vm1 = vsmask.f32 7424  ;;  %vm278_vm2 = vcmask 261120  }
  0x54   :  { %1503 = vmatprep.mubr.msk.bf16.mxu0 %vm1848_vm0, %v1847_v0  ;;  %1551 = vmatprep.mubr.msk.bf16.mxu1 %vm1848_vm0, %v1847_v0  ;;  %v1945_v6 = vld [vmem:[#allocation2 + $0x8] sm:$0xff]   ;;  %v175_v7 = vshrl.u32 %v1943_v5, 16  ;;  %v177_v8 = vshll.u32 %v1943_v5, 16  ;;  %v1707_v10 = vld [vmem:[#allocation7 + $0x30] sm:$0xff]   ;;  %v1954_v16 = vld [vmem:[#allocation2 + $0x18] sm:$0xff]   ;;  %v837_v44 = vrot.slane %v1943_v5, 5 }
  0x55   :  { %1500 = vmatpush3.bf16.msra.mxu0 %v1700_v1  ;;  %1548 = vmatpush3.bf16.msra.mxu1 %v1701_v2  ;;  %v182_v9 = vshll.u32 %v1945_v6, 16  ;;  %v1952_v15 = vld [vmem:[#allocation2 + $0x10] sm:$0xff]   ;;  %v186_v18 = vshrl.u32 %v1945_v6, 16  ;;  %v1706_v20 = vld [vmem:[#allocation7 + $0x20] sm:$0xff]   ;;  %vm593_vm3 = vsmask.f32 3328 }
  0x56   :  { %1501 = vmatprep.subr.bf16.mxu0 %v1847_v0  ;;  %1549 = vmatprep.subr.bf16.mxu1 %v1847_v0  ;;  %v179_v11 = vrot.slane %v177_v8, 1  ;;  %v594_v13 = vrot.slane %v175_v7, 4  ;;  %v595_v14 = vrot.slane %v177_v8, 5  ;;  %v190_v21 = vshll.u32 %v1952_v15, 16  ;;  %v1962_v23 = vld [vmem:[#allocation2 + $0x20] sm:$0xff]   ;;  %v1713_v30 = vld [vmem:[#allocation7 + $0x28] sm:$0xff]  }
  0x57   :  { %v184_v12 = vrot.slane %v182_v9, 1  ;;  %v598_v17 = vrot.slane %v182_v9, 5  ;;  %v597_v22 = vrot.slane %v186_v18, 4  ;;  %v198_v26 = vshll.u32 %v1954_v16, 16  ;;  %v1714_v34 = vld [vmem:[#allocation7 + $0x38] sm:$0xff]   ;;  %v1982_v38 = vld [vmem:[#allocation2 + $0x28] sm:$0xff]  }
  0x58   :  { %v180_v19 = vor.u32 %v179_v11, %v175_v7  ;;  %v596_v24 = vor.u32 %v595_v14, %v594_v13  ;;  %v192_v29 = vrot.slane %v190_v21, 1  ;;  %v194_v31 = vshrl.u32 %v1952_v15, 16  ;;  %v1984_v42 = vld [vmem:[#allocation2 + $0x30] sm:$0xff]   ;;  %v1989_v45 = vld [vmem:[#allocation2 + $0x38] sm:$0xff]   ;;  %v1991_v46 = vld [vmem:[#allocation2 + $0x40] sm:$0xff]   ;;  %s1849_s3 = smov [#allocation10]  }
  0x59   :  { %1502 = vmatpush3.bf16.msra.mxu0 %v1702_v3  ;;  %1550 = vmatpush3.bf16.msra.mxu1 %v1703_v4  ;;  %v599_v27 = vor.u32 %v598_v17, %v597_v22  ;;  %v188_v28 = vor.u32 %v186_v18, %v184_v12  ;;  %v202_v32 = vshrl.u32 %v1954_v16, 16  ;;  %v206_v33 = vshll.u32 %v1962_v23, 16  ;;  %v1996_v48 = vld [vmem:[#allocation2 + $0x48] sm:$0xff]   ;;  %v2018_v1 = vld [vmem:[#allocation2 + $0x50] sm:$0xff]   ;;  %s1258_s17 = sshll.u32 %s1849_s3, 4  ;;  %s1259_s17 = int_to_ptr.vmem [resolvable:$true] %s1258_s17 }
  0x5a   :  { %1595 = vmatprep.subr.bf16.mxu0 %v1847_v0  ;;  %1643 = vmatprep.subr.bf16.mxu1 %v1847_v0  ;;  %v185_v25 = vsel %vm173_vm1, %v180_v19, %v184_v12  ;;  %v200_v36 = vrot.slane %v198_v26, 1  ;;  %v196_v39 = vor.u32 %v194_v31, %v192_v29  ;;  %v210_v43 = vshrl.u32 %v1962_v23, 16  ;;  %s1811_s18 = scalar_lea.vmem %s1259_s17, 1408  ;;  %p1816_p11 = scmp.lt.s32.totalorder %s1259_s17, %s1259_s17 }
  0x5b   :  { %v1975_v35 = vsel %vm593_vm3, %v596_v24, %v599_v27  ;;  %v193_v37 = vsel %vm173_vm1, %v188_v28, %v192_v29  ;;  %v208_v41 = vrot.slane %v206_v33, 1  ;;  %vm836_vm4 = vcmask 1042432   ;;  %p1812_p10 = scmp.ne.s32.totalorder %s1259_s17, %s1811_s18  ;;  %p1817_p12 = scmp.lt.s32.totalorder %s1811_s18, %s1811_s18 }
  0x5c   :  { %1552 = vmatmul.mubr.msk.bf16.vlgmr.msra.gmra.mrb[0].mxu1 %vm278_vm2, %v1943_v5  ;;  %1504 = vmatmul.mubr.msk.bf16.vlgmr.msra.gmra.mrb[0].mxu0 %vm278_vm2, %v185_v25  ;;  %v204_v40 = vor.u32 %v202_v32, %v200_v36  ;;  %v214_v47 = vshll.u32 %v1982_v38, 16  ;;  %v838_v49 = vrot.slane %v1945_v6, 5  ;;  %v201_v50 = vsel %vm173_vm1, %v196_v39, %v200_v36 }
  0x5d   :  { %1644 = vmatpush3.bf16.msra.mxu1 %v1707_v10  ;;  %1555 = vmatprep.mubr.msk.bf16.mxu1 %vm1848_vm0, %v1847_v0  ;;  %v218_v52 = vshrl.u32 %v1982_v38, 16  ;;  %v222_v53 = vshll.u32 %v1984_v42, 16  ;;  %v2003_v54 = vor.u32 %v210_v43, %v208_v41  ;;  %v226_v55 = vshrl.u32 %v1984_v42, 16  ;;  %p1818_p13 = por %p1817_p12, %p1816_p11 }
  0x5e   :  { %1645 = vmatprep.subr.bf16.mxu1 %v1847_v0  ;;  %1596 = vmatpush3.bf16.msra.mxu0 %v1706_v20  ;;  %v209_v51 = vsel %vm173_vm1, %v204_v40, %v208_v41  ;;  %v2007_v56 = vsel %vm836_vm4, %v837_v44, %v838_v49  ;;  %v601_v57 = vrot.slane %v194_v31, 4  ;;  %v230_v58 = vshll.u32 %v1989_v45, 16 }
  0x5f   :  { %1507 = vmatprep.mubr.msk.bf16.mxu0 %vm1848_vm0, %v1847_v0  ;;  %1597 = vmatprep.subr.bf16.mxu0 %v1847_v0  ;;  %v234_v59 = vshrl.u32 %v1989_v45, 16  ;;  %v238_v60 = vshll.u32 %v1991_v46, 16  ;;  %v602_v61 = vrot.slane %v190_v21, 5  ;;  %v242_v62 = vshrl.u32 %v1991_v46, 16  ;;  %p1819_p0 = pnand %p1818_p13, %p1812_p10 }
  0x60   :  { %v246_v63 = vshll.u32 %v1996_v48, 16  ;;  %v840_v2 = vrot.slane %v1952_v15, 5  ;;  %v605_v3 = vrot.slane %v202_v32, 4  ;;  %v250_v4 = vshrl.u32 %v1996_v48, 16 }
  0x61   :  { %1646 = vmatpush3.bf16.msra.mxu1 %v1714_v34  ;;  %v603_v5 = vor.u32 %v602_v61, %v601_v57  ;;  %v842_v7 = vrot.slane %v1954_v16, 5  ;;  %v258_v8 = vshrl.u32 %v2018_v1, 16  ;;  %v609_v10 = vrot.slane %v210_v43, 4 }
  0x62   :  { %1598 = vmatpush3.bf16.msra.mxu0 %v1713_v30  ;;  %v2025_v9 = vsel %vm836_vm4, %v838_v49, %v840_v2  ;;  %v610_v11 = vrot.slane %v206_v33, 5  ;;  %v613_v18 = vrot.slane %v218_v52, 4  ;;  %v614_v19 = vrot.slane %v214_v47, 5 }
  0x63   :  { %v2029_v12 = vsel %vm593_vm3, %v599_v27, %v603_v5  ;;  %v2032_v14 = vsel %vm836_vm4, %v840_v2, %v842_v7  ;;  %v846_v20 = vrot.slane %v1982_v38, 5  ;;  %v617_v24 = vrot.slane %v226_v55, 4 }
  0x64   :  { %1556 = vmatmul.mubr.msk.bf16.gmra.mrb[4].mxu1 %vm278_vm2, %v1945_v6  ;;  %1508 = vmatmul.mubr.msk.bf16.gmra.mrb[4].mxu0 %vm278_vm2, %v193_v37  ;;  %v606_v6 = vrot.slane %v198_v26, 5  ;;  %v611_v17 = vor.u32 %v610_v11, %v609_v10  ;;  %v618_v25 = vrot.slane %v222_v53, 5  ;;  %v615_v27 = vor.u32 %v614_v19, %v613_v18  ;;  %v1719_v11 = vld [vmem:[#allocation5] sm:$0xff]  }
  0x65   :  { %1559 = vmatprep.mubr.msk.bf16.mxu1 %vm1848_vm0, %v1847_v0  ;;  %1511 = vmatprep.mubr.msk.bf16.mxu0 %vm1848_vm0, %v1847_v0  ;;  %v848_v29 = vrot.slane %v1984_v42, 5  ;;  %v621_v31 = vrot.slane %v234_v59, 4  ;;  %v622_v32 = vrot.slane %v230_v58, 5  ;;  %v850_v33 = vrot.slane %v1989_v45, 5 }
  0x66   :  { %v607_v13 = vor.u32 %v606_v6, %v605_v3  ;;  %v619_v30 = vor.u32 %v618_v25, %v617_v24  ;;  %v2069_v34 = vsel %vm593_vm3, %v611_v17, %v615_v27  ;;  %v626_v37 = vrot.slane %v238_v60, 5 }
  0x67   :  { %v2072_v36 = vsel %vm836_vm4, %v846_v20, %v848_v29  ;;  %v623_v40 = vor.u32 %v622_v32, %v621_v31  ;;  %v2082_v41 = vsel %vm836_vm4, %v848_v29, %v850_v33  ;;  %v852_v43 = vrot.slane %v1991_v46, 5 }
  0x68   :  { %v2043_v21 = vsel %vm593_vm3, %v603_v5, %v607_v13  ;;  %v2053_v26 = vsel %vm593_vm3, %v607_v13, %v611_v17  ;;  %v2079_v39 = vsel %vm593_vm3, %v615_v27, %v619_v30  ;;  %v629_v49 = vrot.slane %v250_v4, 4 }
  0x69   :  { %v854_v57 = vrot.slane %v1996_v48, 5  ;;  %v216_v61 = vrot.slane %v214_v47, 1  ;;  %v254_v2 = vshll.u32 %v2018_v1, 16  ;;  %v2095_v3 = vsel %vm593_vm3, %v619_v30, %v623_v40 }
  0x6a   :  { %v2098_v5 = vsel %vm836_vm4, %v850_v33, %v852_v43  ;;  %v633_v47 = vrot.slane %v258_v8, 4  ;;  %v856_v18 = vrot.slane %v2018_v1, 5  ;;  %v637_v25 = vshrl.u32 %v1719_v11, 16 }
  0x6b   :  { %v634_v10 = vrot.slane %v254_v2, 5  ;;  %v217_v17 = vsel %vm173_vm1, %v2003_v54, %v216_v61  ;;  %v224_v54 = vrot.slane %v222_v53, 1  ;;  %v858_v32 = vrot.slane %v1719_v11, 5 }
  0x6c   :  { %1560 = vmatmul.mubr.msk.bf16.gmra.mrb[8].mxu1 %vm278_vm2, %v1952_v15  ;;  %1512 = vmatmul.mubr.msk.bf16.gmra.mrb[8].mxu0 %vm278_vm2, %v201_v50  ;;  %v844_v15 = vrot.slane %v1962_v23, 5  ;;  %v630_v50 = vrot.slane %v246_v63, 5  ;;  %v2124_v24 = vsel %vm836_vm4, %v854_v57, %v856_v18  ;;  %v639_v29 = vrot.slane %v637_v25, 4 }
  0x6d   :  { %1563 = vmatprep.mubr.msk.bf16.mxu1 %vm1848_vm0, %v1847_v0  ;;  %1515 = vmatprep.mubr.msk.bf16.mxu0 %vm1848_vm0, %v1847_v0  ;;  %v232_v53 = vrot.slane %v230_v58, 1 }
  0x6e   :  { %v2046_v22 = vsel %vm836_vm4, %v842_v7, %v844_v15  ;;  %v2056_v28 = vsel %vm836_vm4, %v844_v15, %v846_v20  ;;  %v631_v7 = vor.u32 %v630_v50, %v629_v49  ;;  %v635_v15 = vor.u32 %v634_v10, %v633_v47 }
  0x6f   :  { %v262_v20 = vshll.u32 %v1719_v11, 16 }
  0x70   :  { %v2121_v19 = vsel %vm593_vm3, %v631_v7, %v635_v15 }
  0x71   :  { %v640_v27 = vrot.slane %v262_v20, 5 }
  0x73   :  { %v641_v31 = vor.u32 %v640_v27, %v639_v29 }
  0x74   :  { %1564 = vmatmul.mubr.msk.bf16.gmra.mrb[12].mxu1 %vm278_vm2, %v1954_v16  ;;  %v625_v16 = vrot.slane %v242_v62, 4  ;;  %1516 = vmatmul.mubr.msk.bf16.gmra.mrb[12].mxu0 %vm278_vm2, %v209_v51  ;;  %v2106_v51 = vsel %vm836_vm4, %v852_v43, %v854_v57 }
  0x75   :  { %1567 = vmatprep.mubr.msk.bf16.mxu1 %vm1848_vm0, %v1847_v0  ;;  %1519 = vmatprep.mubr.msk.bf16.mxu0 %vm1848_vm0, %v1847_v0  ;;  %v2139_v33 = vsel %vm593_vm3, %v635_v15, %v641_v31 }
  0x76   :  { %v627_v44 = vor.u32 %v626_v37, %v625_v16  ;;  %v236_v37 = vor.u32 %v234_v59, %v232_v53  ;;  %v248_v59 = vrot.slane %v246_v63, 1 }
  0x78   :  { %v2103_v6 = vsel %vm593_vm3, %v623_v40, %v627_v44  ;;  %v2111_v13 = vsel %vm593_vm3, %v627_v44, %v631_v7  ;;  %v264_v40 = vrot.slane %v262_v20, 1 }
  0x7c   :  { %1568 = vmatmul.mubr.msk.bf16.gmra.mrb[16].mxu1 %vm278_vm2, %v1962_v23  ;;  %1520 = vmatmul.mubr.msk.bf16.gmra.mrb[16].mxu0 %vm278_vm2, %v217_v17  ;;  %v220_v23 = vor.u32 %v218_v52, %v216_v61  ;;  %v2142_v52 = vsel %vm836_vm4, %v856_v18, %v858_v32 }
  0x7d   :  { %1571 = vmatprep.mubr.msk.bf16.mxu1 %vm1848_vm0, %v1847_v0  ;;  %1523 = vmatprep.mubr.msk.bf16.mxu0 %vm1848_vm0, %v1847_v0 }
  0x7e   :  { %v225_v30 = vsel %vm173_vm1, %v220_v23, %v224_v54 }
  0x84   :  { %1572 = vmatmul.mubr.msk.bf16.gmra.mrb[20].mxu1 %vm278_vm2, %v1982_v38  ;;  %1524 = vmatmul.mubr.msk.bf16.gmra.mrb[20].mxu0 %vm278_vm2, %v225_v30  ;;  %v228_v38 = vor.u32 %v226_v55, %v224_v54  ;;  %v240_v55 = vrot.slane %v238_v60, 1  ;;  %v252_v60 = vor.u32 %v250_v4, %v248_v59 }
  0x85   :  { %1575 = vmatprep.mubr.msk.bf16.mxu1 %vm1848_vm0, %v1847_v0  ;;  %1527 = vmatprep.mubr.msk.bf16.mxu0 %vm1848_vm0, %v1847_v0 }
  0x86   :  { %v233_v16 = vsel %vm173_vm1, %v228_v38, %v232_v53  ;;  %v244_v58 = vor.u32 %v242_v62, %v240_v55  ;;  %v256_v62 = vrot.slane %v254_v2, 1 }
  0x88   :  { %v257_v63 = vsel %vm173_vm1, %v252_v60, %v256_v62 }
  0x8c   :  { %1576 = vmatmul.mubr.msk.bf16.gmra.mrb[24].mxu1 %vm278_vm2, %v1984_v42  ;;  %1528 = vmatmul.mubr.msk.bf16.gmra.mrb[24].mxu0 %vm278_vm2, %v233_v16  ;;  %v241_v42 = vsel %vm173_vm1, %v236_v37, %v240_v55 }
  0x8d   :  { %1579 = vmatprep.mubr.msk.bf16.mxu1 %vm1848_vm0, %v1847_v0  ;;  %1531 = vmatprep.mubr.msk.bf16.mxu0 %vm1848_vm0, %v1847_v0 }
  0x94   :  { %1580 = vmatmul.mubr.msk.bf16.gmra.mrb[28].mxu1 %vm278_vm2, %v1989_v45  ;;  %1532 = vmatmul.mubr.msk.bf16.gmra.mrb[28].mxu0 %vm278_vm2, %v241_v42  ;;  %v249_v45 = vsel %vm173_vm1, %v244_v58, %v248_v59 }
  0x95   :  { %1583 = vmatprep.mubr.msk.bf16.mxu1 %vm1848_vm0, %v1847_v0  ;;  %1535 = vmatprep.mubr.msk.bf16.mxu0 %vm1848_vm0, %v1847_v0 }
  0x9c   :  { %1584 = vmatmul.mubr.msk.bf16.gmra.mrb[32].mxu1 %vm278_vm2, %v1991_v46  ;;  %1536 = vmatmul.mubr.msk.bf16.gmra.mrb[32].mxu0 %vm278_vm2, %v249_v45  ;;  %v260_v46 = vor.u32 %v258_v8, %v256_v62 }
  0x9d   :  { %1587 = vmatprep.mubr.msk.bf16.mxu1 %vm1848_vm0, %v1847_v0  ;;  %1539 = vmatprep.mubr.msk.bf16.mxu0 %vm1848_vm0, %v1847_v0 }
  0x9e   :  { %v265_v4 = vsel %vm173_vm1, %v260_v46, %v264_v40 }
  0xa4   :  { %1588 = vmatmul.mubr.msk.bf16.gmra.mrb[36].mxu1 %vm278_vm2, %v1996_v48  ;;  %1540 = vmatmul.mubr.msk.bf16.gmra.mrb[36].mxu0 %vm278_vm2, %v257_v63 }
  0xa5   :  { %1591 = vmatprep.mubr.msk.bf16.mxu1 %vm1848_vm0, %v1847_v0  ;;  %1543 = vmatprep.mubr.msk.bf16.mxu0 %vm1848_vm0, %v1847_v0 }
  0xac   :  { %1592 = vmatmul.mubr.msk.bf16.gmra.mrb[40].mxu1 %vm278_vm2, %v2018_v1  ;;  %1544 = vmatmul.mubr.msk.bf16.gmra.mrb[40].mxu0 %vm278_vm2, %v265_v4 }
  0xad   :  { %1647 = vmatprep.mubr.msk.bf16.mxu1 %vm1848_vm0, %v1847_v0  ;;  %1599 = vmatprep.mubr.msk.bf16.mxu0 %vm1848_vm0, %v1847_v0 }
  0xb4   :  { %1648 = vmatmul.mubr.msk.bf16.vlgmr.msra.gmra.mrb[44].mxu1 %vm278_vm2, %v2007_v56  ;;  %1600 = vmatmul.mubr.msk.bf16.vlgmr.msra.gmra.mrb[44].mxu0 %vm278_vm2, %v1975_v35 }
  0xb5   :  { %1651 = vmatprep.mubr.msk.bf16.mxu1 %vm1848_vm0, %v1847_v0  ;;  %1603 = vmatprep.mubr.msk.bf16.mxu0 %vm1848_vm0, %v1847_v0 }
  0xbc   :  { %1652 = vmatmul.mubr.msk.bf16.gmra.mrb[48].mxu1 %vm278_vm2, %v2025_v9  ;;  %1604 = vmatmul.mubr.msk.bf16.gmra.mrb[48].mxu0 %vm278_vm2, %v2029_v12 }
  0xbd   :  { %1655 = vmatprep.mubr.msk.bf16.mxu1 %vm1848_vm0, %v1847_v0  ;;  %1607 = vmatprep.mubr.msk.bf16.mxu0 %vm1848_vm0, %v1847_v0 }
  0xc4   :  { %1656 = vmatmul.mubr.msk.bf16.gmra.mrb[52].mxu1 %vm278_vm2, %v2032_v14  ;;  %1608 = vmatmul.mubr.msk.bf16.gmra.mrb[52].mxu0 %vm278_vm2, %v2043_v21 }
  0xc5   :  { %1659 = vmatprep.mubr.msk.bf16.mxu1 %vm1848_vm0, %v1847_v0  ;;  %1611 = vmatprep.mubr.msk.bf16.mxu0 %vm1848_vm0, %v1847_v0 }
  0xcc   :  { %1660 = vmatmul.mubr.msk.bf16.gmra.mrb[56].mxu1 %vm278_vm2, %v2046_v22  ;;  %1612 = vmatmul.mubr.msk.bf16.gmra.mrb[56].mxu0 %vm278_vm2, %v2053_v26 }
  0xcd   :  { %1663 = vmatprep.mubr.msk.bf16.mxu1 %vm1848_vm0, %v1847_v0  ;;  %1615 = vmatprep.mubr.msk.bf16.mxu0 %vm1848_vm0, %v1847_v0 }
  0xd4   :  { %1664 = vmatmul.mubr.msk.bf16.gmra.mrb[60].mxu1 %vm278_vm2, %v2056_v28  ;;  %1616 = vmatmul.mubr.msk.bf16.gmra.mrb[60].mxu0 %vm278_vm2, %v2069_v34 }
  0xd5   :  { %1667 = vmatprep.mubr.msk.bf16.mxu1 %vm1848_vm0, %v1847_v0  ;;  %1619 = vmatprep.mubr.msk.bf16.mxu0 %vm1848_vm0, %v1847_v0 }
  0xdc   :  { %1668 = vmatmul.mubr.msk.bf16.gmra.mrb[64].mxu1 %vm278_vm2, %v2072_v36  ;;  %1620 = vmatmul.mubr.msk.bf16.gmra.mrb[64].mxu0 %vm278_vm2, %v2079_v39 }
  0xdd   :  { %1671 = vmatprep.mubr.msk.bf16.mxu1 %vm1848_vm0, %v1847_v0  ;;  %1623 = vmatprep.mubr.msk.bf16.mxu0 %vm1848_vm0, %v1847_v0 }
  0xe4   :  { %1672 = vmatmul.mubr.msk.bf16.gmra.mrb[68].mxu1 %vm278_vm2, %v2082_v41  ;;  %1624 = vmatmul.mubr.msk.bf16.gmra.mrb[68].mxu0 %vm278_vm2, %v2095_v3 }
  0xe5   :  { %1675 = vmatprep.mubr.msk.bf16.mxu1 %vm1848_vm0, %v1847_v0  ;;  %1627 = vmatprep.mubr.msk.bf16.mxu0 %vm1848_vm0, %v1847_v0 }
  0xec   :  { %1676 = vmatmul.mubr.msk.bf16.gmra.mrb[72].mxu1 %vm278_vm2, %v2098_v5  ;;  %1628 = vmatmul.mubr.msk.bf16.gmra.mrb[72].mxu0 %vm278_vm2, %v2103_v6 }
  0xed   :  { %1679 = vmatprep.mubr.msk.bf16.mxu1 %vm1848_vm0, %v1847_v0  ;;  %1631 = vmatprep.mubr.msk.bf16.mxu0 %vm1848_vm0, %v1847_v0 }
  0xf4   :  { %1680 = vmatmul.mubr.msk.bf16.gmra.mrb[76].mxu1 %vm278_vm2, %v2106_v51  ;;  %1632 = vmatmul.mubr.msk.bf16.gmra.mrb[76].mxu0 %vm278_vm2, %v2111_v13 }
  0xf5   :  { %1683 = vmatprep.mubr.msk.bf16.mxu1 %vm1848_vm0, %v1847_v0  ;;  %1635 = vmatprep.mubr.msk.bf16.mxu0 %vm1848_vm0, %v1847_v0 }
  0xfc   :  { %1684 = vmatmul.mubr.msk.bf16.gmra.mrb[80].mxu1 %vm278_vm2, %v2124_v24  ;;  %1636 = vmatmul.mubr.msk.bf16.gmra.mrb[80].mxu0 %vm278_vm2, %v2121_v19 }
  0xfd   :  { %1687 = vmatprep.mubr.msk.bf16.mxu1 %vm1848_vm0, %v1847_v0  ;;  %1639 = vmatprep.mubr.msk.bf16.mxu0 %vm1848_vm0, %v1847_v0 }
 0x104   :  { %1688 = vmatmul.mubr.msk.bf16.gmra.mrb[84].mxu1 %vm278_vm2, %v2142_v52  ;;  %1640 = vmatmul.mubr.msk.bf16.gmra.mrb[84].mxu0 %vm278_vm2, %v2139_v33 }
 0x12f   :  { %v501_v35 = vpop.f32.mrb[0].mxu1  ;;  %v346_v8 = vpop.f32.mrb[0].mxu0 }
 0x130   :  { %v1553_v48 = vpop.f32.mrb[1].mxu1  ;;  %v2287_v9 = vadd.f32 %v501_v35, %v346_v8  ;;  %v1505_v12 = vpop.f32.mrb[1].mxu0 }
 0x131   :  { %v504_v56 = vpop.f32.mrb[2].mxu1  ;;  %v349_v14 = vpop.f32.mrb[2].mxu0 }
 0x132   :  { %v1554_v1 = vpop.f32.mrb[3].mxu1  ;;  %v2289_v21 = vadd.f32 %v504_v56, %v349_v14  ;;  %v1506_v22 = vpop.f32.mrb[3].mxu0 }
 0x137   :  { %v509_v26 = vpop.f32.mrb[4].mxu1  ;;  %v354_v36 = vpop.f32.mrb[4].mxu0 }
 0x138   :  { %v1557_v0 = vpop.f32.mrb[5].mxu1  ;;  %v2291_v39 = vadd.f32 %v509_v26, %v354_v36  ;;  %v1509_v41 = vpop.f32.mrb[5].mxu0 }
 0x139   :  { %v512_v28 = vpop.f32.mrb[6].mxu1  ;;  %v357_v43 = vpop.f32.mrb[6].mxu0 }
 0x13a   :  { %v1558_v34 = vpop.f32.mrb[7].mxu1  ;;  %v2293_v44 = vadd.f32 %v512_v28, %v357_v43  ;;  %v1510_v49 = vpop.f32.mrb[7].mxu0 }
 0x13f   :  { %v517_v50 = vpop.f32.mrb[8].mxu1  ;;  %v362_v3 = vpop.f32.mrb[8].mxu0 }
 0x140   :  { %v1561_v57 = vpop.f32.mrb[9].mxu1  ;;  %v2295_v5 = vadd.f32 %v517_v50, %v362_v3  ;;  %v1513_v6 = vpop.f32.mrb[9].mxu0 }
 0x141   :  { %v520_v61 = vpop.f32.mrb[10].mxu1  ;;  %v365_v7 = vpop.f32.mrb[10].mxu0 }
 0x142   :  { %v1562_v2 = vpop.f32.mrb[11].mxu1  ;;  %v2297_v51 = vadd.f32 %v520_v61, %v365_v7  ;;  %v1514_v47 = vpop.f32.mrb[11].mxu0 }
 0x147   :  { %v525_v10 = vpop.f32.mrb[12].mxu1  ;;  %v370_v17 = vpop.f32.mrb[12].mxu0 }
 0x148   :  { %v1565_v11 = vpop.f32.mrb[13].mxu1  ;;  %v2299_v18 = vadd.f32 %v525_v10, %v370_v17  ;;  %v1517_v19 = vpop.f32.mrb[13].mxu0 }
 0x149   :  { %v528_v13 = vpop.f32.mrb[14].mxu1  ;;  %v373_v20 = vpop.f32.mrb[14].mxu0 }
 0x14a   :  { %v1566_v15 = vpop.f32.mrb[15].mxu1  ;;  %v2301_v24 = vadd.f32 %v528_v13, %v373_v20  ;;  %v1518_v23 = vpop.f32.mrb[15].mxu0 }
 0x14f   :  { %v533_v54 = vpop.f32.mrb[16].mxu1  ;;  %v378_v30 = vpop.f32.mrb[16].mxu0 }
 0x150   :  { %v1569_v25 = vpop.f32.mrb[17].mxu1  ;;  %v2303_v31 = vadd.f32 %v533_v54, %v378_v30  ;;  %v1521_v32 = vpop.f32.mrb[17].mxu0 }
 0x151   :  { %v536_v27 = vpop.f32.mrb[18].mxu1  ;;  %v381_v33 = vpop.f32.mrb[18].mxu0 }
 0x152   :  { %v1570_v29 = vpop.f32.mrb[19].mxu1  ;;  %v2305_v52 = vadd.f32 %v536_v27, %v381_v33  ;;  %v1522_v38 = vpop.f32.mrb[19].mxu0 }
 0x157   :  { %v541_v53 = vpop.f32.mrb[20].mxu1  ;;  %v386_v42 = vpop.f32.mrb[20].mxu0 }
 0x158   :  { %v1573_v16 = vpop.f32.mrb[21].mxu1  ;;  %v2307_v58 = vadd.f32 %v541_v53, %v386_v42  ;;  %v1525_v59 = vpop.f32.mrb[21].mxu0 }
 0x159   :  { %v544_v37 = vpop.f32.mrb[22].mxu1  ;;  %v389_v45 = vpop.f32.mrb[22].mxu0 }
 0x15a   :  { %v1574_v55 = vpop.f32.mrb[23].mxu1  ;;  %v2309_v60 = vadd.f32 %v544_v37, %v389_v45  ;;  %v1526_v62 = vpop.f32.mrb[23].mxu0 }
 0x15f   :  { %v549_v63 = vpop.f32.mrb[24].mxu1  ;;  %v394_v35 = vpop.f32.mrb[24].mxu0 }
 0x160   :  { %v1577_v46 = vpop.f32.mrb[25].mxu1  ;;  %v2311_v48 = vadd.f32 %v549_v63, %v394_v35  ;;  %v1529_v56 = vpop.f32.mrb[25].mxu0 }
 0x161   :  { %v552_v40 = vpop.f32.mrb[26].mxu1  ;;  %v397_v1 = vpop.f32.mrb[26].mxu0  ;;  %v2332_v56 = vld [vmem:[#allocation8] ss:$0 sm:$0xff] }
 0x162   :  { %v1578_v4 = vpop.f32.mrb[27].mxu1  ;;  %v2313_v8 = vadd.f32 %v552_v40, %v397_v1  ;;  %v1530_v12 = vpop.f32.mrb[27].mxu0 }
 0x167   :  { %v557_v14 = vpop.f32.mrb[28].mxu1  ;;  %v402_v28 = vpop.f32.mrb[28].mxu0 }
 0x168   :  { %v1581_v22 = vpop.f32.mrb[29].mxu1  ;;  %v2315_v34 = vadd.f32 %v557_v14, %v402_v28  ;;  %v1533_v36 = vpop.f32.mrb[29].mxu0 }
 0x169   :  { %v560_v26 = vpop.f32.mrb[30].mxu1  ;;  %v405_v41 = vpop.f32.mrb[30].mxu0 }
 0x16a   :  { %v1582_v0 = vpop.f32.mrb[31].mxu1  ;;  %v2317_v43 = vadd.f32 %v560_v26, %v405_v41  ;;  %v1534_v49 = vpop.f32.mrb[31].mxu0 }
 0x16f   :  { %v565_v50 = vpop.f32.mrb[32].mxu1  ;;  %v410_v3 = vpop.f32.mrb[32].mxu0 }
 0x170   :  { %v1585_v57 = vpop.f32.mrb[33].mxu1  ;;  %v2319_v6 = vadd.f32 %v565_v50, %v410_v3  ;;  %v1537_v7 = vpop.f32.mrb[33].mxu0 }
 0x171   :  { %v568_v61 = vpop.f32.mrb[34].mxu1  ;;  %v413_v47 = vpop.f32.mrb[34].mxu0 }
 0x172   :  { %v1586_v2 = vpop.f32.mrb[35].mxu1  ;;  %v2321_v10 = vadd.f32 %v568_v61, %v413_v47  ;;  %v1538_v11 = vpop.f32.mrb[35].mxu0 }
 0x177   :  { %v573_v13 = vpop.f32.mrb[36].mxu1  ;;  %v418_v20 = vpop.f32.mrb[36].mxu0 }
 0x178   :  { %v1589_v15 = vpop.f32.mrb[37].mxu1  ;;  %v2323_v23 = vadd.f32 %v573_v13, %v418_v20  ;;  %v1541_v54 = vpop.f32.mrb[37].mxu0 }
 0x179   :  { %v576_v17 = vpop.f32.mrb[38].mxu1  ;;  %v421_v25 = vpop.f32.mrb[38].mxu0 }
 0x17a   :  { %v1590_v19 = vpop.f32.mrb[39].mxu1  ;;  %v2325_v27 = vadd.f32 %v576_v17, %v421_v25  ;;  %v1542_v29 = vpop.f32.mrb[39].mxu0 }
 0x17f   :  { %v581_v30 = vpop.f32.mrb[40].mxu1  ;;  %v426_v53 = vpop.f32.mrb[40].mxu0 }
 0x180   :  { %v1593_v32 = vpop.f32.mrb[41].mxu1  ;;  %v2327_v16 = vadd.f32 %v581_v30, %v426_v53  ;;  %v1545_v37 = vpop.f32.mrb[41].mxu0 }
 0x181   :  { %v584_v33 = vpop.f32.mrb[42].mxu1  ;;  %v429_v55 = vpop.f32.mrb[42].mxu0 }
 0x182   :  { %v1594_v38 = vpop.f32.mrb[43].mxu1  ;;  %v2329_v42 = vadd.f32 %v584_v33, %v429_v55  ;;  %v1546_v59 = vpop.f32.mrb[43].mxu0 }
 0x187   :  { %v939_v45 = vpop.f32.mrb[44].mxu1  ;;  %v722_v40 = vpop.f32.mrb[44].mxu0 }
 0x188   :  { %v1649_v62 = vpop.f32.mrb[45].mxu1  ;;  %v809_v4 = vadd.f32 %v722_v40, %v2287_v9  ;;  %v1601_v35 = vpop.f32.mrb[45].mxu0 }
 0x189   :  { %v942_v63 = vpop.f32.mrb[46].mxu1  ;;  %v725_v1 = vpop.f32.mrb[46].mxu0 }
 0x18a   :  { %v1650_v46 = vpop.f32.mrb[47].mxu1  ;;  %v1026_v12 = vadd.f32 %v939_v45, %v809_v4  ;;  %v810_v14 = vadd.f32 %v725_v1, %v2289_v21  ;;  %v1602_v22 = vpop.f32.mrb[47].mxu0 }
 0x18c   :  { %v1055_v0 = vadd.f32 %v2332_v56, %v1026_v12  ;;  %v1027_v28 = vadd.f32 %v942_v63, %v810_v14 }
 0x18e   :  { %v1099_v49 = vmul.f32 0.2, %v1055_v0  ;;  %v1056_v50 = vadd.f32 %v2332_v56, %v1027_v28  ;;  %vm1077_vm5 = vcmp.ge.f32.partialorder %v1055_v0, 0.0 }
 0x18f   :  { %v947_v26 = vpop.f32.mrb[48].mxu1  ;;  %v730_v9 = vpop.f32.mrb[48].mxu0 }
 0x190   :  { %v1653_v36 = vpop.f32.mrb[49].mxu1  ;;  %vm1078_vm6 = vcmp.ge.f32.partialorder %v1056_v50, 0.0  ;;  %v1100_v61 = vmul.f32 0.2, %v1056_v50  ;;  %v811_v2 = vadd.f32 %v730_v9, %v2291_v39  ;;  %v1605_v3 = vpop.f32.mrb[49].mxu0  ;;  %v1121_v21 = vsel %vm1077_vm5, %v1055_v0, %v1099_v49 }
 0x191   :  { %v950_v41 = vpop.f32.mrb[50].mxu1  ;;  %v733_v7 = vpop.f32.mrb[50].mxu0 }
 0x192   :  { %v1654_v57 = vpop.f32.mrb[51].mxu1  ;;  %v1122_v47 = vsel %vm1078_vm6, %v1056_v50, %v1100_v61  ;;  %v1028_v11 = vadd.f32 %v947_v26, %v811_v2  ;;  %v812_v13 = vadd.f32 %v733_v7, %v2293_v44  ;;  %v1606_v15 = vpop.f32.mrb[51].mxu0 }
 0x193   :  { %v1385_v17 = vpack.c.bf16 %v1122_v47, %v1121_v21 }
 0x194   :  { %v1057_v20 = vadd.f32 %v2332_v56, %v1028_v11  ;;  %v1029_v54 = vadd.f32 %v950_v41, %v812_v13 }
 0x195   :  { %1386 = vst [vmem:[#allocation10] sm:$0xff] %v1385_v17  }
 0x196   :  { %v1101_v30 = vmul.f32 0.2, %v1057_v20  ;;  %v1058_v32 = vadd.f32 %v2332_v56, %v1029_v54  ;;  %vm1079_vm7 = vcmp.ge.f32.partialorder %v1057_v20, 0.0 }
 0x197   :  { %v955_v19 = vpop.f32.mrb[52].mxu1  ;;  %v738_v33 = vpop.f32.mrb[52].mxu0 }
 0x198   :  { %v1657_v25 = vpop.f32.mrb[53].mxu1  ;;  %vm1080_vm8 = vcmp.ge.f32.partialorder %v1058_v32, 0.0  ;;  %v1102_v38 = vmul.f32 0.2, %v1058_v32  ;;  %v813_v53 = vadd.f32 %v738_v33, %v2295_v5  ;;  %v1609_v44 = vpop.f32.mrb[53].mxu0  ;;  %v1123_v55 = vsel %vm1079_vm7, %v1057_v20, %v1101_v30 }
 0x199   :  { %v958_v29 = vpop.f32.mrb[54].mxu1  ;;  %v741_v37 = vpop.f32.mrb[54].mxu0 }
 0x19a   :  { %v1658_v39 = vpop.f32.mrb[55].mxu1  ;;  %v1124_v59 = vsel %vm1080_vm8, %v1058_v32, %v1102_v38  ;;  %v1030_v45 = vadd.f32 %v955_v19, %v813_v53  ;;  %v814_v62 = vadd.f32 %v741_v37, %v2297_v51  ;;  %v1610_v63 = vpop.f32.mrb[55].mxu0 }
 0x19b   :  { %v1390_v46 = vpack.c.bf16 %v1124_v59, %v1123_v55 }
 0x19c   :  { %v1059_v4 = vadd.f32 %v2332_v56, %v1030_v45  ;;  %v1031_v35 = vadd.f32 %v958_v29, %v814_v62 }
 0x19d   :  { %1437 = vst [vmem:[#allocation10 + $0x8] sm:$0xff] %v1390_v46  }
 0x19e   :  { %v1103_v14 = vmul.f32 0.2, %v1059_v4  ;;  %v1060_v22 = vadd.f32 %v2332_v56, %v1031_v35  ;;  %vm1081_vm9 = vcmp.ge.f32.partialorder %v1059_v4, 0.0 }
 0x19f   :  { %v963_v40 = vpop.f32.mrb[56].mxu1  ;;  %v746_v26 = vpop.f32.mrb[56].mxu0 }
 0x1a0   :  { %v1661_v1 = vpop.f32.mrb[57].mxu1  ;;  %vm1082_vm10 = vcmp.ge.f32.partialorder %v1060_v22, 0.0  ;;  %v1104_v0 = vmul.f32 0.2, %v1060_v22  ;;  %v815_v28 = vadd.f32 %v746_v26, %v2299_v18  ;;  %v1613_v51 = vpop.f32.mrb[57].mxu0  ;;  %v1125_v41 = vsel %vm1081_vm9, %v1059_v4, %v1103_v14 }
 0x1a1   :  { %v966_v12 = vpop.f32.mrb[58].mxu1  ;;  %v749_v36 = vpop.f32.mrb[58].mxu0 }
 0x1a2   :  { %v1662_v5 = vpop.f32.mrb[59].mxu1  ;;  %v1126_v49 = vsel %vm1082_vm10, %v1060_v22, %v1104_v0  ;;  %v1032_v50 = vadd.f32 %v963_v40, %v815_v28  ;;  %v816_v57 = vadd.f32 %v749_v36, %v2301_v24  ;;  %v1614_v9 = vpop.f32.mrb[59].mxu0 }
 0x1a3   :  { %v1395_v61 = vpack.c.bf16 %v1126_v49, %v1125_v41 }
 0x1a4   :  { %v1061_v3 = vadd.f32 %v2332_v56, %v1032_v50  ;;  %v1033_v7 = vadd.f32 %v966_v12, %v816_v57 }
 0x1a5   :  { %1438 = vst [vmem:[#allocation10 + $0x10] sm:$0xff] %v1395_v61  }
 0x1a6   :  { %v1105_v11 = vmul.f32 0.2, %v1061_v3  ;;  %v1062_v13 = vadd.f32 %v2332_v56, %v1033_v7  ;;  %vm1083_vm11 = vcmp.ge.f32.partialorder %v1061_v3, 0.0 }
 0x1a7   :  { %v971_v2 = vpop.f32.mrb[60].mxu1  ;;  %v754_v15 = vpop.f32.mrb[60].mxu0 }
 0x1a8   :  { %v1665_v21 = vpop.f32.mrb[61].mxu1  ;;  %vm1084_vm12 = vcmp.ge.f32.partialorder %v1062_v13, 0.0  ;;  %v1106_v17 = vmul.f32 0.2, %v1062_v13  ;;  %v817_v19 = vadd.f32 %v754_v15, %v2303_v31  ;;  %v1617_v24 = vpop.f32.mrb[61].mxu0  ;;  %v1127_v54 = vsel %vm1083_vm11, %v1061_v3, %v1105_v11 }
 0x1a9   :  { %v974_v47 = vpop.f32.mrb[62].mxu1  ;;  %v757_v20 = vpop.f32.mrb[62].mxu0 }
 0x1aa   :  { %v1666_v18 = vpop.f32.mrb[63].mxu1  ;;  %v1128_v25 = vsel %vm1084_vm12, %v1062_v13, %v1106_v17  ;;  %v1034_v29 = vadd.f32 %v971_v2, %v817_v19  ;;  %v818_v30 = vadd.f32 %v757_v20, %v2305_v52  ;;  %v1618_v32 = vpop.f32.mrb[63].mxu0 }
 0x1ab   :  { %v1400_v39 = vpack.c.bf16 %v1128_v25, %v1127_v54 }
 0x1ac   :  { %v1063_v38 = vadd.f32 %v2332_v56, %v1034_v29  ;;  %v1035_v53 = vadd.f32 %v974_v47, %v818_v30 }
 0x1ad   :  { %1439 = vst [vmem:[#allocation10 + $0x18] sm:$0xff] %v1400_v39  }
 0x1ae   :  { %v1107_v55 = vmul.f32 0.2, %v1063_v38  ;;  %v1064_v59 = vadd.f32 %v2332_v56, %v1035_v53  ;;  %vm1085_vm13 = vcmp.ge.f32.partialorder %v1063_v38, 0.0 }
 0x1af   :  { %v979_v33 = vpop.f32.mrb[64].mxu1  ;;  %v762_v45 = vpop.f32.mrb[64].mxu0 }
 0x1b0   :  { %v1669_v44 = vpop.f32.mrb[65].mxu1  ;;  %vm1086_vm14 = vcmp.ge.f32.partialorder %v1064_v59, 0.0  ;;  %v1108_v62 = vmul.f32 0.2, %v1064_v59  ;;  %v819_v63 = vadd.f32 %v762_v45, %v2307_v58  ;;  %v1621_v52 = vpop.f32.mrb[65].mxu0  ;;  %v1129_v40 = vsel %vm1085_vm13, %v1063_v38, %v1107_v55 }
 0x1b1   :  { %v982_v37 = vpop.f32.mrb[66].mxu1  ;;  %v765_v46 = vpop.f32.mrb[66].mxu0 }
 0x1b2   :  { %v1670_v31 = vpop.f32.mrb[67].mxu1  ;;  %v1130_v4 = vsel %vm1086_vm14, %v1064_v59, %v1108_v62  ;;  %v1036_v35 = vadd.f32 %v979_v33, %v819_v63  ;;  %v820_v1 = vadd.f32 %v765_v46, %v2309_v60  ;;  %v1622_v12 = vpop.f32.mrb[67].mxu0 }
 0x1b3   :  { %v1405_v14 = vpack.c.bf16 %v1130_v4, %v1129_v40 }
 0x1b4   :  { %v1065_v5 = vadd.f32 %v2332_v56, %v1036_v35  ;;  %v1037_v26 = vadd.f32 %v982_v37, %v820_v1 }
 0x1b5   :  { %1440 = vst [vmem:[#allocation10 + $0x20] sm:$0xff] %v1405_v14  }
 0x1b6   :  { %v1109_v51 = vmul.f32 0.2, %v1065_v5  ;;  %v1066_v36 = vadd.f32 %v2332_v56, %v1037_v26  ;;  %vm1087_vm15 = vcmp.ge.f32.partialorder %v1065_v5, 0.0 }
 0x1b7   :  { %v987_v22 = vpop.f32.mrb[68].mxu1  ;;  %v770_v41 = vpop.f32.mrb[68].mxu0 }
 0x1b8   :  { %v1673_v0 = vpop.f32.mrb[69].mxu1  ;;  %vm1088_vm0 = vcmp.ge.f32.partialorder %v1066_v36, 0.0  ;;  %v1110_v49 = vmul.f32 0.2, %v1066_v36  ;;  %v821_v50 = vadd.f32 %v770_v41, %v2311_v48  ;;  %v1625_v60 = vpop.f32.mrb[69].mxu0  ;;  %v1131_v9 = vsel %vm1087_vm15, %v1065_v5, %v1109_v51 }
 0x1b9   :  { %v990_v28 = vpop.f32.mrb[70].mxu1  ;;  %v773_v57 = vpop.f32.mrb[70].mxu0 }
 0x1ba   :  { %v1674_v58 = vpop.f32.mrb[71].mxu1  ;;  %v1132_v61 = vsel %vm1088_vm0, %v1066_v36, %v1110_v49  ;;  %v1038_v2 = vadd.f32 %v987_v22, %v821_v50  ;;  %v822_v3 = vadd.f32 %v773_v57, %v2313_v8  ;;  %v1626_v7 = vpop.f32.mrb[71].mxu0 }
 0x1bb   :  { %v1410_v21 = vpack.c.bf16 %v1132_v61, %v1131_v9 }
 0x1bc   :  { %v1067_v11 = vadd.f32 %v2332_v56, %v1038_v2  ;;  %v1039_v13 = vadd.f32 %v990_v28, %v822_v3 }
 0x1bd   :  { %1441 = vst [vmem:[#allocation10 + $0x28] sm:$0xff] %v1410_v21  }
 0x1be   :  { %v1111_v17 = vmul.f32 0.2, %v1067_v11  ;;  %v1068_v19 = vadd.f32 %v2332_v56, %v1039_v13  ;;  %vm1089_vm1 = vcmp.ge.f32.partialorder %v1067_v11, 0.0 }
 0x1bf   :  { %v995_v47 = vpop.f32.mrb[72].mxu1  ;;  %v778_v24 = vpop.f32.mrb[72].mxu0 }
 0x1c0   :  { %v1677_v18 = vpop.f32.mrb[73].mxu1  ;;  %vm1090_vm2 = vcmp.ge.f32.partialorder %v1068_v19, 0.0  ;;  %v1112_v20 = vmul.f32 0.2, %v1068_v19  ;;  %v823_v54 = vadd.f32 %v778_v24, %v2315_v34  ;;  %v1629_v8 = vpop.f32.mrb[73].mxu0  ;;  %v1133_v29 = vsel %vm1089_vm1, %v1067_v11, %v1111_v17 }
 0x1c1   :  { %v998_v15 = vpop.f32.mrb[74].mxu1  ;;  %v781_v25 = vpop.f32.mrb[74].mxu0 }
 0x1c2   :  { %v1678_v48 = vpop.f32.mrb[75].mxu1  ;;  %v1134_v30 = vsel %vm1090_vm2, %v1068_v19, %v1112_v20  ;;  %v1040_v32 = vadd.f32 %v995_v47, %v823_v54  ;;  %v824_v39 = vadd.f32 %v781_v25, %v2317_v43  ;;  %v1630_v33 = vpop.f32.mrb[75].mxu0 }
 0x1c3   :  { %v1415_v38 = vpack.c.bf16 %v1134_v30, %v1133_v29 }
 0x1c4   :  { %v1069_v44 = vadd.f32 %v2332_v56, %v1040_v32  ;;  %v1041_v37 = vadd.f32 %v998_v15, %v824_v39 }
 0x1c5   :  { %1442 = vst [vmem:[#allocation10 + $0x30] sm:$0xff] %v1415_v38  }
 0x1c6   :  { %v1113_v31 = vmul.f32 0.2, %v1069_v44  ;;  %v1070_v45 = vadd.f32 %v2332_v56, %v1041_v37  ;;  %vm1091_vm3 = vcmp.ge.f32.partialorder %v1069_v44, 0.0 }
 0x1c7   :  { %v1003_v53 = vpop.f32.mrb[76].mxu1  ;;  %v786_v62 = vpop.f32.mrb[76].mxu0 }
 0x1c8   :  { %v1681_v55 = vpop.f32.mrb[77].mxu1  ;;  %vm1092_vm4 = vcmp.ge.f32.partialorder %v1070_v45, 0.0  ;;  %v1114_v63 = vmul.f32 0.2, %v1070_v45  ;;  %v825_v52 = vadd.f32 %v786_v62, %v2319_v6  ;;  %v1633_v43 = vpop.f32.mrb[77].mxu0  ;;  %v1135_v40 = vsel %vm1091_vm3, %v1069_v44, %v1113_v31 }
 0x1c9   :  { %v1006_v59 = vpop.f32.mrb[78].mxu1  ;;  %v789_v46 = vpop.f32.mrb[78].mxu0 }
 0x1ca   :  { %v1682_v34 = vpop.f32.mrb[79].mxu1  ;;  %v1136_v4 = vsel %vm1092_vm4, %v1070_v45, %v1114_v63  ;;  %v1042_v35 = vadd.f32 %v1003_v53, %v825_v52  ;;  %v826_v1 = vadd.f32 %v789_v46, %v2321_v10  ;;  %v1634_v12 = vpop.f32.mrb[79].mxu0 }
 0x1cb   :  { %v1420_v14 = vpack.c.bf16 %v1136_v4, %v1135_v40 }
 0x1cc   :  { %v1071_v5 = vadd.f32 %v2332_v56, %v1042_v35  ;;  %v1043_v26 = vadd.f32 %v1006_v59, %v826_v1 }
 0x1cd   :  { %1443 = vst [vmem:[#allocation10 + $0x38] sm:$0xff] %v1420_v14  }
 0x1ce   :  { %v1115_v51 = vmul.f32 0.2, %v1071_v5  ;;  %v1072_v36 = vadd.f32 %v2332_v56, %v1043_v26  ;;  %vm1093_vm5 = vcmp.ge.f32.partialorder %v1071_v5, 0.0 }
 0x1cf   :  { %v1011_v22 = vpop.f32.mrb[80].mxu1  ;;  %v794_v58 = vpop.f32.mrb[80].mxu0 }
 0x1d0   :  { %v1685_v0 = vpop.f32.mrb[81].mxu1  ;;  %vm1094_vm6 = vcmp.ge.f32.partialorder %v1072_v36, 0.0  ;;  %v1116_v41 = vmul.f32 0.2, %v1072_v36  ;;  %v827_v49 = vadd.f32 %v794_v58, %v2323_v23  ;;  %v1637_v10 = vpop.f32.mrb[81].mxu0  ;;  %v1137_v60 = vsel %vm1093_vm5, %v1071_v5, %v1115_v51 }
 0x1d1   :  { %v1014_v28 = vpop.f32.mrb[82].mxu1  ;;  %v797_v50 = vpop.f32.mrb[82].mxu0 }
 0x1d2   :  { %v1686_v6 = vpop.f32.mrb[83].mxu1  ;;  %v1138_v57 = vsel %vm1094_vm6, %v1072_v36, %v1116_v41  ;;  %v1044_v9 = vadd.f32 %v1011_v22, %v827_v49  ;;  %v828_v61 = vadd.f32 %v797_v50, %v2325_v27  ;;  %v1638_v2 = vpop.f32.mrb[83].mxu0 }
 0x1d3   :  { %v1425_v3 = vpack.c.bf16 %v1138_v57, %v1137_v60 }
 0x1d4   :  { %v1073_v21 = vadd.f32 %v2332_v56, %v1044_v9  ;;  %v1045_v47 = vadd.f32 %v1014_v28, %v828_v61 }
 0x1d5   :  { %1444 = vst [vmem:[#allocation10 + $0x40] sm:$0xff] %v1425_v3  }
 0x1d6   :  { %v1117_v18 = vmul.f32 0.2, %v1073_v21  ;;  %v1074_v15 = vadd.f32 %v2332_v56, %v1045_v47  ;;  %vm1095_vm7 = vcmp.ge.f32.partialorder %v1073_v21, 0.0 }
 0x1d7   :  { %v1019_v7 = vpop.f32.mrb[84].mxu1  ;;  %v802_v17 = vpop.f32.mrb[84].mxu0 }
 0x1d8   :  { %v1689_v11 = vpop.f32.mrb[85].mxu1  ;;  %vm1096_vm8 = vcmp.ge.f32.partialorder %v1074_v15, 0.0  ;;  %v1118_v19 = vmul.f32 0.2, %v1074_v15  ;;  %v829_v48 = vadd.f32 %v802_v17, %v2327_v16  ;;  %v1641_v27 = vpop.f32.mrb[85].mxu0  ;;  %v1139_v20 = vsel %vm1095_vm7, %v1073_v21, %v1117_v18 }
 0x1d9   :  { %v1022_v13 = vpop.f32.mrb[86].mxu1  ;;  %v805_v24 = vpop.f32.mrb[86].mxu0 }
 0x1da   :  { %v1690_v23 = vpop.f32.mrb[87].mxu1  ;;  %v1140_v54 = vsel %vm1096_vm8, %v1074_v15, %v1118_v19  ;;  %v1046_v8 = vadd.f32 %v1019_v7, %v829_v48  ;;  %v830_v25 = vadd.f32 %v805_v24, %v2329_v42  ;;  %v1642_v29 = vpop.f32.mrb[87].mxu0 }
 0x1db   :  { %v1430_v30 = vpack.c.bf16 %v1140_v54, %v1139_v20 }
 0x1dc   :  { %v1075_v32 = vadd.f32 %v2332_v56, %v1046_v8  ;;  %v1047_v39 = vadd.f32 %v1022_v13, %v830_v25 }
 0x1dd   :  { %1445 = vst [vmem:[#allocation10 + $0x48] sm:$0xff] %v1430_v30  }
 0x1de   :  { %v1119_v33 = vmul.f32 0.2, %v1075_v32  ;;  %v1076_v38 = vadd.f32 %v2332_v56, %v1047_v39  ;;  %vm1097_vm9 = vcmp.ge.f32.partialorder %v1075_v32, 0.0 }
 0x1e0   :  { %vm1098_vm10 = vcmp.ge.f32.partialorder %v1076_v38, 0.0  ;;  %v1120_v53 = vmul.f32 0.2, %v1076_v38  ;;  %v1141_v16 = vsel %vm1097_vm9, %v1075_v32, %v1119_v33 }
 0x1e2   :  { %v1142_v44 = vsel %vm1098_vm10, %v1076_v38, %v1120_v53 }
 0x1e3   :  { %v1435_v37 = vpack.c.bf16 %v1142_v44, %v1141_v16 }
 0x1e5   :  { %1446 = vst [vmem:[#allocation10 + $0x50] sm:$0xff] %v1435_v37  }
 0x1e6   :  { %1822 = shalt.err (!%p1819_p0)
}
 0x1e7   :  { %s1823_s22 = scalar_lea.hbm %s2396_s4, 1408 }
 0x1e8   :  { %p1824_p1 = scmp.ne.s32.totalorder %s2396_s4, %s1823_s22  ;;  %p1827_p2 = scmp.lt.u32.totalorder %s1823_s22, %s2396_s4 }
 0x1ea   :  { %p1829_p3 = pnand %p1827_p2, %p1824_p1 }
 0x1ec   :  { %1832 = shalt.err (!%p1829_p3)
}
 0x1ed   :  { %1264 = dma.vmem_to_hbm [thread:$0]  %s1259_s17, 1408, %s2396_s4, [#allocation4], %s1843_s5, %s1843_s5, %s1844_s6  }
 0x1ee   :  { %1839 = dma.done.wait [#allocation4], 1408  }
 0x1ef   :  { %1840 = vsyncadd [#allocation4], 4294965888 }
 0x1f0   :  { %1268 = vsyncpa [#allocation3], 1 }
 0x1f1   :  { %1269 = vsyncpa [#allocation6], 1 }
 0x1f2   :  { %1270 = vsyncpa [#allocation9], 1 }
 0x1f3   :  { %1271 = vsyncpa [#allocation4], 1 }

</bundles_post_ra>
